<compile_context>
chip_gen: v5e
topology: v5e:2x2
jax: 0.10.0
libtpu: 0.0.40
codegen_flags: <defaults>
</compile_context>

<pallas_src>
import numpy as np

import jax
import jax.numpy as jnp
from jax.experimental import pallas as pl
from jax.experimental.pallas import tpu as pltpu

# ---------------------------------------------------------------- configuration
B, L, D = 2, 8, 32          # batch, seq_len, d_model
D_FF = 4 * D                # d_ff = 4 * d_model (default)
ENC_LSTM = 1                # num GRU layers
STEP_LEN = 5                # series_decomp moving-average kernel size
LN_EPS = 1e-5

# ---- packed GRU buffer layout: (2*ENC_LSTM, GRU_ROWS, 3*GATE_LANES) ----------
GATE_LANES = 128            # one lane-aligned 128-lane block per gate [r,z,n]
GRU_LANES = 3 * GATE_LANES
G_WIH_R0 = 0                # rows [0, D)        : input->gates weights
G_WHH_R0 = D                # rows [D, 2D)       : hidden->gates weights
G_BIAS_R0 = 2 * D           # row 2D: bih + bhh[r,z] folded; row 2D+1: bhh[n]
GRU_ROWS = 2 * D + 2

# ---- packed misc buffer layout: (MISC_ROWS, MISC_LANES) ----------------------
MISC_LANES = 128
assert D_FF <= MISC_LANES
MISC_W1_R0 = 0                       # rows [0, D)        : conv1 weight (D, D_FF)
MISC_W2_R0 = MISC_W1_R0 + D          # rows [D, D+D_FF)   : conv2 weight (D_FF, D)
MISC_VEC_R0 = MISC_W2_R0 + D_FF      # rows +0..3: b1, b2, ln_gamma, ln_beta
MISC_A_R0 = MISC_VEC_R0 + 8          # rows [., .+L)      : (L,L) moving-avg matrix
MISC_ROWS = MISC_A_R0 + L

_VMEM_SPEC = pl.BlockSpec(memory_space=pltpu.MemorySpace.VMEM)


# ---------------------------------------------------------------- fused kernel
def _encoder_layer_kernel(x_ref, gru_ref, misc_ref, res_ref, hidden_ref):
    b, l, d = x_ref.shape
    f32 = jnp.float32
    gl = GATE_LANES

    x = x_ref[...]                                            # (B, L, D)

    # -------- unpack packed params (one-time, off the recurrence path) ------
    w1 = misc_ref[MISC_W1_R0:MISC_W1_R0 + d, 0:D_FF]          # (D, D_FF)
    w2 = misc_ref[MISC_W2_R0:MISC_W2_R0 + D_FF, 0:d]          # (D_FF, D)
    vecs = misc_ref[MISC_VEC_R0:MISC_VEC_R0 + 8, :]           # (8, 128)
    b1 = vecs[0:1, 0:D_FF]
    b2 = vecs[1:2, 0:d]
    gamma = vecs[2:3, 0:d]
    beta = vecs[3:4, 0:d]
    avg_mat = misc_ref[MISC_A_R0:MISC_A_R0 + l, 0:l]          # (L, L)
    avg_b = jnp.broadcast_to(avg_mat, (b, l, l))              # hoisted, used 2x

    # -------- series decomposition == constant averaging-matrix matmul ------
    def decomp(v):
        trend = jnp.einsum("bts,bsd->btd", avg_b, v,
                           preferred_element_type=f32)
        return v - trend, trend

    # -------- multi-layer GRU, fully unrolled, state kept in vregs ----------
    def run_gru_stack(inp, stack):
        cur = inp
        finals = []
        for layer in range(ENC_LSTM):
            blk = stack * ENC_LSTM + layer
            wih = gru_ref[blk, G_WIH_R0:G_WIH_R0 + d, :]      # (D, 3*128)
            whh = gru_ref[blk, G_WHH_R0:G_WHH_R0 + d, :]      # (D, 3*128)
            biases = gru_ref[blk, G_BIAS_R0:G_BIAS_R0 + 2, :]  # (2, 3*128)
            # Hoisted input projection for all timesteps; input bias and the
            # r/z parts of the hh bias are pre-folded into biases row 0.
            gi = (jnp.dot(cur.reshape(b * l, d), wih,
                          preferred_element_type=f32)
                  + biases[0:1, :]).reshape(b, l, 3 * gl)
            # n-gate hh bias: broadcast hoisted out of the unrolled loop.
            bhn = jnp.broadcast_to(biases[1:2, 2 * gl:], (b, gl))
            h = jnp.zeros((b, d), f32)
            steps = []
            for t in range(l):                                 # static unroll
                gi_t = gi[:, t, :]                             # (B, 3*128)
                gh = jnp.dot(h, whh, preferred_element_type=f32)
                # All gate slices fall on 128-lane vreg boundaries (free).
                rz = jax.nn.sigmoid(gi_t[:, :2 * gl] + gh[:, :2 * gl])
                r = rz[:, 0:gl]                                # (B, 128)
                z = rz[:, gl:gl + d]                           # (B, D)
                n = jnp.tanh(gi_t[:, 2 * gl:] + r * (gh[:, 2 * gl:] + bhn))
                n_d = n[:, 0:d]
                h = n_d + z * (h - n_d)                        # (1-z)*n + z*h
                steps.append(h)
            cur = jnp.stack(steps, axis=1)                     # (B, L, D)
            finals.append(h)
        return cur, finals

    # -------- attention (placeholder single-head SDPA, no projections) ------
    # TODO(synk): plug in the real injected attention module semantics if known.
    scale = 1.0 / (d ** 0.5)
    s = jnp.einsum("bqd,bkd->bqk", x, x, preferred_element_type=f32) * scale
    s = s - jnp.max(s, axis=-1, keepdims=True)
    p = jnp.exp(s)
    p = p / jnp.sum(p, axis=-1, keepdims=True)                 # exact (parity)
    new_x = jnp.einsum("bqk,bkd->bqd", p, x, preferred_element_type=f32)

    # -------- GRU (lstm) on x; final hidden state is an output --------------
    y1, finals0 = run_gru_stack(x, stack=0)
    hidden_ref[...] = jnp.stack(finals0, axis=0)               # (nl, B, D)

    # -------- gate: x1 = new_x + softmax(y1) * x + x  (dropout == identity) --
    sm = jnp.exp(y1 - jnp.max(y1, axis=-1, keepdims=True))
    sm = sm / jnp.sum(sm, axis=-1, keepdims=True)
    x1 = new_x + sm * x + x

    # -------- decomp1 --------------------------------------------------------
    x_seas, trend1 = decomp(x1)

    # -------- norm1 + pointwise-conv FFN (k=1 conv == linear over features) --
    s2 = (x_seas + new_x).reshape(b * l, d)
    mu = jnp.mean(s2, axis=-1, keepdims=True)
    var = jnp.mean((s2 - mu) ** 2, axis=-1, keepdims=True)
    yn = (s2 - mu) * jax.lax.rsqrt(var + LN_EPS) * gamma + beta
    hdd = jnp.maximum(jnp.dot(yn, w1, preferred_element_type=f32) + b1, 0.0)
    y = (jnp.dot(hdd, w2, preferred_element_type=f32) + b2).reshape(b, l, d)

    # -------- decomp2 + trend GRU + output -----------------------------------
    res, trend2 = decomp(x_seas + y)
    y1b, _ = run_gru_stack(trend1 + trend2, stack=1)
    res_ref[...] = (res + y1b) * 0.5


# ---------------------------------------------------------------- wrapper
@jax.jit
def encoder_layer_forward(x, gru_buf, misc_buf):
    b, l, d = x.shape
    nl = gru_buf.shape[0] // 2
    return pl.pallas_call(
        _encoder_layer_kernel,
        out_shape=(jax.ShapeDtypeStruct((b, l, d), jnp.float32),
                   jax.ShapeDtypeStruct((nl, b, d), jnp.float32)),
        in_specs=[_VMEM_SPEC, _VMEM_SPEC, _VMEM_SPEC],
        out_specs=(_VMEM_SPEC, _VMEM_SPEC),
    )(x, gru_buf, misc_buf)


# ---------------------------------------------------------------- parameters
def make_params(key):
    """'Natural' params: fused-gate (D, 3D) GRU weights (== torch w_ih.T)."""
    ks = iter(jax.random.split(key, 32))
    bound = 1.0 / (D ** 0.5)

    def uniform(shape, bnd=bound):
        return jax.random.uniform(next(ks), shape, jnp.float32, -bnd, bnd)

    def gru_stack():
        return [dict(wih=uniform((D, 3 * D)), whh=uniform((D, 3 * D)),
                     bih=uniform((3 * D,)), bhh=uniform((3 * D,)))
                for _ in range(ENC_LSTM)]

    return {
        "gru0": gru_stack(),
        "gru1": gru_stack(),
        "w1": uniform((D, D_FF)),
        "b1": uniform((D_FF,)),
        "w2": uniform((D_FF, D), 1.0 / (D_FF ** 0.5)),
        "b2": uniform((D,), 1.0 / (D_FF ** 0.5)),
        "ln_gamma": jnp.ones((D,), jnp.float32),
        "ln_beta": jnp.zeros((D,), jnp.float32),
    }


def _pad_gate_cols(w):
    """(rows, 3*D) fused [r,z,n] -> (rows, 3*128): gate g in lanes
    [g*128, g*128+D), rest zero, so gate slices are vreg-aligned."""
    rows = w.shape[0]
    w3 = w.reshape(rows, 3, D)
    out = jnp.zeros((rows, 3, GATE_LANES), jnp.float32)
    out = out.at[:, :, :D].set(w3)
    return out.reshape(rows, 3 * GATE_LANES)


def _moving_avg_matrix(length, kernel_size):
    """A with (A @ v) == replicate-pad moving average (stride 1)."""
    front = (kernel_size - 1) // 2
    a = np.zeros((length, length), np.float32)
    for t in range(length):
        for j in range(kernel_size):
            s = min(max(t - front + j, 0), length - 1)
            a[t, s] += 1.0 / kernel_size
    return jnp.asarray(a)


def pack_params(p):
    """Pack everything into two lane-aligned f32 buffers (2 DMAs total)."""
    blocks = []
    for stack in ("gru0", "gru1"):
        for lp in p[stack]:
            wih = _pad_gate_cols(lp["wih"])
            whh = _pad_gate_cols(lp["whh"])
            bih = _pad_gate_cols(lp["bih"][None, :])
            bhh = _pad_gate_cols(lp["bhh"][None, :])
            # Fold bhh's r/z blocks into the hoisted input bias; keep the n
            # block separate (it is multiplied by r inside the step).
            bi_fold = bih.at[:, :2 * GATE_LANES].add(bhh[:, :2 * GATE_LANES])
            bhn_row = jnp.zeros_like(bhh).at[:, 2 * GATE_LANES:].set(
                bhh[:, 2 * GATE_LANES:])
            blocks.append(jnp.concatenate([wih, whh, bi_fold, bhn_row], axis=0))
    gru_buf = jnp.stack(blocks, axis=0)                 # (2*ENC_LSTM, 66, 384)
    assert gru_buf.shape == (2 * ENC_LSTM, GRU_ROWS, GRU_LANES)

    misc = jnp.zeros((MISC_ROWS, MISC_LANES), jnp.float32)
    misc = misc.at[MISC_W1_R0:MISC_W1_R0 + D, :D_FF].set(p["w1"])
    misc = misc.at[MISC_W2_R0:MISC_W2_R0 + D_FF, :D].set(p["w2"])
    misc = misc.at[MISC_VEC_R0 + 0, :D_FF].set(p["b1"])
    misc = misc.at[MISC_VEC_R0 + 1, :D].set(p["b2"])
    misc = misc.at[MISC_VEC_R0 + 2, :D].set(p["ln_gamma"])
    misc = misc.at[MISC_VEC_R0 + 3, :D].set(p["ln_beta"])
    misc = misc.at[MISC_A_R0:MISC_A_R0 + L, :L].set(
        _moving_avg_matrix(L, STEP_LEN))
    return gru_buf, misc


# ---------------------------------------------------------------- pure-JAX reference
def reference_forward(x, p):
    """Same (eval-mode, placeholder-attention) semantics; HIGHEST precision."""
    hi = jax.lax.Precision.HIGHEST
    b, l, d = x.shape
    f32 = jnp.float32

    def gru_stack(inp, layers):
        cur, finals = inp, []
        for lp in layers:
            h = jnp.zeros((b, d), f32)
            outs = []
            for t in range(l):
                gi = jnp.dot(cur[:, t, :], lp["wih"], precision=hi) + lp["bih"]
                gh = jnp.dot(h, lp["whh"], precision=hi) + lp["bhh"]
                r = jax.nn.sigmoid(gi[:, :d] + gh[:, :d])
                z = jax.nn.sigmoid(gi[:, d:2 * d] + gh[:, d:2 * d])
                n = jnp.tanh(gi[:, 2 * d:] + r * gh[:, 2 * d:])
                h = (1.0 - z) * n + z * h
                outs.append(h)
            cur = jnp.stack(outs, axis=1)
            finals.append(h)
        return cur, jnp.stack(finals, axis=0)

    def decomp(v):
        front, back = (STEP_LEN - 1) // 2, STEP_LEN // 2
        padded = jnp.concatenate(
            [jnp.repeat(v[:, :1], front, axis=1), v,
             jnp.repeat(v[:, -1:], back, axis=1)], axis=1)
        trend = jnp.mean(
            jnp.stack([padded[:, i:i + l] for i in range(STEP_LEN)], 0), 0)
        return v - trend, trend

    s = jnp.einsum("bqd,bkd->bqk", x, x, precision=hi) / (d ** 0.5)
    new_x = jnp.einsum("bqk,bkd->bqd", jax.nn.softmax(s, -1), x, precision=hi)

    y1, hidden = gru_stack(x, p["gru0"])
    x1 = new_x + jax.nn.softmax(y1, axis=-1) * x + x
    x_seas, trend1 = decomp(x1)

    z2 = x_seas + new_x
    mu = jnp.mean(z2, axis=-1, keepdims=True)
    var = jnp.mean((z2 - mu) ** 2, axis=-1, keepdims=True)
    yn = (z2 - mu) / jnp.sqrt(var + LN_EPS) * p["ln_gamma"] + p["ln_beta"]
    hdd = jax.nn.relu(jnp.einsum("bld,df->blf", yn, p["w1"], precision=hi)
                      + p["b1"])
    y = jnp.einsum("blf,fd->bld", hdd, p["w2"], precision=hi) + p["b2"]

    res, trend2 = decomp(x_seas + y)
    y1b, _ = gru_stack(trend1 + trend2, p["gru1"])
    return (res + y1b) * 0.5, hidden


# ---------------------------------------------------------------- main
if __name__ == "__main__":
    key = jax.random.PRNGKey(0)
    k_x, k_p = jax.random.split(key)
    x = jax.random.normal(k_x, (B, L, D), jnp.float32)
    params = make_params(k_p)
    gru_buf, misc_buf = pack_params(params)

    res, hidden = encoder_layer_forward(x, gru_buf, misc_buf)
    jax.block_until_ready((res, hidden))

    assert res.shape == (B, L, D)
    assert hidden.shape == (ENC_LSTM, B, D)
    assert bool(jnp.all(jnp.isfinite(res)))
    assert bool(jnp.all(jnp.isfinite(hidden)))

    # Numerical check vs pure-JAX reference of the same semantics (loose
    # tolerance to absorb MXU f32-pass differences; catches packing bugs).
    res_r, hid_r = jax.jit(reference_forward)(x, params)
    assert bool(jnp.allclose(res, res_r, atol=3e-2, rtol=3e-2)), (
        float(jnp.max(jnp.abs(res - res_r))))
    assert bool(jnp.allclose(hidden, hid_r, atol=3e-2, rtol=3e-2)), (
        float(jnp.max(jnp.abs(hidden - hid_r))))
    print("KERNEL_OK")
</pallas_src>

<mosaic_0001>
module attributes {stable_mosaic.version = 11 : i64} {
  func.func @_encoder_layer_kernel(%arg0: memref<2x8x32xf32, #tpu.memory_space<vmem>>, %arg1: memref<2x66x384xf32, #tpu.memory_space<vmem>>, %arg2: memref<176x128xf32, #tpu.memory_space<vmem>>, %arg3: memref<2x8x32xf32, #tpu.memory_space<vmem>>, %arg4: memref<1x2x32xf32, #tpu.memory_space<vmem>>) attributes {dimension_semantics = [], scalar_prefetch = 0 : i64, scratch_operands = 0 : i64, tpu.core_type = #tpu.core_type<tc>} {
    %c0 = arith.constant 0 : index
    %c0_0 = arith.constant 0 : index
    %c0_1 = arith.constant 0 : index
    %0 = vector.load %arg0[%c0, %c0_0, %c0_1] : memref<2x8x32xf32, #tpu.memory_space<vmem>>, vector<2x8x32xf32>
    %c0_2 = arith.constant 0 : index
    %c0_3 = arith.constant 0 : index
    %1 = vector.load %arg2[%c0_2, %c0_3] : memref<176x128xf32, #tpu.memory_space<vmem>>, vector<32x128xf32>
    %c32 = arith.constant 32 : index
    %c0_4 = arith.constant 0 : index
    %2 = vector.load %arg2[%c32, %c0_4] : memref<176x128xf32, #tpu.memory_space<vmem>>, vector<128x32xf32>
    %c160 = arith.constant 160 : index
    %c0_5 = arith.constant 0 : index
    %3 = vector.load %arg2[%c160, %c0_5] : memref<176x128xf32, #tpu.memory_space<vmem>>, vector<8x128xf32>
    %4 = vector.extract_strided_slice %3 {offsets = [0, 0], sizes = [1, 128], strides = [1, 1]} : vector<8x128xf32> to vector<1x128xf32>
    %5 = vector.extract_strided_slice %3 {offsets = [1, 0], sizes = [1, 32], strides = [1, 1]} : vector<8x128xf32> to vector<1x32xf32>
    %6 = vector.extract_strided_slice %3 {offsets = [2, 0], sizes = [1, 32], strides = [1, 1]} : vector<8x128xf32> to vector<1x32xf32>
    %7 = vector.extract_strided_slice %3 {offsets = [3, 0], sizes = [1, 32], strides = [1, 1]} : vector<8x128xf32> to vector<1x32xf32>
    %c168 = arith.constant 168 : index
    %c0_6 = arith.constant 0 : index
    %8 = vector.load %arg2[%c168, %c0_6] : memref<176x128xf32, #tpu.memory_space<vmem>>, vector<8x8xf32>
    %9 = vector.shape_cast %8 : vector<8x8xf32> to vector<1x8x8xf32>
    %10 = vector.broadcast %9 : vector<1x8x8xf32> to vector<2x8x8xf32>
    "tpu.trace_start"() <{level = 10 : i32, message = "bqd,bkd->bqk"}> : () -> ()
    %cst = arith.constant dense<0.000000e+00> : vector<2x8x8xf32>
    %11 = tpu.matmul %0, %0, %cst {dimension_numbers = #tpu.dot_dimension_numbers<[2], [2], [1], [1], [0, 0, 0, 1, 1, 1], [0], [0]>} : vector<2x8x32xf32>, vector<2x8x32xf32>, vector<2x8x8xf32> -> vector<2x8x8xf32>
    "tpu.trace_stop"() : () -> ()
    %cst_7 = arith.constant 0.176776692 : f32
    %12 = vector.broadcast %cst_7 : f32 to vector<2x8x8xf32>
    %13 = arith.mulf %11, %12 : vector<2x8x8xf32>
    %cst_8 = arith.constant dense<0xFF800000> : vector<2x8xf32>
    %14 = vector.multi_reduction <maximumf>, %13, %cst_8 [2] : vector<2x8x8xf32> to vector<2x8xf32>
    %15 = vector.shape_cast %14 : vector<2x8xf32> to vector<2x8x1xf32>
    %16 = vector.broadcast %15 : vector<2x8x1xf32> to vector<2x8x8xf32>
    %17 = arith.subf %13, %16 : vector<2x8x8xf32>
    %18 = math.exp %17 : vector<2x8x8xf32>
    %cst_9 = arith.constant dense<0.000000e+00> : vector<2x8xf32>
    %19 = vector.multi_reduction <add>, %18, %cst_9 [2] : vector<2x8x8xf32> to vector<2x8xf32>
    %20 = vector.shape_cast %19 : vector<2x8xf32> to vector<2x8x1xf32>
    %21 = vector.broadcast %20 : vector<2x8x1xf32> to vector<2x8x8xf32>
    %22 = arith.divf %18, %21 : vector<2x8x8xf32>
    "tpu.trace_start"() <{level = 10 : i32, message = "bqk,bkd->bqd"}> : () -> ()
    %cst_10 = arith.constant dense<0.000000e+00> : vector<2x8x32xf32>
    %23 = tpu.matmul %22, %0, %cst_10 {dimension_numbers = #tpu.dot_dimension_numbers<[2], [1], [1], [2], [0, 0, 0, 1, 1, 2], [0], [0]>} : vector<2x8x8xf32>, vector<2x8x32xf32>, vector<2x8x32xf32> -> vector<2x8x32xf32>
    "tpu.trace_stop"() : () -> ()
    %c0_11 = arith.constant 0 : index
    %c0_12 = arith.constant 0 : index
    %c0_13 = arith.constant 0 : index
    %24 = vector.load %arg1[%c0_11, %c0_12, %c0_13] : memref<2x66x384xf32, #tpu.memory_space<vmem>>, vector<1x32x384xf32>
    %25 = vector.shape_cast %24 : vector<1x32x384xf32> to vector<32x384xf32>
    %c0_14 = arith.constant 0 : index
    %c32_15 = arith.constant 32 : index
    %c0_16 = arith.constant 0 : index
    %26 = vector.load %arg1[%c0_14, %c32_15, %c0_16] : memref<2x66x384xf32, #tpu.memory_space<vmem>>, vector<1x32x384xf32>
    %27 = vector.shape_cast %26 : vector<1x32x384xf32> to vector<32x384xf32>
    %c0_17 = arith.constant 0 : index
    %c64 = arith.constant 64 : index
    %c0_18 = arith.constant 0 : index
    %28 = vector.load %arg1[%c0_17, %c64, %c0_18] : memref<2x66x384xf32, #tpu.memory_space<vmem>>, vector<1x2x384xf32>
    %29 = vector.shape_cast %28 : vector<1x2x384xf32> to vector<2x384xf32>
    %30 = vector.shape_cast %0 : vector<2x8x32xf32> to vector<16x32xf32>
    %cst_19 = arith.constant dense<0.000000e+00> : vector<16x384xf32>
    %31 = tpu.matmul %30, %25, %cst_19 {dimension_numbers = #tpu.dot_dimension_numbers<[1], [0], [0], [1], [0, 0, 1, 1], [], []>} : vector<16x32xf32>, vector<32x384xf32>, vector<16x384xf32> -> vector<16x384xf32>
    %32 = vector.extract_strided_slice %29 {offsets = [0, 0], sizes = [1, 384], strides = [1, 1]} : vector<2x384xf32> to vector<1x384xf32>
    %33 = vector.broadcast %32 : vector<1x384xf32> to vector<16x384xf32>
    %34 = arith.addf %31, %33 : vector<16x384xf32>
    %35 = vector.shape_cast %34 : vector<16x384xf32> to vector<2x8x384xf32>
    %36 = vector.extract_strided_slice %29 {offsets = [1, 256], sizes = [1, 128], strides = [1, 1]} : vector<2x384xf32> to vector<1x128xf32>
    %37 = vector.shape_cast %36 : vector<1x128xf32> to vector<1x128xf32>
    %38 = vector.broadcast %37 : vector<1x128xf32> to vector<2x128xf32>
    %cst_20 = arith.constant 0.000000e+00 : f32
    %39 = vector.broadcast %cst_20 : f32 to vector<2x32xf32>
    %40 = vector.extract_strided_slice %35 {offsets = [0, 0, 0], sizes = [2, 1, 384], strides = [1, 1, 1]} : vector<2x8x384xf32> to vector<2x1x384xf32>
    %41 = vector.shape_cast %40 : vector<2x1x384xf32> to vector<2x384xf32>
    %cst_21 = arith.constant dense<0.000000e+00> : vector<2x384xf32>
    %42 = tpu.matmul %39, %27, %cst_21 {dimension_numbers = #tpu.dot_dimension_numbers<[1], [0], [0], [1], [0, 0, 1, 1], [], []>} : vector<2x32xf32>, vector<32x384xf32>, vector<2x384xf32> -> vector<2x384xf32>
    %43 = vector.extract_strided_slice %41 {offsets = [0, 0], sizes = [2, 256], strides = [1, 1]} : vector<2x384xf32> to vector<2x256xf32>
    %44 = vector.extract_strided_slice %42 {offsets = [0, 0], sizes = [2, 256], strides = [1, 1]} : vector<2x384xf32> to vector<2x256xf32>
    %45 = arith.addf %43, %44 : vector<2x256xf32>
    %46 = arith.negf %45 : vector<2x256xf32>
    %47 = math.exp %46 : vector<2x256xf32>
    %cst_22 = arith.constant 1.000000e+00 : f32
    %48 = vector.broadcast %cst_22 : f32 to vector<2x256xf32>
    %49 = arith.addf %48, %47 : vector<2x256xf32>
    %50 = arith.divf %48, %49 : vector<2x256xf32>
    %51 = vector.extract_strided_slice %50 {offsets = [0, 0], sizes = [2, 128], strides = [1, 1]} : vector<2x256xf32> to vector<2x128xf32>
    %52 = vector.extract_strided_slice %50 {offsets = [0, 128], sizes = [2, 32], strides = [1, 1]} : vector<2x256xf32> to vector<2x32xf32>
    %53 = vector.extract_strided_slice %41 {offsets = [0, 256], sizes = [2, 128], strides = [1, 1]} : vector<2x384xf32> to vector<2x128xf32>
    %54 = vector.extract_strided_slice %42 {offsets = [0, 256], sizes = [2, 128], strides = [1, 1]} : vector<2x384xf32> to vector<2x128xf32>
    %55 = arith.addf %54, %38 : vector<2x128xf32>
    %56 = arith.mulf %51, %55 : vector<2x128xf32>
    %57 = arith.addf %53, %56 : vector<2x128xf32>
    %58 = math.tanh %57 : vector<2x128xf32>
    %59 = vector.extract_strided_slice %58 {offsets = [0, 0], sizes = [2, 32], strides = [1, 1]} : vector<2x128xf32> to vector<2x32xf32>
    %60 = arith.subf %39, %59 : vector<2x32xf32>
    %61 = arith.mulf %52, %60 : vector<2x32xf32>
    %62 = arith.addf %59, %61 : vector<2x32xf32>
    %63 = vector.extract_strided_slice %35 {offsets = [0, 1, 0], sizes = [2, 1, 384], strides = [1, 1, 1]} : vector<2x8x384xf32> to vector<2x1x384xf32>
    %64 = vector.shape_cast %63 : vector<2x1x384xf32> to vector<2x384xf32>
    %cst_23 = arith.constant dense<0.000000e+00> : vector<2x384xf32>
    %65 = tpu.matmul %62, %27, %cst_23 {dimension_numbers = #tpu.dot_dimension_numbers<[1], [0], [0], [1], [0, 0, 1, 1], [], []>} : vector<2x32xf32>, vector<32x384xf32>, vector<2x384xf32> -> vector<2x384xf32>
    %66 = vector.extract_strided_slice %64 {offsets = [0, 0], sizes = [2, 256], strides = [1, 1]} : vector<2x384xf32> to vector<2x256xf32>
    %67 = vector.extract_strided_slice %65 {offsets = [0, 0], sizes = [2, 256], strides = [1, 1]} : vector<2x384xf32> to vector<2x256xf32>
    %68 = arith.addf %66, %67 : vector<2x256xf32>
    %69 = arith.negf %68 : vector<2x256xf32>
    %70 = math.exp %69 : vector<2x256xf32>
    %cst_24 = arith.constant 1.000000e+00 : f32
    %71 = vector.broadcast %cst_24 : f32 to vector<2x256xf32>
    %72 = arith.addf %71, %70 : vector<2x256xf32>
    %73 = arith.divf %71, %72 : vector<2x256xf32>
    %74 = vector.extract_strided_slice %73 {offsets = [0, 0], sizes = [2, 128], strides = [1, 1]} : vector<2x256xf32> to vector<2x128xf32>
    %75 = vector.extract_strided_slice %73 {offsets = [0, 128], sizes = [2, 32], strides = [1, 1]} : vector<2x256xf32> to vector<2x32xf32>
    %76 = vector.extract_strided_slice %64 {offsets = [0, 256], sizes = [2, 128], strides = [1, 1]} : vector<2x384xf32> to vector<2x128xf32>
    %77 = vector.extract_strided_slice %65 {offsets = [0, 256], sizes = [2, 128], strides = [1, 1]} : vector<2x384xf32> to vector<2x128xf32>
    %78 = arith.addf %77, %38 : vector<2x128xf32>
    %79 = arith.mulf %74, %78 : vector<2x128xf32>
    %80 = arith.addf %76, %79 : vector<2x128xf32>
    %81 = math.tanh %80 : vector<2x128xf32>
    %82 = vector.extract_strided_slice %81 {offsets = [0, 0], sizes = [2, 32], strides = [1, 1]} : vector<2x128xf32> to vector<2x32xf32>
    %83 = arith.subf %62, %82 : vector<2x32xf32>
    %84 = arith.mulf %75, %83 : vector<2x32xf32>
    %85 = arith.addf %82, %84 : vector<2x32xf32>
    %86 = vector.extract_strided_slice %35 {offsets = [0, 2, 0], sizes = [2, 1, 384], strides = [1, 1, 1]} : vector<2x8x384xf32> to vector<2x1x384xf32>
    %87 = vector.shape_cast %86 : vector<2x1x384xf32> to vector<2x384xf32>
    %cst_25 = arith.constant dense<0.000000e+00> : vector<2x384xf32>
    %88 = tpu.matmul %85, %27, %cst_25 {dimension_numbers = #tpu.dot_dimension_numbers<[1], [0], [0], [1], [0, 0, 1, 1], [], []>} : vector<2x32xf32>, vector<32x384xf32>, vector<2x384xf32> -> vector<2x384xf32>
    %89 = vector.extract_strided_slice %87 {offsets = [0, 0], sizes = [2, 256], strides = [1, 1]} : vector<2x384xf32> to vector<2x256xf32>
    %90 = vector.extract_strided_slice %88 {offsets = [0, 0], sizes = [2, 256], strides = [1, 1]} : vector<2x384xf32> to vector<2x256xf32>
    %91 = arith.addf %89, %90 : vector<2x256xf32>
    %92 = arith.negf %91 : vector<2x256xf32>
    %93 = math.exp %92 : vector<2x256xf32>
    %cst_26 = arith.constant 1.000000e+00 : f32
    %94 = vector.broadcast %cst_26 : f32 to vector<2x256xf32>
    %95 = arith.addf %94, %93 : vector<2x256xf32>
    %96 = arith.divf %94, %95 : vector<2x256xf32>
    %97 = vector.extract_strided_slice %96 {offsets = [0, 0], sizes = [2, 128], strides = [1, 1]} : vector<2x256xf32> to vector<2x128xf32>
    %98 = vector.extract_strided_slice %96 {offsets = [0, 128], sizes = [2, 32], strides = [1, 1]} : vector<2x256xf32> to vector<2x32xf32>
    %99 = vector.extract_strided_slice %87 {offsets = [0, 256], sizes = [2, 128], strides = [1, 1]} : vector<2x384xf32> to vector<2x128xf32>
    %100 = vector.extract_strided_slice %88 {offsets = [0, 256], sizes = [2, 128], strides = [1, 1]} : vector<2x384xf32> to vector<2x128xf32>
    %101 = arith.addf %100, %38 : vector<2x128xf32>
    %102 = arith.mulf %97, %101 : vector<2x128xf32>
    %103 = arith.addf %99, %102 : vector<2x128xf32>
    %104 = math.tanh %103 : vector<2x128xf32>
    %105 = vector.extract_strided_slice %104 {offsets = [0, 0], sizes = [2, 32], strides = [1, 1]} : vector<2x128xf32> to vector<2x32xf32>
    %106 = arith.subf %85, %105 : vector<2x32xf32>
    %107 = arith.mulf %98, %106 : vector<2x32xf32>
    %108 = arith.addf %105, %107 : vector<2x32xf32>
    %109 = vector.extract_strided_slice %35 {offsets = [0, 3, 0], sizes = [2, 1, 384], strides = [1, 1, 1]} : vector<2x8x384xf32> to vector<2x1x384xf32>
    %110 = vector.shape_cast %109 : vector<2x1x384xf32> to vector<2x384xf32>
    %cst_27 = arith.constant dense<0.000000e+00> : vector<2x384xf32>
    %111 = tpu.matmul %108, %27, %cst_27 {dimension_numbers = #tpu.dot_dimension_numbers<[1], [0], [0], [1], [0, 0, 1, 1], [], []>} : vector<2x32xf32>, vector<32x384xf32>, vector<2x384xf32> -> vector<2x384xf32>
    %112 = vector.extract_strided_slice %110 {offsets = [0, 0], sizes = [2, 256], strides = [1, 1]} : vector<2x384xf32> to vector<2x256xf32>
    %113 = vector.extract_strided_slice %111 {offsets = [0, 0], sizes = [2, 256], strides = [1, 1]} : vector<2x384xf32> to vector<2x256xf32>
    %114 = arith.addf %112, %113 : vector<2x256xf32>
    %115 = arith.negf %114 : vector<2x256xf32>
    %116 = math.exp %115 : vector<2x256xf32>
    %cst_28 = arith.constant 1.000000e+00 : f32
    %117 = vector.broadcast %cst_28 : f32 to vector<2x256xf32>
    %118 = arith.addf %117, %116 : vector<2x256xf32>
    %119 = arith.divf %117, %118 : vector<2x256xf32>
    %120 = vector.extract_strided_slice %119 {offsets = [0, 0], sizes = [2, 128], strides = [1, 1]} : vector<2x256xf32> to vector<2x128xf32>
    %121 = vector.extract_strided_slice %119 {offsets = [0, 128], sizes = [2, 32], strides = [1, 1]} : vector<2x256xf32> to vector<2x32xf32>
    %122 = vector.extract_strided_slice %110 {offsets = [0, 256], sizes = [2, 128], strides = [1, 1]} : vector<2x384xf32> to vector<2x128xf32>
    %123 = vector.extract_strided_slice %111 {offsets = [0, 256], sizes = [2, 128], strides = [1, 1]} : vector<2x384xf32> to vector<2x128xf32>
    %124 = arith.addf %123, %38 : vector<2x128xf32>
    %125 = arith.mulf %120, %124 : vector<2x128xf32>
    %126 = arith.addf %122, %125 : vector<2x128xf32>
    %127 = math.tanh %126 : vector<2x128xf32>
    %128 = vector.extract_strided_slice %127 {offsets = [0, 0], sizes = [2, 32], strides = [1, 1]} : vector<2x128xf32> to vector<2x32xf32>
    %129 = arith.subf %108, %128 : vector<2x32xf32>
    %130 = arith.mulf %121, %129 : vector<2x32xf32>
    %131 = arith.addf %128, %130 : vector<2x32xf32>
    %132 = vector.extract_strided_slice %35 {offsets = [0, 4, 0], sizes = [2, 1, 384], strides = [1, 1, 1]} : vector<2x8x384xf32> to vector<2x1x384xf32>
    %133 = vector.shape_cast %132 : vector<2x1x384xf32> to vector<2x384xf32>
    %cst_29 = arith.constant dense<0.000000e+00> : vector<2x384xf32>
    %134 = tpu.matmul %131, %27, %cst_29 {dimension_numbers = #tpu.dot_dimension_numbers<[1], [0], [0], [1], [0, 0, 1, 1], [], []>} : vector<2x32xf32>, vector<32x384xf32>, vector<2x384xf32> -> vector<2x384xf32>
    %135 = vector.extract_strided_slice %133 {offsets = [0, 0], sizes = [2, 256], strides = [1, 1]} : vector<2x384xf32> to vector<2x256xf32>
    %136 = vector.extract_strided_slice %134 {offsets = [0, 0], sizes = [2, 256], strides = [1, 1]} : vector<2x384xf32> to vector<2x256xf32>
    %137 = arith.addf %135, %136 : vector<2x256xf32>
    %138 = arith.negf %137 : vector<2x256xf32>
    %139 = math.exp %138 : vector<2x256xf32>
    %cst_30 = arith.constant 1.000000e+00 : f32
    %140 = vector.broadcast %cst_30 : f32 to vector<2x256xf32>
    %141 = arith.addf %140, %139 : vector<2x256xf32>
    %142 = arith.divf %140, %141 : vector<2x256xf32>
    %143 = vector.extract_strided_slice %142 {offsets = [0, 0], sizes = [2, 128], strides = [1, 1]} : vector<2x256xf32> to vector<2x128xf32>
    %144 = vector.extract_strided_slice %142 {offsets = [0, 128], sizes = [2, 32], strides = [1, 1]} : vector<2x256xf32> to vector<2x32xf32>
    %145 = vector.extract_strided_slice %133 {offsets = [0, 256], sizes = [2, 128], strides = [1, 1]} : vector<2x384xf32> to vector<2x128xf32>
    %146 = vector.extract_strided_slice %134 {offsets = [0, 256], sizes = [2, 128], strides = [1, 1]} : vector<2x384xf32> to vector<2x128xf32>
    %147 = arith.addf %146, %38 : vector<2x128xf32>
    %148 = arith.mulf %143, %147 : vector<2x128xf32>
    %149 = arith.addf %145, %148 : vector<2x128xf32>
    %150 = math.tanh %149 : vector<2x128xf32>
    %151 = vector.extract_strided_slice %150 {offsets = [0, 0], sizes = [2, 32], strides = [1, 1]} : vector<2x128xf32> to vector<2x32xf32>
    %152 = arith.subf %131, %151 : vector<2x32xf32>
    %153 = arith.mulf %144, %152 : vector<2x32xf32>
    %154 = arith.addf %151, %153 : vector<2x32xf32>
    %155 = vector.extract_strided_slice %35 {offsets = [0, 5, 0], sizes = [2, 1, 384], strides = [1, 1, 1]} : vector<2x8x384xf32> to vector<2x1x384xf32>
    %156 = vector.shape_cast %155 : vector<2x1x384xf32> to vector<2x384xf32>
    %cst_31 = arith.constant dense<0.000000e+00> : vector<2x384xf32>
    %157 = tpu.matmul %154, %27, %cst_31 {dimension_numbers = #tpu.dot_dimension_numbers<[1], [0], [0], [1], [0, 0, 1, 1], [], []>} : vector<2x32xf32>, vector<32x384xf32>, vector<2x384xf32> -> vector<2x384xf32>
    %158 = vector.extract_strided_slice %156 {offsets = [0, 0], sizes = [2, 256], strides = [1, 1]} : vector<2x384xf32> to vector<2x256xf32>
    %159 = vector.extract_strided_slice %157 {offsets = [0, 0], sizes = [2, 256], strides = [1, 1]} : vector<2x384xf32> to vector<2x256xf32>
    %160 = arith.addf %158, %159 : vector<2x256xf32>
    %161 = arith.negf %160 : vector<2x256xf32>
    %162 = math.exp %161 : vector<2x256xf32>
    %cst_32 = arith.constant 1.000000e+00 : f32
    %163 = vector.broadcast %cst_32 : f32 to vector<2x256xf32>
    %164 = arith.addf %163, %162 : vector<2x256xf32>
    %165 = arith.divf %163, %164 : vector<2x256xf32>
    %166 = vector.extract_strided_slice %165 {offsets = [0, 0], sizes = [2, 128], strides = [1, 1]} : vector<2x256xf32> to vector<2x128xf32>
    %167 = vector.extract_strided_slice %165 {offsets = [0, 128], sizes = [2, 32], strides = [1, 1]} : vector<2x256xf32> to vector<2x32xf32>
    %168 = vector.extract_strided_slice %156 {offsets = [0, 256], sizes = [2, 128], strides = [1, 1]} : vector<2x384xf32> to vector<2x128xf32>
    %169 = vector.extract_strided_slice %157 {offsets = [0, 256], sizes = [2, 128], strides = [1, 1]} : vector<2x384xf32> to vector<2x128xf32>
    %170 = arith.addf %169, %38 : vector<2x128xf32>
    %171 = arith.mulf %166, %170 : vector<2x128xf32>
    %172 = arith.addf %168, %171 : vector<2x128xf32>
    %173 = math.tanh %172 : vector<2x128xf32>
    %174 = vector.extract_strided_slice %173 {offsets = [0, 0], sizes = [2, 32], strides = [1, 1]} : vector<2x128xf32> to vector<2x32xf32>
    %175 = arith.subf %154, %174 : vector<2x32xf32>
    %176 = arith.mulf %167, %175 : vector<2x32xf32>
    %177 = arith.addf %174, %176 : vector<2x32xf32>
    %178 = vector.extract_strided_slice %35 {offsets = [0, 6, 0], sizes = [2, 1, 384], strides = [1, 1, 1]} : vector<2x8x384xf32> to vector<2x1x384xf32>
    %179 = vector.shape_cast %178 : vector<2x1x384xf32> to vector<2x384xf32>
    %cst_33 = arith.constant dense<0.000000e+00> : vector<2x384xf32>
    %180 = tpu.matmul %177, %27, %cst_33 {dimension_numbers = #tpu.dot_dimension_numbers<[1], [0], [0], [1], [0, 0, 1, 1], [], []>} : vector<2x32xf32>, vector<32x384xf32>, vector<2x384xf32> -> vector<2x384xf32>
    %181 = vector.extract_strided_slice %179 {offsets = [0, 0], sizes = [2, 256], strides = [1, 1]} : vector<2x384xf32> to vector<2x256xf32>
    %182 = vector.extract_strided_slice %180 {offsets = [0, 0], sizes = [2, 256], strides = [1, 1]} : vector<2x384xf32> to vector<2x256xf32>
    %183 = arith.addf %181, %182 : vector<2x256xf32>
    %184 = arith.negf %183 : vector<2x256xf32>
    %185 = math.exp %184 : vector<2x256xf32>
    %cst_34 = arith.constant 1.000000e+00 : f32
    %186 = vector.broadcast %cst_34 : f32 to vector<2x256xf32>
    %187 = arith.addf %186, %185 : vector<2x256xf32>
    %188 = arith.divf %186, %187 : vector<2x256xf32>
    %189 = vector.extract_strided_slice %188 {offsets = [0, 0], sizes = [2, 128], strides = [1, 1]} : vector<2x256xf32> to vector<2x128xf32>
    %190 = vector.extract_strided_slice %188 {offsets = [0, 128], sizes = [2, 32], strides = [1, 1]} : vector<2x256xf32> to vector<2x32xf32>
    %191 = vector.extract_strided_slice %179 {offsets = [0, 256], sizes = [2, 128], strides = [1, 1]} : vector<2x384xf32> to vector<2x128xf32>
    %192 = vector.extract_strided_slice %180 {offsets = [0, 256], sizes = [2, 128], strides = [1, 1]} : vector<2x384xf32> to vector<2x128xf32>
    %193 = arith.addf %192, %38 : vector<2x128xf32>
    %194 = arith.mulf %189, %193 : vector<2x128xf32>
    %195 = arith.addf %191, %194 : vector<2x128xf32>
    %196 = math.tanh %195 : vector<2x128xf32>
    %197 = vector.extract_strided_slice %196 {offsets = [0, 0], sizes = [2, 32], strides = [1, 1]} : vector<2x128xf32> to vector<2x32xf32>
    %198 = arith.subf %177, %197 : vector<2x32xf32>
    %199 = arith.mulf %190, %198 : vector<2x32xf32>
    %200 = arith.addf %197, %199 : vector<2x32xf32>
    %201 = vector.extract_strided_slice %35 {offsets = [0, 7, 0], sizes = [2, 1, 384], strides = [1, 1, 1]} : vector<2x8x384xf32> to vector<2x1x384xf32>
    %202 = vector.shape_cast %201 : vector<2x1x384xf32> to vector<2x384xf32>
    %cst_35 = arith.constant dense<0.000000e+00> : vector<2x384xf32>
    %203 = tpu.matmul %200, %27, %cst_35 {dimension_numbers = #tpu.dot_dimension_numbers<[1], [0], [0], [1], [0, 0, 1, 1], [], []>} : vector<2x32xf32>, vector<32x384xf32>, vector<2x384xf32> -> vector<2x384xf32>
    %204 = vector.extract_strided_slice %202 {offsets = [0, 0], sizes = [2, 256], strides = [1, 1]} : vector<2x384xf32> to vector<2x256xf32>
    %205 = vector.extract_strided_slice %203 {offsets = [0, 0], sizes = [2, 256], strides = [1, 1]} : vector<2x384xf32> to vector<2x256xf32>
    %206 = arith.addf %204, %205 : vector<2x256xf32>
    %207 = arith.negf %206 : vector<2x256xf32>
    %208 = math.exp %207 : vector<2x256xf32>
    %cst_36 = arith.constant 1.000000e+00 : f32
    %209 = vector.broadcast %cst_36 : f32 to vector<2x256xf32>
    %210 = arith.addf %209, %208 : vector<2x256xf32>
    %211 = arith.divf %209, %210 : vector<2x256xf32>
    %212 = vector.extract_strided_slice %211 {offsets = [0, 0], sizes = [2, 128], strides = [1, 1]} : vector<2x256xf32> to vector<2x128xf32>
    %213 = vector.extract_strided_slice %211 {offsets = [0, 128], sizes = [2, 32], strides = [1, 1]} : vector<2x256xf32> to vector<2x32xf32>
    %214 = vector.extract_strided_slice %202 {offsets = [0, 256], sizes = [2, 128], strides = [1, 1]} : vector<2x384xf32> to vector<2x128xf32>
    %215 = vector.extract_strided_slice %203 {offsets = [0, 256], sizes = [2, 128], strides = [1, 1]} : vector<2x384xf32> to vector<2x128xf32>
    %216 = arith.addf %215, %38 : vector<2x128xf32>
    %217 = arith.mulf %212, %216 : vector<2x128xf32>
    %218 = arith.addf %214, %217 : vector<2x128xf32>
    %219 = math.tanh %218 : vector<2x128xf32>
    %220 = vector.extract_strided_slice %219 {offsets = [0, 0], sizes = [2, 32], strides = [1, 1]} : vector<2x128xf32> to vector<2x32xf32>
    %221 = arith.subf %200, %220 : vector<2x32xf32>
    %222 = arith.mulf %213, %221 : vector<2x32xf32>
    %223 = arith.addf %220, %222 : vector<2x32xf32>
    %224 = vector.shape_cast %62 : vector<2x32xf32> to vector<2x1x32xf32>
    %225 = vector.shape_cast %85 : vector<2x32xf32> to vector<2x1x32xf32>
    %226 = vector.shape_cast %108 : vector<2x32xf32> to vector<2x1x32xf32>
    %227 = vector.shape_cast %131 : vector<2x32xf32> to vector<2x1x32xf32>
    %228 = vector.shape_cast %154 : vector<2x32xf32> to vector<2x1x32xf32>
    %229 = vector.shape_cast %177 : vector<2x32xf32> to vector<2x1x32xf32>
    %230 = vector.shape_cast %200 : vector<2x32xf32> to vector<2x1x32xf32>
    %231 = vector.shape_cast %223 : vector<2x32xf32> to vector<2x1x32xf32>
    %232 = tpu.concatenate %224, %225, %226, %227, %228, %229, %230, %231 in 1 : vector<2x1x32xf32>, vector<2x1x32xf32>, vector<2x1x32xf32>, vector<2x1x32xf32>, vector<2x1x32xf32>, vector<2x1x32xf32>, vector<2x1x32xf32>, vector<2x1x32xf32> -> vector<2x8x32xf32>
    %233 = vector.shape_cast %223 : vector<2x32xf32> to vector<1x2x32xf32>
    %c0_37 = arith.constant 0 : index
    %c0_38 = arith.constant 0 : index
    %c0_39 = arith.constant 0 : index
    %234 = vector.load %arg4[%c0_37, %c0_38, %c0_39] : memref<1x2x32xf32, #tpu.memory_space<vmem>>, vector<1x2x32xf32>
    tpu.vector_store %arg4[%c0_37, %c0_38, %c0_39], %233 {strides = array<i32>} : memref<1x2x32xf32, #tpu.memory_space<vmem>>, vector<1x2x32xf32>,
    %cst_40 = arith.constant dense<0xFF800000> : vector<2x8xf32>
    %235 = vector.multi_reduction <maximumf>, %232, %cst_40 [2] : vector<2x8x32xf32> to vector<2x8xf32>
    %236 = vector.shape_cast %235 : vector<2x8xf32> to vector<2x8x1xf32>
    %237 = vector.broadcast %236 : vector<2x8x1xf32> to vector<2x8x32xf32>
    %238 = arith.subf %232, %237 : vector<2x8x32xf32>
    %239 = math.exp %238 : vector<2x8x32xf32>
    %cst_41 = arith.constant dense<0.000000e+00> : vector<2x8xf32>
    %240 = vector.multi_reduction <add>, %239, %cst_41 [2] : vector<2x8x32xf32> to vector<2x8xf32>
    %241 = vector.shape_cast %240 : vector<2x8xf32> to vector<2x8x1xf32>
    %242 = vector.broadcast %241 : vector<2x8x1xf32> to vector<2x8x32xf32>
    %243 = arith.divf %239, %242 : vector<2x8x32xf32>
    %244 = arith.mulf %243, %0 : vector<2x8x32xf32>
    %245 = arith.addf %23, %244 : vector<2x8x32xf32>
    %246 = arith.addf %245, %0 : vector<2x8x32xf32>
    "tpu.trace_start"() <{level = 10 : i32, message = "bts,bsd->btd"}> : () -> ()
    %cst_42 = arith.constant dense<0.000000e+00> : vector<2x8x32xf32>
    %247 = tpu.matmul %10, %246, %cst_42 {dimension_numbers = #tpu.dot_dimension_numbers<[2], [1], [1], [2], [0, 0, 0, 1, 1, 2], [0], [0]>} : vector<2x8x8xf32>, vector<2x8x32xf32>, vector<2x8x32xf32> -> vector<2x8x32xf32>
    "tpu.trace_stop"() : () -> ()
    %248 = arith.subf %246, %247 : vector<2x8x32xf32>
    %249 = arith.addf %248, %23 : vector<2x8x32xf32>
    %250 = vector.shape_cast %249 : vector<2x8x32xf32> to vector<16x32xf32>
    %cst_43 = arith.constant dense<0.000000e+00> : vector<16xf32>
    %251 = vector.multi_reduction <add>, %250, %cst_43 [1] : vector<16x32xf32> to vector<16xf32>
    %252 = vector.shape_cast %251 : vector<16xf32> to vector<16x1xf32>
    %cst_44 = arith.constant 3.200000e+01 : f32
    %253 = vector.broadcast %cst_44 : f32 to vector<16x1xf32>
    %254 = arith.divf %252, %253 : vector<16x1xf32>
    %255 = vector.broadcast %254 : vector<16x1xf32> to vector<16x32xf32>
    %256 = arith.subf %250, %255 : vector<16x32xf32>
    %257 = arith.mulf %256, %256 : vector<16x32xf32>
    %cst_45 = arith.constant dense<0.000000e+00> : vector<16xf32>
    %258 = vector.multi_reduction <add>, %257, %cst_45 [1] : vector<16x32xf32> to vector<16xf32>
    %259 = vector.shape_cast %258 : vector<16xf32> to vector<16x1xf32>
    %cst_46 = arith.constant 3.200000e+01 : f32
    %260 = vector.broadcast %cst_46 : f32 to vector<16x1xf32>
    %261 = arith.divf %259, %260 : vector<16x1xf32>
    %262 = vector.broadcast %254 : vector<16x1xf32> to vector<16x32xf32>
    %263 = arith.subf %250, %262 : vector<16x32xf32>
    %cst_47 = arith.constant 9.99999974E-6 : f32
    %264 = vector.broadcast %cst_47 : f32 to vector<16x1xf32>
    %265 = arith.addf %261, %264 : vector<16x1xf32>
    %266 = math.rsqrt %265 : vector<16x1xf32>
    %267 = vector.broadcast %266 : vector<16x1xf32> to vector<16x32xf32>
    %268 = arith.mulf %263, %267 : vector<16x32xf32>
    %269 = vector.broadcast %6 : vector<1x32xf32> to vector<16x32xf32>
    %270 = arith.mulf %268, %269 : vector<16x32xf32>
    %271 = vector.broadcast %7 : vector<1x32xf32> to vector<16x32xf32>
    %272 = arith.addf %270, %271 : vector<16x32xf32>
    %cst_48 = arith.constant dense<0.000000e+00> : vector<16x128xf32>
    %273 = tpu.matmul %272, %1, %cst_48 {dimension_numbers = #tpu.dot_dimension_numbers<[1], [0], [0], [1], [0, 0, 1, 1], [], []>} : vector<16x32xf32>, vector<32x128xf32>, vector<16x128xf32> -> vector<16x128xf32>
    %274 = vector.broadcast %4 : vector<1x128xf32> to vector<16x128xf32>
    %275 = arith.addf %273, %274 : vector<16x128xf32>
    %cst_49 = arith.constant 0.000000e+00 : f32
    %276 = vector.broadcast %cst_49 : f32 to vector<16x128xf32>
    %277 = arith.maximumf %275, %276 : vector<16x128xf32>
    %cst_50 = arith.constant dense<0.000000e+00> : vector<16x32xf32>
    %278 = tpu.matmul %277, %2, %cst_50 {dimension_numbers = #tpu.dot_dimension_numbers<[1], [0], [0], [1], [0, 0, 1, 1], [], []>} : vector<16x128xf32>, vector<128x32xf32>, vector<16x32xf32> -> vector<16x32xf32>
    %279 = vector.broadcast %5 : vector<1x32xf32> to vector<16x32xf32>
    %280 = arith.addf %278, %279 : vector<16x32xf32>
    %281 = vector.shape_cast %280 : vector<16x32xf32> to vector<2x8x32xf32>
    %282 = arith.addf %248, %281 : vector<2x8x32xf32>
    "tpu.trace_start"() <{level = 10 : i32, message = "bts,bsd->btd"}> : () -> ()
    %cst_51 = arith.constant dense<0.000000e+00> : vector<2x8x32xf32>
    %283 = tpu.matmul %10, %282, %cst_51 {dimension_numbers = #tpu.dot_dimension_numbers<[2], [1], [1], [2], [0, 0, 0, 1, 1, 2], [0], [0]>} : vector<2x8x8xf32>, vector<2x8x32xf32>, vector<2x8x32xf32> -> vector<2x8x32xf32>
    "tpu.trace_stop"() : () -> ()
    %284 = arith.subf %282, %283 : vector<2x8x32xf32>
    %285 = arith.addf %247, %283 : vector<2x8x32xf32>
    %c1 = arith.constant 1 : index
    %c0_52 = arith.constant 0 : index
    %c0_53 = arith.constant 0 : index
    %286 = vector.load %arg1[%c1, %c0_52, %c0_53] : memref<2x66x384xf32, #tpu.memory_space<vmem>>, vector<1x32x384xf32>
    %287 = vector.shape_cast %286 : vector<1x32x384xf32> to vector<32x384xf32>
    %c1_54 = arith.constant 1 : index
    %c32_55 = arith.constant 32 : index
    %c0_56 = arith.constant 0 : index
    %288 = vector.load %arg1[%c1_54, %c32_55, %c0_56] : memref<2x66x384xf32, #tpu.memory_space<vmem>>, vector<1x32x384xf32>
    %289 = vector.shape_cast %288 : vector<1x32x384xf32> to vector<32x384xf32>
    %c1_57 = arith.constant 1 : index
    %c64_58 = arith.constant 64 : index
    %c0_59 = arith.constant 0 : index
    %290 = vector.load %arg1[%c1_57, %c64_58, %c0_59] : memref<2x66x384xf32, #tpu.memory_space<vmem>>, vector<1x2x384xf32>
    %291 = vector.shape_cast %290 : vector<1x2x384xf32> to vector<2x384xf32>
    %292 = vector.shape_cast %285 : vector<2x8x32xf32> to vector<16x32xf32>
    %cst_60 = arith.constant dense<0.000000e+00> : vector<16x384xf32>
    %293 = tpu.matmul %292, %287, %cst_60 {dimension_numbers = #tpu.dot_dimension_numbers<[1], [0], [0], [1], [0, 0, 1, 1], [], []>} : vector<16x32xf32>, vector<32x384xf32>, vector<16x384xf32> -> vector<16x384xf32>
    %294 = vector.extract_strided_slice %291 {offsets = [0, 0], sizes = [1, 384], strides = [1, 1]} : vector<2x384xf32> to vector<1x384xf32>
    %295 = vector.broadcast %294 : vector<1x384xf32> to vector<16x384xf32>
    %296 = arith.addf %293, %295 : vector<16x384xf32>
    %297 = vector.shape_cast %296 : vector<16x384xf32> to vector<2x8x384xf32>
    %298 = vector.extract_strided_slice %291 {offsets = [1, 256], sizes = [1, 128], strides = [1, 1]} : vector<2x384xf32> to vector<1x128xf32>
    %299 = vector.shape_cast %298 : vector<1x128xf32> to vector<1x128xf32>
    %300 = vector.broadcast %299 : vector<1x128xf32> to vector<2x128xf32>
    %cst_61 = arith.constant 0.000000e+00 : f32
    %301 = vector.broadcast %cst_61 : f32 to vector<2x32xf32>
    %302 = vector.extract_strided_slice %297 {offsets = [0, 0, 0], sizes = [2, 1, 384], strides = [1, 1, 1]} : vector<2x8x384xf32> to vector<2x1x384xf32>
    %303 = vector.shape_cast %302 : vector<2x1x384xf32> to vector<2x384xf32>
    %cst_62 = arith.constant dense<0.000000e+00> : vector<2x384xf32>
    %304 = tpu.matmul %301, %289, %cst_62 {dimension_numbers = #tpu.dot_dimension_numbers<[1], [0], [0], [1], [0, 0, 1, 1], [], []>} : vector<2x32xf32>, vector<32x384xf32>, vector<2x384xf32> -> vector<2x384xf32>
    %305 = vector.extract_strided_slice %303 {offsets = [0, 0], sizes = [2, 256], strides = [1, 1]} : vector<2x384xf32> to vector<2x256xf32>
    %306 = vector.extract_strided_slice %304 {offsets = [0, 0], sizes = [2, 256], strides = [1, 1]} : vector<2x384xf32> to vector<2x256xf32>
    %307 = arith.addf %305, %306 : vector<2x256xf32>
    %308 = arith.negf %307 : vector<2x256xf32>
    %309 = math.exp %308 : vector<2x256xf32>
    %cst_63 = arith.constant 1.000000e+00 : f32
    %310 = vector.broadcast %cst_63 : f32 to vector<2x256xf32>
    %311 = arith.addf %310, %309 : vector<2x256xf32>
    %312 = arith.divf %310, %311 : vector<2x256xf32>
    %313 = vector.extract_strided_slice %312 {offsets = [0, 0], sizes = [2, 128], strides = [1, 1]} : vector<2x256xf32> to vector<2x128xf32>
    %314 = vector.extract_strided_slice %312 {offsets = [0, 128], sizes = [2, 32], strides = [1, 1]} : vector<2x256xf32> to vector<2x32xf32>
    %315 = vector.extract_strided_slice %303 {offsets = [0, 256], sizes = [2, 128], strides = [1, 1]} : vector<2x384xf32> to vector<2x128xf32>
    %316 = vector.extract_strided_slice %304 {offsets = [0, 256], sizes = [2, 128], strides = [1, 1]} : vector<2x384xf32> to vector<2x128xf32>
    %317 = arith.addf %316, %300 : vector<2x128xf32>
    %318 = arith.mulf %313, %317 : vector<2x128xf32>
    %319 = arith.addf %315, %318 : vector<2x128xf32>
    %320 = math.tanh %319 : vector<2x128xf32>
    %321 = vector.extract_strided_slice %320 {offsets = [0, 0], sizes = [2, 32], strides = [1, 1]} : vector<2x128xf32> to vector<2x32xf32>
    %322 = arith.subf %301, %321 : vector<2x32xf32>
    %323 = arith.mulf %314, %322 : vector<2x32xf32>
    %324 = arith.addf %321, %323 : vector<2x32xf32>
    %325 = vector.extract_strided_slice %297 {offsets = [0, 1, 0], sizes = [2, 1, 384], strides = [1, 1, 1]} : vector<2x8x384xf32> to vector<2x1x384xf32>
    %326 = vector.shape_cast %325 : vector<2x1x384xf32> to vector<2x384xf32>
    %cst_64 = arith.constant dense<0.000000e+00> : vector<2x384xf32>
    %327 = tpu.matmul %324, %289, %cst_64 {dimension_numbers = #tpu.dot_dimension_numbers<[1], [0], [0], [1], [0, 0, 1, 1], [], []>} : vector<2x32xf32>, vector<32x384xf32>, vector<2x384xf32> -> vector<2x384xf32>
    %328 = vector.extract_strided_slice %326 {offsets = [0, 0], sizes = [2, 256], strides = [1, 1]} : vector<2x384xf32> to vector<2x256xf32>
    %329 = vector.extract_strided_slice %327 {offsets = [0, 0], sizes = [2, 256], strides = [1, 1]} : vector<2x384xf32> to vector<2x256xf32>
    %330 = arith.addf %328, %329 : vector<2x256xf32>
    %331 = arith.negf %330 : vector<2x256xf32>
    %332 = math.exp %331 : vector<2x256xf32>
    %cst_65 = arith.constant 1.000000e+00 : f32
    %333 = vector.broadcast %cst_65 : f32 to vector<2x256xf32>
    %334 = arith.addf %333, %332 : vector<2x256xf32>
    %335 = arith.divf %333, %334 : vector<2x256xf32>
    %336 = vector.extract_strided_slice %335 {offsets = [0, 0], sizes = [2, 128], strides = [1, 1]} : vector<2x256xf32> to vector<2x128xf32>
    %337 = vector.extract_strided_slice %335 {offsets = [0, 128], sizes = [2, 32], strides = [1, 1]} : vector<2x256xf32> to vector<2x32xf32>
    %338 = vector.extract_strided_slice %326 {offsets = [0, 256], sizes = [2, 128], strides = [1, 1]} : vector<2x384xf32> to vector<2x128xf32>
    %339 = vector.extract_strided_slice %327 {offsets = [0, 256], sizes = [2, 128], strides = [1, 1]} : vector<2x384xf32> to vector<2x128xf32>
    %340 = arith.addf %339, %300 : vector<2x128xf32>
    %341 = arith.mulf %336, %340 : vector<2x128xf32>
    %342 = arith.addf %338, %341 : vector<2x128xf32>
    %343 = math.tanh %342 : vector<2x128xf32>
    %344 = vector.extract_strided_slice %343 {offsets = [0, 0], sizes = [2, 32], strides = [1, 1]} : vector<2x128xf32> to vector<2x32xf32>
    %345 = arith.subf %324, %344 : vector<2x32xf32>
    %346 = arith.mulf %337, %345 : vector<2x32xf32>
    %347 = arith.addf %344, %346 : vector<2x32xf32>
    %348 = vector.extract_strided_slice %297 {offsets = [0, 2, 0], sizes = [2, 1, 384], strides = [1, 1, 1]} : vector<2x8x384xf32> to vector<2x1x384xf32>
    %349 = vector.shape_cast %348 : vector<2x1x384xf32> to vector<2x384xf32>
    %cst_66 = arith.constant dense<0.000000e+00> : vector<2x384xf32>
    %350 = tpu.matmul %347, %289, %cst_66 {dimension_numbers = #tpu.dot_dimension_numbers<[1], [0], [0], [1], [0, 0, 1, 1], [], []>} : vector<2x32xf32>, vector<32x384xf32>, vector<2x384xf32> -> vector<2x384xf32>
    %351 = vector.extract_strided_slice %349 {offsets = [0, 0], sizes = [2, 256], strides = [1, 1]} : vector<2x384xf32> to vector<2x256xf32>
    %352 = vector.extract_strided_slice %350 {offsets = [0, 0], sizes = [2, 256], strides = [1, 1]} : vector<2x384xf32> to vector<2x256xf32>
    %353 = arith.addf %351, %352 : vector<2x256xf32>
    %354 = arith.negf %353 : vector<2x256xf32>
    %355 = math.exp %354 : vector<2x256xf32>
    %cst_67 = arith.constant 1.000000e+00 : f32
    %356 = vector.broadcast %cst_67 : f32 to vector<2x256xf32>
    %357 = arith.addf %356, %355 : vector<2x256xf32>
    %358 = arith.divf %356, %357 : vector<2x256xf32>
    %359 = vector.extract_strided_slice %358 {offsets = [0, 0], sizes = [2, 128], strides = [1, 1]} : vector<2x256xf32> to vector<2x128xf32>
    %360 = vector.extract_strided_slice %358 {offsets = [0, 128], sizes = [2, 32], strides = [1, 1]} : vector<2x256xf32> to vector<2x32xf32>
    %361 = vector.extract_strided_slice %349 {offsets = [0, 256], sizes = [2, 128], strides = [1, 1]} : vector<2x384xf32> to vector<2x128xf32>
    %362 = vector.extract_strided_slice %350 {offsets = [0, 256], sizes = [2, 128], strides = [1, 1]} : vector<2x384xf32> to vector<2x128xf32>
    %363 = arith.addf %362, %300 : vector<2x128xf32>
    %364 = arith.mulf %359, %363 : vector<2x128xf32>
    %365 = arith.addf %361, %364 : vector<2x128xf32>
    %366 = math.tanh %365 : vector<2x128xf32>
    %367 = vector.extract_strided_slice %366 {offsets = [0, 0], sizes = [2, 32], strides = [1, 1]} : vector<2x128xf32> to vector<2x32xf32>
    %368 = arith.subf %347, %367 : vector<2x32xf32>
    %369 = arith.mulf %360, %368 : vector<2x32xf32>
    %370 = arith.addf %367, %369 : vector<2x32xf32>
    %371 = vector.extract_strided_slice %297 {offsets = [0, 3, 0], sizes = [2, 1, 384], strides = [1, 1, 1]} : vector<2x8x384xf32> to vector<2x1x384xf32>
    %372 = vector.shape_cast %371 : vector<2x1x384xf32> to vector<2x384xf32>
    %cst_68 = arith.constant dense<0.000000e+00> : vector<2x384xf32>
    %373 = tpu.matmul %370, %289, %cst_68 {dimension_numbers = #tpu.dot_dimension_numbers<[1], [0], [0], [1], [0, 0, 1, 1], [], []>} : vector<2x32xf32>, vector<32x384xf32>, vector<2x384xf32> -> vector<2x384xf32>
    %374 = vector.extract_strided_slice %372 {offsets = [0, 0], sizes = [2, 256], strides = [1, 1]} : vector<2x384xf32> to vector<2x256xf32>
    %375 = vector.extract_strided_slice %373 {offsets = [0, 0], sizes = [2, 256], strides = [1, 1]} : vector<2x384xf32> to vector<2x256xf32>
    %376 = arith.addf %374, %375 : vector<2x256xf32>
    %377 = arith.negf %376 : vector<2x256xf32>
    %378 = math.exp %377 : vector<2x256xf32>
    %cst_69 = arith.constant 1.000000e+00 : f32
    %379 = vector.broadcast %cst_69 : f32 to vector<2x256xf32>
    %380 = arith.addf %379, %378 : vector<2x256xf32>
    %381 = arith.divf %379, %380 : vector<2x256xf32>
    %382 = vector.extract_strided_slice %381 {offsets = [0, 0], sizes = [2, 128], strides = [1, 1]} : vector<2x256xf32> to vector<2x128xf32>
    %383 = vector.extract_strided_slice %381 {offsets = [0, 128], sizes = [2, 32], strides = [1, 1]} : vector<2x256xf32> to vector<2x32xf32>
    %384 = vector.extract_strided_slice %372 {offsets = [0, 256], sizes = [2, 128], strides = [1, 1]} : vector<2x384xf32> to vector<2x128xf32>
    %385 = vector.extract_strided_slice %373 {offsets = [0, 256], sizes = [2, 128], strides = [1, 1]} : vector<2x384xf32> to vector<2x128xf32>
    %386 = arith.addf %385, %300 : vector<2x128xf32>
    %387 = arith.mulf %382, %386 : vector<2x128xf32>
    %388 = arith.addf %384, %387 : vector<2x128xf32>
    %389 = math.tanh %388 : vector<2x128xf32>
    %390 = vector.extract_strided_slice %389 {offsets = [0, 0], sizes = [2, 32], strides = [1, 1]} : vector<2x128xf32> to vector<2x32xf32>
    %391 = arith.subf %370, %390 : vector<2x32xf32>
    %392 = arith.mulf %383, %391 : vector<2x32xf32>
    %393 = arith.addf %390, %392 : vector<2x32xf32>
    %394 = vector.extract_strided_slice %297 {offsets = [0, 4, 0], sizes = [2, 1, 384], strides = [1, 1, 1]} : vector<2x8x384xf32> to vector<2x1x384xf32>
    %395 = vector.shape_cast %394 : vector<2x1x384xf32> to vector<2x384xf32>
    %cst_70 = arith.constant dense<0.000000e+00> : vector<2x384xf32>
    %396 = tpu.matmul %393, %289, %cst_70 {dimension_numbers = #tpu.dot_dimension_numbers<[1], [0], [0], [1], [0, 0, 1, 1], [], []>} : vector<2x32xf32>, vector<32x384xf32>, vector<2x384xf32> -> vector<2x384xf32>
    %397 = vector.extract_strided_slice %395 {offsets = [0, 0], sizes = [2, 256], strides = [1, 1]} : vector<2x384xf32> to vector<2x256xf32>
    %398 = vector.extract_strided_slice %396 {offsets = [0, 0], sizes = [2, 256], strides = [1, 1]} : vector<2x384xf32> to vector<2x256xf32>
    %399 = arith.addf %397, %398 : vector<2x256xf32>
    %400 = arith.negf %399 : vector<2x256xf32>
    %401 = math.exp %400 : vector<2x256xf32>
    %cst_71 = arith.constant 1.000000e+00 : f32
    %402 = vector.broadcast %cst_71 : f32 to vector<2x256xf32>
    %403 = arith.addf %402, %401 : vector<2x256xf32>
    %404 = arith.divf %402, %403 : vector<2x256xf32>
    %405 = vector.extract_strided_slice %404 {offsets = [0, 0], sizes = [2, 128], strides = [1, 1]} : vector<2x256xf32> to vector<2x128xf32>
    %406 = vector.extract_strided_slice %404 {offsets = [0, 128], sizes = [2, 32], strides = [1, 1]} : vector<2x256xf32> to vector<2x32xf32>
    %407 = vector.extract_strided_slice %395 {offsets = [0, 256], sizes = [2, 128], strides = [1, 1]} : vector<2x384xf32> to vector<2x128xf32>
    %408 = vector.extract_strided_slice %396 {offsets = [0, 256], sizes = [2, 128], strides = [1, 1]} : vector<2x384xf32> to vector<2x128xf32>
    %409 = arith.addf %408, %300 : vector<2x128xf32>
    %410 = arith.mulf %405, %409 : vector<2x128xf32>
    %411 = arith.addf %407, %410 : vector<2x128xf32>
    %412 = math.tanh %411 : vector<2x128xf32>
    %413 = vector.extract_strided_slice %412 {offsets = [0, 0], sizes = [2, 32], strides = [1, 1]} : vector<2x128xf32> to vector<2x32xf32>
    %414 = arith.subf %393, %413 : vector<2x32xf32>
    %415 = arith.mulf %406, %414 : vector<2x32xf32>
    %416 = arith.addf %413, %415 : vector<2x32xf32>
    %417 = vector.extract_strided_slice %297 {offsets = [0, 5, 0], sizes = [2, 1, 384], strides = [1, 1, 1]} : vector<2x8x384xf32> to vector<2x1x384xf32>
    %418 = vector.shape_cast %417 : vector<2x1x384xf32> to vector<2x384xf32>
    %cst_72 = arith.constant dense<0.000000e+00> : vector<2x384xf32>
    %419 = tpu.matmul %416, %289, %cst_72 {dimension_numbers = #tpu.dot_dimension_numbers<[1], [0], [0], [1], [0, 0, 1, 1], [], []>} : vector<2x32xf32>, vector<32x384xf32>, vector<2x384xf32> -> vector<2x384xf32>
    %420 = vector.extract_strided_slice %418 {offsets = [0, 0], sizes = [2, 256], strides = [1, 1]} : vector<2x384xf32> to vector<2x256xf32>
    %421 = vector.extract_strided_slice %419 {offsets = [0, 0], sizes = [2, 256], strides = [1, 1]} : vector<2x384xf32> to vector<2x256xf32>
    %422 = arith.addf %420, %421 : vector<2x256xf32>
    %423 = arith.negf %422 : vector<2x256xf32>
    %424 = math.exp %423 : vector<2x256xf32>
    %cst_73 = arith.constant 1.000000e+00 : f32
    %425 = vector.broadcast %cst_73 : f32 to vector<2x256xf32>
    %426 = arith.addf %425, %424 : vector<2x256xf32>
    %427 = arith.divf %425, %426 : vector<2x256xf32>
    %428 = vector.extract_strided_slice %427 {offsets = [0, 0], sizes = [2, 128], strides = [1, 1]} : vector<2x256xf32> to vector<2x128xf32>
    %429 = vector.extract_strided_slice %427 {offsets = [0, 128], sizes = [2, 32], strides = [1, 1]} : vector<2x256xf32> to vector<2x32xf32>
    %430 = vector.extract_strided_slice %418 {offsets = [0, 256], sizes = [2, 128], strides = [1, 1]} : vector<2x384xf32> to vector<2x128xf32>
    %431 = vector.extract_strided_slice %419 {offsets = [0, 256], sizes = [2, 128], strides = [1, 1]} : vector<2x384xf32> to vector<2x128xf32>
    %432 = arith.addf %431, %300 : vector<2x128xf32>
    %433 = arith.mulf %428, %432 : vector<2x128xf32>
    %434 = arith.addf %430, %433 : vector<2x128xf32>
    %435 = math.tanh %434 : vector<2x128xf32>
    %436 = vector.extract_strided_slice %435 {offsets = [0, 0], sizes = [2, 32], strides = [1, 1]} : vector<2x128xf32> to vector<2x32xf32>
    %437 = arith.subf %416, %436 : vector<2x32xf32>
    %438 = arith.mulf %429, %437 : vector<2x32xf32>
    %439 = arith.addf %436, %438 : vector<2x32xf32>
    %440 = vector.extract_strided_slice %297 {offsets = [0, 6, 0], sizes = [2, 1, 384], strides = [1, 1, 1]} : vector<2x8x384xf32> to vector<2x1x384xf32>
    %441 = vector.shape_cast %440 : vector<2x1x384xf32> to vector<2x384xf32>
    %cst_74 = arith.constant dense<0.000000e+00> : vector<2x384xf32>
    %442 = tpu.matmul %439, %289, %cst_74 {dimension_numbers = #tpu.dot_dimension_numbers<[1], [0], [0], [1], [0, 0, 1, 1], [], []>} : vector<2x32xf32>, vector<32x384xf32>, vector<2x384xf32> -> vector<2x384xf32>
    %443 = vector.extract_strided_slice %441 {offsets = [0, 0], sizes = [2, 256], strides = [1, 1]} : vector<2x384xf32> to vector<2x256xf32>
    %444 = vector.extract_strided_slice %442 {offsets = [0, 0], sizes = [2, 256], strides = [1, 1]} : vector<2x384xf32> to vector<2x256xf32>
    %445 = arith.addf %443, %444 : vector<2x256xf32>
    %446 = arith.negf %445 : vector<2x256xf32>
    %447 = math.exp %446 : vector<2x256xf32>
    %cst_75 = arith.constant 1.000000e+00 : f32
    %448 = vector.broadcast %cst_75 : f32 to vector<2x256xf32>
    %449 = arith.addf %448, %447 : vector<2x256xf32>
    %450 = arith.divf %448, %449 : vector<2x256xf32>
    %451 = vector.extract_strided_slice %450 {offsets = [0, 0], sizes = [2, 128], strides = [1, 1]} : vector<2x256xf32> to vector<2x128xf32>
    %452 = vector.extract_strided_slice %450 {offsets = [0, 128], sizes = [2, 32], strides = [1, 1]} : vector<2x256xf32> to vector<2x32xf32>
    %453 = vector.extract_strided_slice %441 {offsets = [0, 256], sizes = [2, 128], strides = [1, 1]} : vector<2x384xf32> to vector<2x128xf32>
    %454 = vector.extract_strided_slice %442 {offsets = [0, 256], sizes = [2, 128], strides = [1, 1]} : vector<2x384xf32> to vector<2x128xf32>
    %455 = arith.addf %454, %300 : vector<2x128xf32>
    %456 = arith.mulf %451, %455 : vector<2x128xf32>
    %457 = arith.addf %453, %456 : vector<2x128xf32>
    %458 = math.tanh %457 : vector<2x128xf32>
    %459 = vector.extract_strided_slice %458 {offsets = [0, 0], sizes = [2, 32], strides = [1, 1]} : vector<2x128xf32> to vector<2x32xf32>
    %460 = arith.subf %439, %459 : vector<2x32xf32>
    %461 = arith.mulf %452, %460 : vector<2x32xf32>
    %462 = arith.addf %459, %461 : vector<2x32xf32>
    %463 = vector.extract_strided_slice %297 {offsets = [0, 7, 0], sizes = [2, 1, 384], strides = [1, 1, 1]} : vector<2x8x384xf32> to vector<2x1x384xf32>
    %464 = vector.shape_cast %463 : vector<2x1x384xf32> to vector<2x384xf32>
    %cst_76 = arith.constant dense<0.000000e+00> : vector<2x384xf32>
    %465 = tpu.matmul %462, %289, %cst_76 {dimension_numbers = #tpu.dot_dimension_numbers<[1], [0], [0], [1], [0, 0, 1, 1], [], []>} : vector<2x32xf32>, vector<32x384xf32>, vector<2x384xf32> -> vector<2x384xf32>
    %466 = vector.extract_strided_slice %464 {offsets = [0, 0], sizes = [2, 256], strides = [1, 1]} : vector<2x384xf32> to vector<2x256xf32>
    %467 = vector.extract_strided_slice %465 {offsets = [0, 0], sizes = [2, 256], strides = [1, 1]} : vector<2x384xf32> to vector<2x256xf32>
    %468 = arith.addf %466, %467 : vector<2x256xf32>
    %469 = arith.negf %468 : vector<2x256xf32>
    %470 = math.exp %469 : vector<2x256xf32>
    %cst_77 = arith.constant 1.000000e+00 : f32
    %471 = vector.broadcast %cst_77 : f32 to vector<2x256xf32>
    %472 = arith.addf %471, %470 : vector<2x256xf32>
    %473 = arith.divf %471, %472 : vector<2x256xf32>
    %474 = vector.extract_strided_slice %473 {offsets = [0, 0], sizes = [2, 128], strides = [1, 1]} : vector<2x256xf32> to vector<2x128xf32>
    %475 = vector.extract_strided_slice %473 {offsets = [0, 128], sizes = [2, 32], strides = [1, 1]} : vector<2x256xf32> to vector<2x32xf32>
    %476 = vector.extract_strided_slice %464 {offsets = [0, 256], sizes = [2, 128], strides = [1, 1]} : vector<2x384xf32> to vector<2x128xf32>
    %477 = vector.extract_strided_slice %465 {offsets = [0, 256], sizes = [2, 128], strides = [1, 1]} : vector<2x384xf32> to vector<2x128xf32>
    %478 = arith.addf %477, %300 : vector<2x128xf32>
    %479 = arith.mulf %474, %478 : vector<2x128xf32>
    %480 = arith.addf %476, %479 : vector<2x128xf32>
    %481 = math.tanh %480 : vector<2x128xf32>
    %482 = vector.extract_strided_slice %481 {offsets = [0, 0], sizes = [2, 32], strides = [1, 1]} : vector<2x128xf32> to vector<2x32xf32>
    %483 = arith.subf %462, %482 : vector<2x32xf32>
    %484 = arith.mulf %475, %483 : vector<2x32xf32>
    %485 = arith.addf %482, %484 : vector<2x32xf32>
    %486 = vector.shape_cast %324 : vector<2x32xf32> to vector<2x1x32xf32>
    %487 = vector.shape_cast %347 : vector<2x32xf32> to vector<2x1x32xf32>
    %488 = vector.shape_cast %370 : vector<2x32xf32> to vector<2x1x32xf32>
    %489 = vector.shape_cast %393 : vector<2x32xf32> to vector<2x1x32xf32>
    %490 = vector.shape_cast %416 : vector<2x32xf32> to vector<2x1x32xf32>
    %491 = vector.shape_cast %439 : vector<2x32xf32> to vector<2x1x32xf32>
    %492 = vector.shape_cast %462 : vector<2x32xf32> to vector<2x1x32xf32>
    %493 = vector.shape_cast %485 : vector<2x32xf32> to vector<2x1x32xf32>
    %494 = tpu.concatenate %486, %487, %488, %489, %490, %491, %492, %493 in 1 : vector<2x1x32xf32>, vector<2x1x32xf32>, vector<2x1x32xf32>, vector<2x1x32xf32>, vector<2x1x32xf32>, vector<2x1x32xf32>, vector<2x1x32xf32>, vector<2x1x32xf32> -> vector<2x8x32xf32>
    %495 = arith.addf %284, %494 : vector<2x8x32xf32>
    %cst_78 = arith.constant 5.000000e-01 : f32
    %496 = vector.broadcast %cst_78 : f32 to vector<2x8x32xf32>
    %497 = arith.mulf %495, %496 : vector<2x8x32xf32>
    %c0_79 = arith.constant 0 : index
    %c0_80 = arith.constant 0 : index
    %c0_81 = arith.constant 0 : index
    %498 = vector.load %arg3[%c0_79, %c0_80, %c0_81] : memref<2x8x32xf32, #tpu.memory_space<vmem>>, vector<2x8x32xf32>
    tpu.vector_store %arg3[%c0_79, %c0_80, %c0_81], %497 {strides = array<i32>} : memref<2x8x32xf32, #tpu.memory_space<vmem>>, vector<2x8x32xf32>,
    return
  }
}

</mosaic_0001>

<bundles_post_ra>
// kernel: encoder_layer_forward.1
= control target key start
LH: loop header
LB: loop body
LE: loop exit
PB: predicated region body
PF: predicated region fallthrough
CT: control target
= control target key end

     0   :  { %10 = vsyncpa [#allocation3], 0  ;;  %vm42_vm0 = vcmask 261120   ;;  %s5707_s0 = inlined_call_operand.vmem [shape: f32[2,8,32], index: 0, kind: input, shape index: {}]   ;;  %s5708_s1 = inlined_call_operand.vmem [shape: f32[2,66,384], index: 1, kind: input, shape index: {}]   ;;  %s5709_s2 = inlined_call_operand.vmem [shape: f32[176,128], index: 2, kind: input, shape index: {}]   ;;  %s5710_s3 = inlined_call_operand.hbm [shape: f32[2,8,32], index: 3, kind: output, shape index: {0}]   ;;  %s5711_s4 = inlined_call_operand.hbm [shape: f32[1,2,32], index: 4, kind: output, shape index: {1}]  }
   0x1   :  { %v4296_v0 = vld [vmem:[%s5707_s0] sm:$0xff]  ;;  %v4301_v1 = vld [vmem:[%s5707_s0 + $0x8] sm:$0xff] }
   0x2   :  { %11 = vsyncpa [#allocation5], 0  ;;  %3679 = vmatpush.xpose.msk.msra.mxu0 %vm42_vm0, %v4296_v0  ;;  %3681 = vmatpush.xpose.msk.msra.mxu1 %vm42_vm0, %v4301_v1  ;;  %vm91_vm1 = vcmask 64512   ;;  %v195_v18 = vld [vmem:[%s5708_s1 + $0x48] sm:$0xff]  ;;  %v192_v19 = vld [vmem:[%s5708_s1 + $0x30] sm:$0xff]  ;;  %v4262_v31 = vmov 0.0  }
   0x3   :  { %158 = vmatpush.msra.mxu2 %v4296_v0  ;;  %181 = vmatpush.msra.mxu3 %v4301_v1  ;;  %v189_v20 = vld [vmem:[%s5708_s1 + $0x18] sm:$0xff]  ;;  %v186_v21 = vld [vmem:[%s5708_s1] sm:$0xff]  ;;  %v196_v22 = vld [vmem:[%s5708_s1 + $0x50] sm:$0xff]  ;;  %s3665_s10 = sshll.u32 %s5711_s4, 4  ;;  %s4265_s4 = smov [#allocation2]   ;;  %s3666_s10 = int_to_ptr.hbm [resolvable:$true] %s3665_s10 }
   0x4   :  { %v4341_v23 = vld [vmem:[%s5708_s1 + $0xa8] sm:$0xff]  ;;  %v193_v24 = vld [vmem:[%s5708_s1 + $0x38] sm:$0xff]  ;;  %v4350_v25 = vld [vmem:[%s5708_s1 + $0x90] sm:$0xff]  ;;  %s3649_s11 = sshll.u32 %s4265_s4, 4  ;;  %s3651_s14 = sshll.u32 %s5710_s3, 4  ;;  %s3650_s11 = int_to_ptr.vmem [resolvable:$true] %s3649_s11  ;;  %s3652_s14 = int_to_ptr.hbm [resolvable:$true] %s3651_s14 }
   0x5   :  { %3680 = vmatmul.msk.f32.vlgmr.msra.gmra.mxu0 %vm42_vm0, %v4296_v0  ;;  %3682 = vmatmul.msk.f32.vlgmr.msra.gmra.mxu1 %vm42_vm0, %v4301_v1  ;;  %v190_v26 = vld [vmem:[%s5708_s1 + $0x20] sm:$0xff]  ;;  %v4358_v27 = vld [vmem:[%s5708_s1 + $0x78] sm:$0xff]  ;;  %v187_v29 = vld [vmem:[%s5708_s1 + $0x8] sm:$0xff]  ;;  %s4266_s15 = smov 128   ;;  %s4267_s16 = smov 8  }
   0x6   :  { %228 = vmatpush.msrb.mxu2 %v195_v18  ;;  %251 = vmatpush.msrb.mxu3 %v196_v22  ;;  %v4367_v30 = vld [vmem:[%s5708_s1 + $0x60] sm:$0xff]  ;;  %v4375_v32 = vld [vmem:[%s5708_s1 + $0xb0] sm:$0xff]  ;;  %v4380_v33 = vld [vmem:[%s5708_s1 + $0x98] sm:$0xff] }
   0x7   :  { %301 = vmatpush.msrb.mxu1 %v4341_v23  ;;  %v4386_v34 = vld [vmem:[%s5708_s1 + $0x80] sm:$0xff]  ;;  %v4392_v38 = vld [vmem:[%s5708_s1 + $0x68] sm:$0xff]  ;;  %v4400_v43 = vld [vmem:[%s5708_s1 + $0xb8] sm:$0xff] }
   0x8   :  { %229 = vmatpush.msrb.mxu2 %v192_v19  ;;  %252 = vmatpush.msrb.mxu3 %v193_v24  ;;  %v197_v44 = vld [vmem:[%s5708_s1 + $0x58] sm:$0xff]  ;;  %v194_v45 = vld [vmem:[%s5708_s1 + $0x40] sm:$0xff]  ;;  %v191_v50 = vld [vmem:[%s5708_s1 + $0x28] sm:$0xff] }
   0x9   :  { %302 = vmatpush.msrb.mxu1 %v4350_v25  ;;  %v4412_v47 = vld [vmem:[%s5708_s1 + $0xa0] sm:$0xff]  ;;  %274 = vmatpush.msrb.mxu0 %v197_v44  ;;  %v4421_v53 = vld [vmem:[%s5708_s1 + $0x88] sm:$0xff]  ;;  %v188_v55 = vld [vmem:[%s5708_s1 + $0x10] sm:$0xff] }
   0xa   :  { %230 = vmatpush.msrb.mxu2 %v189_v20  ;;  %253 = vmatpush.msrb.mxu3 %v190_v26  ;;  %v4431_v58 = vld [vmem:[%s5708_s1 + $0x70] sm:$0xff] }
   0xb   :  { %303 = vmatpush.msrb.mxu1 %v4358_v27  ;;  %275 = vmatpush.msrb.mxu0 %v194_v45  ;;  %v212_v45 = vld [vmem:[%s5708_s1 + $0xd0] sm:$0x3] }
   0xc   :  { %231 = vmatpush.msrb.mxu2 %v186_v21  ;;  %254 = vmatpush.msrb.mxu3 %v187_v29 }
   0xd   :  { %304 = vmatpush.msrb.mxu1 %v4367_v30  ;;  %276 = vmatpush.msrb.mxu0 %v191_v50  ;;  %v4509_v50 = vperm.slane %v212_v45, 1 }
   0xe   :  { %305 = vmatmul.f32.vlgmr.msrb.gmra.mxu1 %v4262_v31 }
   0xf   :  { %321 = vmatpush.msra.mxu1 %v4375_v32  ;;  %277 = vmatpush.msrb.mxu0 %v188_v55 }
  0x10   :  { %3689 = vmatmul.msk.f32.vlgmr.msrb.gmra.mxu0 %vm42_vm0, %v4296_v0 }
  0x11   :  { %322 = vmatpush.msra.mxu1 %v4380_v33  ;;  %493 = vmatpush.msra.mxu0 %v4375_v32 }
  0x13   :  { %323 = vmatpush.msra.mxu1 %v4386_v34  ;;  %494 = vmatpush.msra.mxu0 %v4380_v33 }
  0x15   :  { %324 = vmatpush.msra.mxu1 %v4392_v38  ;;  %495 = vmatpush.msra.mxu0 %v4386_v34 }
  0x16   :  { %325 = vmatmul.f32.vlgmr.msra.gmra.mxu1 %v4262_v31 }
  0x17   :  { %513 = vmatpush.msrb.mxu1 %v4400_v43  ;;  %496 = vmatpush.msra.mxu0 %v4392_v38 }
  0x18   :  { %3690 = vmatmul.msk.f32.gmra.mxu0 %vm42_vm0, %v4301_v1 }
  0x19   :  { %514 = vmatpush.msrb.mxu1 %v4412_v47  ;;  %696 = vmatpush.msrb.mxu0 %v4400_v43 }
  0x1b   :  { %515 = vmatpush.msrb.mxu1 %v4421_v53  ;;  %697 = vmatpush.msrb.mxu0 %v4412_v47 }
  0x1d   :  { %516 = vmatpush.msrb.mxu1 %v4431_v58  ;;  %698 = vmatpush.msrb.mxu0 %v4421_v53 }
  0x1f   :  { %843 = vmatpush.msra.mxu1 %v4341_v23  ;;  %699 = vmatpush.msrb.mxu0 %v4431_v58 }
  0x21   :  { %844 = vmatpush.msra.mxu1 %v4350_v25 }
  0x23   :  { %845 = vmatpush.msra.mxu1 %v4358_v27 }
  0x25   :  { %846 = vmatpush.msra.mxu1 %v4367_v30 }
  0x82   :  { %v63_v2 = vpop.f32.mrf.mxu0  ;;  %v86_v4 = vpop.f32.mrf.mxu1 }
  0x83   :  { %v89_v3 = vmul.f32 0.17677669, %v63_v2  ;;  %v90_v6 = vmul.f32 0.17677669, %v86_v4 }
  0x85   :  { %v92_v5 = vsel %vm91_vm1, %v89_v3, -inf  ;;  %v95_v7 = vsel %vm91_vm1, %v90_v6, -inf }
  0x86   :  { %93 = vmax.xlane.f32.xlu0 %v92_v5  ;;  %v210_v5 = vld [vmem:[%s5708_s1 + $0xc0] sm:$0x3] }
  0x8e   :  { %96 = vmax.xlane.f32.xlu0 %v95_v7  ;;  %v306_v7 = vpop.f32.mrf.mxu1 }
  0xf9   :  { %v94_v8 = vpop.xlane.xlu0 %93 }
  0xfa   :  { %v98_v9 = vsub.f32 %v89_v3, %v94_v8 }
  0xfc   :  { %v100_v10 = vmul.f32 1.442695, %v98_v9 }
  0xfe   :  { %3842 = vpow2.f32 %v100_v10  ;;  %v211_v10 = vld [vmem:[%s5708_s1 + $0xc8] sm:$0x3] }
 0x101   :  { %v97_v11 = vpop.xlane.xlu0 %96 }
 0x102   :  { %v99_v12 = vsub.f32 %v90_v6, %v97_v11  ;;  %v213_v6 = vperm.slane %v210_v5, 0 }
 0x104   :  { %v4315_v13 = vpop.eup %3842  ;;  %v102_v14 = vmul.f32 1.442695, %v99_v12 }
 0x105   :  { %v104_v15 = vsel %vm91_vm1, %v4315_v13, 0.0 }
 0x106   :  { %3844 = vpow2.f32 %v102_v14  ;;  %105 = vadd.xlane.f32.xlu1 %v104_v15  ;;  %v351_v14 = vrot.slane %v306_v7, 1  ;;  %v326_v15 = vpop.f32.mrf.mxu1 }
 0x107   :  { %v352_v29 = vrot.slane %v326_v15, 1 }
 0x10c   :  { %v4319_v16 = vpop.eup %3844 }
 0x10d   :  { %v107_v17 = vsel %vm91_vm1, %v4319_v16, 0.0 }
 0x10e   :  { %108 = vadd.xlane.f32.xlu1 %v107_v17 }
 0x179   :  { %v106_v28 = vpop.xlane.xlu1 %105 }
 0x17a   :  { %3846 = vrcp.f32 %v106_v28  ;;  %v121_v40 = vand.u32 2147483648, %v106_v28  ;;  %v119_v42 = vand.u32 2147483647, %v106_v28  ;;  %vm115_vm3 = vweird.f32 %v106_v28 }
 0x17c   :  { %v122_v49 = vor.u32 1.1754944e-38, %v121_v40  ;;  %vm120_vm5 = vcmp.eq.f32.partialorder %v119_v42, 8.507059e+37 }
 0x180   :  { %v3847_v35 = vpop.eup %3846 }
 0x181   :  { %v111_v36 = vmul.f32 %v3847_v35, %v106_v28  ;;  %v109_v37 = vpop.xlane.xlu1 %108  ;;  %vm116_vm2 = vweird.f32 %v3847_v35 }
 0x182   :  { %3848 = vrcp.f32 %v109_v37  ;;  %vm117_vm4 = vmor %vm115_vm3, %vm116_vm2  ;;  %v136_v59 = vand.u32 2147483648, %v109_v37  ;;  %v134_v61 = vand.u32 2147483647, %v109_v37  ;;  %vm130_vm7 = vweird.f32 %v109_v37 }
 0x183   :  { %v112_v39 = vsub.f32 1.0, %v111_v36 }
 0x184   :  { %v137_v63 = vor.u32 1.1754944e-38, %v136_v59  ;;  %vm135_vm9 = vcmp.eq.f32.partialorder %v134_v61, 8.507059e+37 }
 0x185   :  { %v113_v41 = vmul.f32 %v3847_v35, %v112_v39 }
 0x187   :  { %v114_v46 = vadd.f32 %v3847_v35, %v113_v41 }
 0x188   :  { %v3849_v48 = vpop.eup %3848 }
 0x189   :  { %v126_v51 = vmul.f32 %v3849_v48, %v109_v37  ;;  %v118_v52 = vsel %vm117_vm4, %v3847_v35, %v114_v46  ;;  %vm131_vm6 = vweird.f32 %v3849_v48 }
 0x18a   :  { %v123_v54 = vsel %vm120_vm5, %v122_v49, %v118_v52  ;;  %vm132_vm8 = vmor %vm130_vm7, %vm131_vm6 }
 0x18b   :  { %v127_v56 = vsub.f32 1.0, %v126_v51  ;;  %v124_v57 = vmul.f32 %v4315_v13, %v123_v54  ;;  %v214_v13 = vperm.slane %v211_v10, 0 }
 0x18d   :  { %v128_v60 = vmul.f32 %v3849_v48, %v127_v56  ;;  %3683 = vmatmul.msk.f32.vlgmr.msra.gmra.mxu2 %vm91_vm1, %v124_v57  ;;  %v279_v56 = vpop.f32.mrf.mxu0 }
 0x18e   :  { %341 = vmatpush.msra.mxu2 %v4400_v43 }
 0x18f   :  { %v129_v62 = vadd.f32 %v3849_v48, %v128_v60 }
 0x190   :  { %342 = vmatpush.msra.mxu2 %v4412_v47 }
 0x191   :  { %v133_v2 = vsel %vm132_vm8, %v3849_v48, %v129_v62 }
 0x192   :  { %v138_v3 = vsel %vm135_vm9, %v137_v63, %v133_v2  ;;  %343 = vmatpush.msra.mxu2 %v4421_v53  ;;  %v215_v2 = vperm.slane %v212_v45, 0 }
 0x193   :  { %v139_v4 = vmul.f32 %v4319_v16, %v138_v3 }
 0x194   :  { %344 = vmatpush.msra.mxu2 %v4431_v58  ;;  %v4513_v10 = vadd.f32 %v279_v56, %v215_v2 }
 0x195   :  { %3684 = vmatmul.msk.f32.vlgmr.msra.gmra.mxu3 %vm91_vm1, %v139_v4  ;;  %3685 = vmatmul.msk.f32.vlgmr.msrb.gmra.mxu2 %vm42_vm0, %v4296_v0 }
 0x196   :  { %473 = vmatpush.msra.mxu3 %v4341_v23  ;;  %656 = vmatpush.msrb.mxu2 %v4341_v23 }
 0x198   :  { %474 = vmatpush.msra.mxu3 %v4350_v25  ;;  %657 = vmatpush.msrb.mxu2 %v4350_v25 }
 0x19a   :  { %475 = vmatpush.msra.mxu3 %v4358_v27  ;;  %658 = vmatpush.msrb.mxu2 %v4358_v27 }
 0x19c   :  { %476 = vmatpush.msra.mxu3 %v4367_v30  ;;  %659 = vmatpush.msrb.mxu2 %v4367_v30 }
 0x19d   :  { %3686 = vmatmul.msk.f32.gmra.mxu2 %vm42_vm0, %v4301_v1  ;;  %3687 = vmatmul.msk.f32.vlgmr.msrb.gmra.mxu3 %vm42_vm0, %v4296_v0 }
 0x19e   :  { %676 = vmatpush.msrb.mxu3 %v4375_v32 }
 0x1a0   :  { %677 = vmatpush.msrb.mxu3 %v4380_v33 }
 0x1a2   :  { %678 = vmatpush.msrb.mxu3 %v4386_v34 }
 0x1a4   :  { %679 = vmatpush.msrb.mxu3 %v4392_v38 }
 0x1a5   :  { %3688 = vmatmul.msk.f32.gmra.mxu3 %vm42_vm0, %v4301_v1  ;;  %345 = vmatmul.f32.vlgmr.msra.gmra.mxu2 %v4262_v31 }
 0x1a6   :  { %863 = vmatpush.msra.mxu2 %v4375_v32 }
 0x1a8   :  { %864 = vmatpush.msra.mxu2 %v4380_v33 }
 0x1aa   :  { %865 = vmatpush.msra.mxu2 %v4386_v34 }
 0x1ac   :  { %866 = vmatpush.msra.mxu2 %v4392_v38 }
 0x210   :  { %v4482_v0 = vpop.f32.mrf.mxu2 }
 0x218   :  { %v4487_v8 = vpop.f32.mrf.mxu3  ;;  %v233_v1 = vpop.f32.mrf.mxu2 }
 0x219   :  { %v4489_v9 = vadd.f32 %v233_v1, %v213_v6 }
 0x21b   :  { %v357_v11 = vadd.f32 %v306_v7, %v4489_v9 }
 0x21d   :  { %v3691_v12 = vmul.f32 -1.442695, %v357_v11 }
 0x21f   :  { %3850 = vpow2.f32 %v3691_v12 }
 0x220   :  { %v236_v16 = vpop.f32.mrf.mxu2  ;;  %v256_v17 = vpop.f32.mrf.mxu3 }
 0x221   :  { %v4495_v18 = vadd.f32 %v236_v16, %v213_v6  ;;  %v4497_v19 = vadd.f32 %v256_v17, %v214_v13  ;;  %v282_v17 = vpop.f32.mrf.mxu0 }
 0x223   :  { %v358_v20 = vadd.f32 %v326_v15, %v4497_v19  ;;  %v359_v21 = vadd.f32 %v351_v14, %v4495_v18 }
 0x225   :  { %v3851_v22 = vpop.eup %3850  ;;  %v3692_v24 = vmul.f32 -1.442695, %v358_v20  ;;  %v3693_v26 = vmul.f32 -1.442695, %v359_v21 }
 0x226   :  { %v373_v28 = vadd.f32 1.0, %v3851_v22 }
 0x227   :  { %3852 = vpow2.f32 %v3692_v24 }
 0x228   :  { %3854 = vrcp.f32 %v373_v28  ;;  %v259_v35 = vpop.f32.mrf.mxu3  ;;  %v388_v51 = vand.u32 2147483648, %v373_v28  ;;  %v386_v54 = vand.u32 2147483647, %v373_v28  ;;  %v346_v55 = vpop.f32.mrf.mxu2  ;;  %vm382_vm11 = vweird.f32 %v373_v28 }
 0x229   :  { %v4501_v36 = vadd.f32 %v259_v35, %v214_v13  ;;  %3856 = vpow2.f32 %v3693_v26  ;;  %v437_v63 = vadd.f32 %v346_v55, %v4509_v50 }
 0x22a   :  { %v389_v60 = vor.u32 1.1754944e-38, %v388_v51  ;;  %vm387_vm13 = vcmp.eq.f32.partialorder %v386_v54, 8.507059e+37 }
 0x22b   :  { %v360_v37 = vadd.f32 %v352_v29, %v4501_v36  ;;  %v439_v16 = vrot.slane %v437_v63, 1  ;;  %v4517_v29 = vadd.f32 %v282_v17, %v215_v2 }
 0x22d   :  { %v3853_v39 = vpop.eup %3852  ;;  %v3694_v40 = vmul.f32 -1.442695, %v360_v37 }
 0x22e   :  { %v3855_v41 = vpop.eup %3854  ;;  %v4504_v44 = vadd.f32 1.0, %v3853_v39 }
 0x22f   :  { %v3857_v42 = vpop.eup %3856  ;;  %3858 = vpow2.f32 %v3694_v40  ;;  %v378_v46 = vmul.f32 %v3855_v41, %v373_v28  ;;  %vm383_vm10 = vweird.f32 %v3855_v41 }
 0x230   :  { %v375_v48 = vadd.f32 1.0, %v3857_v42  ;;  %vm384_vm12 = vmor %vm382_vm11, %vm383_vm10  ;;  %vm397_vm6 = vweird.f32 %v4504_v44 }
 0x231   :  { %v379_v49 = vsub.f32 1.0, %v378_v46 }
 0x232   :  { %3860 = vrcp.f32 %v375_v48  ;;  %v418_v12 = vand.u32 2147483648, %v375_v48  ;;  %v416_v14 = vand.u32 2147483647, %v375_v48  ;;  %vm412_vm15 = vweird.f32 %v375_v48 }
 0x233   :  { %3862 = vrcp.f32 %v4504_v44  ;;  %v380_v52 = vmul.f32 %v3855_v41, %v379_v49  ;;  %v403_v49 = vand.u32 2147483648, %v4504_v44 }
 0x234   :  { %v419_v26 = vor.u32 1.1754944e-38, %v418_v12  ;;  %vm417_vm3 = vcmp.eq.f32.partialorder %v416_v14, 8.507059e+37 }
 0x235   :  { %v3859_v57 = vpop.eup %3858  ;;  %v381_v59 = vadd.f32 %v3855_v41, %v380_v52  ;;  %v401_v52 = vand.u32 2147483647, %v4504_v44 }
 0x236   :  { %v376_v61 = vadd.f32 1.0, %v3859_v57 }
 0x237   :  { %v385_v62 = vsel %vm384_vm12, %v3855_v41, %v381_v59  ;;  %vm402_vm10 = vcmp.eq.f32.partialorder %v401_v52, 8.507059e+37  ;;  %vm457_vm12 = vcmask 1041409  }
 0x238   :  { %v3861_v3 = vpop.eup %3860  ;;  %v390_v4 = vsel %vm387_vm13, %v389_v60, %v385_v62  ;;  %3864 = vrcp.f32 %v376_v61  ;;  %v433_v51 = vand.u32 2147483648, %v376_v61  ;;  %vm427_vm8 = vweird.f32 %v376_v61 }
 0x239   :  { %v3863_v5 = vpop.eup %3862  ;;  %v408_v6 = vmul.f32 %v3861_v3, %v375_v48  ;;  %v442_v1 = vmul.f32 %v437_v63, %v390_v4  ;;  %vm413_vm14 = vweird.f32 %v3861_v3  ;;  %v431_v54 = vand.u32 2147483647, %v376_v61 }
 0x23a   :  { %v393_v11 = vmul.f32 %v3863_v5, %v4504_v44  ;;  %vm414_vm2 = vmor %vm412_vm15, %vm413_vm14  ;;  %vm398_vm4 = vweird.f32 %v3863_v5  ;;  %v404_v60 = vor.u32 1.1754944e-38, %v403_v49  ;;  %v434_v62 = vor.u32 1.1754944e-38, %v433_v51 }
 0x23b   :  { %v409_v7 = vsub.f32 1.0, %v408_v6  ;;  %v444_v22 = vadd.f32 %v442_v1, %v4513_v10  ;;  %vm399_vm7 = vmor %vm397_vm6, %vm398_vm4  ;;  %vm432_vm11 = vcmp.eq.f32.partialorder %v431_v54, 8.507059e+37 }
 0x23c   :  { %v394_v24 = vsub.f32 1.0, %v393_v11 }
 0x23d   :  { %v410_v13 = vmul.f32 %v3861_v3, %v409_v7  ;;  %3866 = vtanh.f32 %v444_v22 }
 0x23e   :  { %v3865_v15 = vpop.eup %3864  ;;  %v395_v40 = vmul.f32 %v3863_v5, %v394_v24 }
 0x23f   :  { %v411_v20 = vadd.f32 %v3861_v3, %v410_v13  ;;  %v423_v21 = vmul.f32 %v3865_v15, %v376_v61  ;;  %vm428_vm5 = vweird.f32 %v3865_v15 }
 0x240   :  { %v396_v45 = vadd.f32 %v3863_v5, %v395_v40  ;;  %vm429_vm9 = vmor %vm427_vm8, %vm428_vm5 }
 0x241   :  { %v415_v28 = vsel %vm414_vm2, %v3861_v3, %v411_v20  ;;  %v424_v35 = vsub.f32 1.0, %v423_v21 }
 0x242   :  { %v420_v37 = vsel %vm417_vm3, %v419_v26, %v415_v28  ;;  %v400_v55 = vsel %vm399_vm7, %v3863_v5, %v396_v45 }
 0x243   :  { %v443_v39 = vmul.f32 %v439_v16, %v420_v37  ;;  %v425_v41 = vmul.f32 %v3865_v15, %v424_v35  ;;  %v3867_v48 = vpop.eup %3866  ;;  %v405_v2 = vsel %vm402_vm10, %v404_v60, %v400_v55 }
 0x244   :  { %v448_v57 = vsub.f32 0.0, %v3867_v48 }
 0x245   :  { %v445_v42 = vadd.f32 %v443_v39, %v4517_v29  ;;  %v426_v46 = vadd.f32 %v3865_v15, %v425_v41 }
 0x246   :  { %v450_v4 = vmul.f32 %v448_v57, %v405_v2 }
 0x247   :  { %3868 = vtanh.f32 %v445_v42  ;;  %v430_v56 = vsel %vm429_vm9, %v3865_v15, %v426_v46 }
 0x248   :  { %v435_v3 = vsel %vm432_vm11, %v434_v62, %v430_v56  ;;  %v4525_v44 = vadd.f32 %v3867_v48, %v450_v4 }
 0x24d   :  { %v3869_v59 = vpop.eup %3868 }
 0x24e   :  { %v449_v63 = vsub.f32 0.0, %v3869_v59 }
 0x250   :  { %v451_v6 = vmul.f32 %v449_v63, %v435_v3 }
 0x252   :  { %v4523_v7 = vadd.f32 %v3869_v59, %v451_v6 }
 0x254   :  { %v456_v61 = vrot.slane %v4523_v7, 7 }
 0x256   :  { %v458_v5 = vsel %vm457_vm12, %v456_v61, %v4525_v44 }
 0x257   :  { %3695 = vmatmul.msk.f32.vlgmr.msra.gmra.mxu3 %vm42_vm0, %v458_v5  ;;  %3696 = vmatmul.msk.f32.vlgmr.msra.gmra.mxu0 %vm42_vm0, %v458_v5 }
 0x258   :  { %3697 = vmatmul.msk.f32.vlgmr.msrb.gmra.mxu1 %vm42_vm0, %v458_v5  ;;  %883 = vmatpush.msra.mxu3 %v4400_v43 }
 0x259   :  { %1030 = vmatpush.msra.mxu0 %v4341_v23  ;;  %1050 = vmatpush.msrb.mxu1 %v4375_v32 }
 0x25a   :  { %884 = vmatpush.msra.mxu3 %v4412_v47 }
 0x25b   :  { %1031 = vmatpush.msra.mxu0 %v4350_v25  ;;  %1051 = vmatpush.msrb.mxu1 %v4380_v33 }
 0x25c   :  { %885 = vmatpush.msra.mxu3 %v4421_v53 }
 0x25d   :  { %1032 = vmatpush.msra.mxu0 %v4358_v27  ;;  %1052 = vmatpush.msrb.mxu1 %v4386_v34 }
 0x25e   :  { %886 = vmatpush.msra.mxu3 %v4431_v58 }
 0x25f   :  { %1033 = vmatpush.msra.mxu0 %v4367_v30  ;;  %1053 = vmatpush.msrb.mxu1 %v4392_v38 }
 0x2d4   :  { %v498_v1 = vpop.f32.mrf.mxu0 }
 0x2d5   :  { %v524_v11 = vrot.slane %v498_v1, 7  ;;  %v532_v12 = vadd.f32 %v498_v1, %v4501_v36  ;;  %v518_v49 = vpop.f32.mrf.mxu1 }
 0x2d6   :  { %v609_v60 = vadd.f32 %v518_v49, %v4509_v50 }
 0x2d7   :  { %v530_v13 = vadd.f32 %v524_v11, %v4497_v19  ;;  %v3701_v17 = vmul.f32 -1.442695, %v532_v12 }
 0x2d9   :  { %v3699_v22 = vmul.f32 -1.442695, %v530_v13 }
 0x2da   :  { %v478_v14 = vpop.f32.mrf.mxu3 }
 0x2db   :  { %v523_v15 = vrot.slane %v478_v14, 7  ;;  %v531_v16 = vadd.f32 %v478_v14, %v4495_v18  ;;  %v611_v14 = vrot.slane %v609_v60, 7 }
 0x2dd   :  { %v529_v20 = vadd.f32 %v523_v15, %v4489_v9  ;;  %v3700_v21 = vmul.f32 -1.442695, %v531_v16 }
 0x2df   :  { %v3698_v24 = vmul.f32 -1.442695, %v529_v20  ;;  %3870 = vpow2.f32 %v3700_v21 }
 0x2e0   :  { %3872 = vpow2.f32 %v3701_v17 }
 0x2e1   :  { %3874 = vpow2.f32 %v3698_v24 }
 0x2e2   :  { %3876 = vpow2.f32 %v3699_v22 }
 0x2e5   :  { %v3871_v26 = vpop.eup %3870 }
 0x2e6   :  { %v3873_v28 = vpop.eup %3872  ;;  %v547_v35 = vadd.f32 1.0, %v3871_v26 }
 0x2e7   :  { %v3875_v37 = vpop.eup %3874  ;;  %v4549_v41 = vadd.f32 1.0, %v3873_v28 }
 0x2e8   :  { %v3877_v39 = vpop.eup %3876  ;;  %v545_v40 = vadd.f32 1.0, %v3875_v37  ;;  %3878 = vrcp.f32 %v547_v35  ;;  %v590_v54 = vand.u32 2147483648, %v547_v35  ;;  %v588_v57 = vand.u32 2147483647, %v547_v35 }
 0x2e9   :  { %v4551_v42 = vadd.f32 1.0, %v3877_v39  ;;  %vm584_vm14 = vweird.f32 %v547_v35  ;;  %vm599_vm9 = vweird.f32 %v4549_v41  ;;  %v605_v49 = vand.u32 2147483648, %v4549_v41 }
 0x2ea   :  { %3880 = vrcp.f32 %v545_v40  ;;  %v560_v62 = vand.u32 2147483648, %v545_v40  ;;  %v558_v3 = vand.u32 2147483647, %v545_v40  ;;  %v591_v6 = vor.u32 1.1754944e-38, %v590_v54 }
 0x2eb   :  { %3882 = vrcp.f32 %v4549_v41  ;;  %vm554_vm3 = vweird.f32 %v545_v40  ;;  %vm589_vm4 = vcmp.eq.f32.partialorder %v588_v57, 8.507059e+37  ;;  %vm569_vm10 = vweird.f32 %v4551_v42 }
 0x2ec   :  { %3884 = vrcp.f32 %v4551_v42  ;;  %v561_v12 = vor.u32 1.1754944e-38, %v560_v62  ;;  %vm559_vm6 = vcmp.eq.f32.partialorder %v558_v3, 8.507059e+37  ;;  %v606_v3 = vor.u32 1.1754944e-38, %v605_v49 }
 0x2ee   :  { %v3879_v45 = vpop.eup %3878 }
 0x2ef   :  { %v580_v46 = vmul.f32 %v3879_v45, %v547_v35  ;;  %vm585_vm13 = vweird.f32 %v3879_v45 }
 0x2f0   :  { %v3881_v48 = vpop.eup %3880  ;;  %vm586_vm2 = vmor %vm584_vm14, %vm585_vm13 }
 0x2f1   :  { %v550_v51 = vmul.f32 %v3881_v48, %v545_v40  ;;  %v581_v52 = vsub.f32 1.0, %v580_v46  ;;  %v4555_v59 = vpop.eup %3882  ;;  %vm555_vm15 = vweird.f32 %v3881_v48 }
 0x2f2   :  { %v3885_v63 = vpop.eup %3884  ;;  %v595_v11 = vmul.f32 %v4555_v59, %v4549_v41  ;;  %vm556_vm5 = vmor %vm554_vm3, %vm555_vm15  ;;  %vm600_vm7 = vweird.f32 %v4555_v59 }
 0x2f3   :  { %v551_v55 = vsub.f32 1.0, %v550_v51  ;;  %v582_v56 = vmul.f32 %v3879_v45, %v581_v52  ;;  %v565_v1 = vmul.f32 %v3885_v63, %v4551_v42  ;;  %vm570_vm8 = vweird.f32 %v3885_v63  ;;  %vm601_vm11 = vmor %vm599_vm9, %vm600_vm7 }
 0x2f4   :  { %v596_v24 = vsub.f32 1.0, %v595_v11  ;;  %v603_v51 = vand.u32 2147483647, %v4549_v41  ;;  %v573_v52 = vand.u32 2147483647, %v4551_v42  ;;  %vm571_vm13 = vmor %vm569_vm10, %vm570_vm8 }
 0x2f5   :  { %v552_v2 = vmul.f32 %v3881_v48, %v551_v55  ;;  %v583_v4 = vadd.f32 %v3879_v45, %v582_v56  ;;  %v566_v22 = vsub.f32 1.0, %v565_v1 }
 0x2f6   :  { %v597_v35 = vmul.f32 %v4555_v59, %v596_v24  ;;  %vm574_vm14 = vcmp.eq.f32.partialorder %v573_v52, 8.507059e+37  ;;  %vm604_vm15 = vcmp.eq.f32.partialorder %v603_v51, 8.507059e+37 }
 0x2f7   :  { %v553_v61 = vadd.f32 %v3881_v48, %v552_v2  ;;  %v587_v5 = vsel %vm586_vm2, %v3879_v45, %v583_v4  ;;  %v567_v28 = vmul.f32 %v3885_v63, %v566_v22 }
 0x2f8   :  { %v592_v13 = vsel %vm589_vm4, %v591_v6, %v587_v5  ;;  %v598_v40 = vadd.f32 %v4555_v59, %v597_v35 }
 0x2f9   :  { %v557_v15 = vsel %vm556_vm5, %v3881_v48, %v553_v61  ;;  %v615_v16 = vmul.f32 %v609_v60, %v592_v13  ;;  %v568_v39 = vadd.f32 %v3885_v63, %v567_v28  ;;  %v575_v48 = vand.u32 2147483648, %v4551_v42 }
 0x2fa   :  { %v562_v17 = vsel %vm559_vm6, %v561_v12, %v557_v15  ;;  %v602_v57 = vsel %vm601_vm11, %v4555_v59, %v598_v40 }
 0x2fb   :  { %v614_v20 = vmul.f32 %v611_v14, %v562_v17  ;;  %v617_v21 = vadd.f32 %v615_v16, %v4517_v29  ;;  %v572_v56 = vsel %vm571_vm13, %v3885_v63, %v568_v39  ;;  %v576_v2 = vor.u32 1.1754944e-38, %v575_v48 }
 0x2fc   :  { %v607_v6 = vsel %vm604_vm15, %v606_v3, %v602_v57 }
 0x2fd   :  { %v616_v26 = vadd.f32 %v614_v20, %v4513_v10  ;;  %3886 = vtanh.f32 %v617_v21  ;;  %v577_v4 = vsel %vm574_vm14, %v576_v2, %v572_v56 }
 0x2ff   :  { %3888 = vtanh.f32 %v616_v26 }
 0x303   :  { %v3887_v37 = vpop.eup %3886 }
 0x304   :  { %v623_v45 = vrot.slane %v3887_v37, 1 }
 0x305   :  { %v3889_v46 = vpop.eup %3888 }
 0x306   :  { %v622_v54 = vrot.slane %v3889_v46, 1  ;;  %v627_v55 = vsub.f32 %v4523_v7, %v623_v45 }
 0x308   :  { %v626_v60 = vsub.f32 %v4525_v44, %v622_v54  ;;  %v631_v62 = vrot.slane %v627_v55, 7 }
 0x30a   :  { %v630_v41 = vrot.slane %v626_v60, 7  ;;  %v635_v42 = vmul.f32 %v631_v62, %v607_v6 }
 0x30c   :  { %v634_v61 = vmul.f32 %v630_v41, %v577_v4  ;;  %v4577_v1 = vadd.f32 %v3887_v37, %v635_v42 }
 0x30e   :  { %v4575_v5 = vadd.f32 %v3889_v46, %v634_v61 }
 0x310   :  { %v640_v63 = vrot.slane %v4575_v5, 1 }
 0x312   :  { %v641_v59 = vsel %vm457_vm12, %v4577_v1, %v640_v63 }
 0x313   :  { %3702 = vmatmul.msk.f32.vlgmr.msrb.gmra.mxu2 %vm42_vm0, %v641_v59  ;;  %3703 = vmatmul.msk.f32.vlgmr.msrb.gmra.mxu3 %vm42_vm0, %v641_v59 }
 0x314   :  { %3704 = vmatmul.msk.f32.vlgmr.msrb.gmra.mxu0 %vm42_vm0, %v641_v59  ;;  %1070 = vmatpush.msrb.mxu2 %v4400_v43 }
 0x315   :  { %1217 = vmatpush.msrb.mxu3 %v4341_v23  ;;  %1237 = vmatpush.msrb.mxu0 %v4375_v32 }
 0x316   :  { %1071 = vmatpush.msrb.mxu2 %v4412_v47 }
 0x317   :  { %1218 = vmatpush.msrb.mxu3 %v4350_v25  ;;  %1238 = vmatpush.msrb.mxu0 %v4380_v33 }
 0x318   :  { %1072 = vmatpush.msrb.mxu2 %v4421_v53 }
 0x319   :  { %1219 = vmatpush.msrb.mxu3 %v4358_v27  ;;  %1239 = vmatpush.msrb.mxu0 %v4386_v34 }
 0x31a   :  { %1073 = vmatpush.msrb.mxu2 %v4431_v58 }
 0x31b   :  { %1220 = vmatpush.msrb.mxu3 %v4367_v30  ;;  %1240 = vmatpush.msrb.mxu0 %v4392_v38 }
 0x391   :  { %v701_v54 = vpop.f32.mrf.mxu0 }
 0x392   :  { %v794_v60 = vadd.f32 %v701_v54, %v4509_v50 }
 0x396   :  { %v661_v11 = vpop.f32.mrf.mxu2  ;;  %v681_v12 = vpop.f32.mrf.mxu3 }
 0x397   :  { %v706_v13 = vrot.slane %v661_v11, 6  ;;  %v708_v14 = vrot.slane %v661_v11, 7  ;;  %v707_v15 = vrot.slane %v681_v12, 6  ;;  %v709_v16 = vrot.slane %v681_v12, 7 }
 0x398   :  { %v796_v11 = vrot.slane %v794_v60, 6 }
 0x399   :  { %v714_v17 = vadd.f32 %v706_v13, %v4489_v9  ;;  %v716_v20 = vadd.f32 %v708_v14, %v4495_v18  ;;  %v715_v21 = vadd.f32 %v707_v15, %v4497_v19  ;;  %v717_v22 = vadd.f32 %v709_v16, %v4501_v36 }
 0x39b   :  { %v3705_v24 = vmul.f32 -1.442695, %v714_v17  ;;  %v3707_v26 = vmul.f32 -1.442695, %v716_v20  ;;  %v3706_v28 = vmul.f32 -1.442695, %v715_v21 }
 0x39c   :  { %v3708_v35 = vmul.f32 -1.442695, %v717_v22  ;;  %v797_v21 = vrot.slane %v794_v60, 7 }
 0x39d   :  { %3890 = vpow2.f32 %v3705_v24 }
 0x39e   :  { %3892 = vpow2.f32 %v3707_v26 }
 0x39f   :  { %3894 = vpow2.f32 %v3706_v28 }
 0x3a0   :  { %3896 = vpow2.f32 %v3708_v35 }
 0x3a3   :  { %v3891_v37 = vpop.eup %3890 }
 0x3a4   :  { %v3893_v39 = vpop.eup %3892  ;;  %v730_v40 = vadd.f32 1.0, %v3891_v37 }
 0x3a5   :  { %v3895_v45 = vpop.eup %3894  ;;  %v732_v46 = vadd.f32 1.0, %v3893_v39 }
 0x3a6   :  { %v3897_v48 = vpop.eup %3896  ;;  %3898 = vrcp.f32 %v730_v40  ;;  %v4601_v49 = vadd.f32 1.0, %v3895_v45  ;;  %v745_v2 = vand.u32 2147483648, %v730_v40  ;;  %v743_v6 = vand.u32 2147483647, %v730_v40 }
 0x3a7   :  { %3900 = vrcp.f32 %v732_v46  ;;  %v4603_v51 = vadd.f32 1.0, %v3897_v48  ;;  %v775_v61 = vand.u32 2147483648, %v732_v46  ;;  %v773_v59 = vand.u32 2147483647, %v732_v46 }
 0x3a8   :  { %3902 = vrcp.f32 %v4601_v49  ;;  %vm739_vm4 = vweird.f32 %v730_v40  ;;  %v746_v13 = vor.u32 1.1754944e-38, %v745_v2  ;;  %vm769_vm6 = vweird.f32 %v732_v46 }
 0x3a9   :  { %3904 = vrcp.f32 %v4603_v51  ;;  %vm744_vm7 = vcmp.eq.f32.partialorder %v743_v6, 8.507059e+37  ;;  %v776_v17 = vor.u32 1.1754944e-38, %v775_v61  ;;  %vm774_vm9 = vcmp.eq.f32.partialorder %v773_v59, 8.507059e+37 }
 0x3aa   :  { %vm754_vm13 = vweird.f32 %v4601_v49  ;;  %v758_v60 = vand.u32 2147483647, %v4601_v49  ;;  %vm784_vm15 = vweird.f32 %v4603_v51 }
 0x3ac   :  { %v3899_v52 = vpop.eup %3898 }
 0x3ad   :  { %v3901_v55 = vpop.eup %3900  ;;  %v735_v56 = vmul.f32 %v3899_v52, %v730_v40  ;;  %vm740_vm2 = vweird.f32 %v3899_v52 }
 0x3ae   :  { %v765_v57 = vmul.f32 %v3901_v55, %v732_v46  ;;  %v4608_v41 = vpop.eup %3902  ;;  %vm770_vm3 = vweird.f32 %v3901_v55  ;;  %vm741_vm5 = vmor %vm739_vm4, %vm740_vm2 }
 0x3af   :  { %v736_v62 = vsub.f32 1.0, %v735_v56  ;;  %v3905_v42 = vpop.eup %3904  ;;  %v750_v15 = vmul.f32 %v4608_v41, %v4601_v49  ;;  %vm771_vm8 = vmor %vm769_vm6, %vm770_vm3  ;;  %vm755_vm10 = vweird.f32 %v4608_v41  ;;  %vm759_vm3 = vcmp.eq.f32.partialorder %v758_v60, 8.507059e+37 }
 0x3b0   :  { %v766_v3 = vsub.f32 1.0, %v765_v57  ;;  %v780_v20 = vmul.f32 %v3905_v42, %v4603_v51  ;;  %vm785_vm11 = vweird.f32 %v3905_v42  ;;  %vm756_vm14 = vmor %vm754_vm13, %vm755_vm10 }
 0x3b1   :  { %v737_v4 = vmul.f32 %v3899_v52, %v736_v62  ;;  %v751_v37 = vsub.f32 1.0, %v750_v15  ;;  %v790_v62 = vand.u32 2147483648, %v4603_v51  ;;  %vm786_vm2 = vmor %vm784_vm15, %vm785_vm11 }
 0x3b2   :  { %v767_v63 = vmul.f32 %v3901_v55, %v766_v3  ;;  %v781_v39 = vsub.f32 1.0, %v780_v20  ;;  %v788_v3 = vand.u32 2147483647, %v4603_v51 }
 0x3b3   :  { %v738_v12 = vadd.f32 %v3899_v52, %v737_v4  ;;  %v752_v46 = vmul.f32 %v4608_v41, %v751_v37 }
 0x3b4   :  { %v768_v14 = vadd.f32 %v3901_v55, %v767_v63  ;;  %v782_v48 = vmul.f32 %v3905_v42, %v781_v39  ;;  %vm789_vm4 = vcmp.eq.f32.partialorder %v788_v3, 8.507059e+37 }
 0x3b5   :  { %v742_v16 = vsel %vm741_vm5, %v3899_v52, %v738_v12  ;;  %v753_v52 = vadd.f32 %v4608_v41, %v752_v46 }
 0x3b6   :  { %v747_v22 = vsel %vm744_vm7, %v746_v13, %v742_v16  ;;  %v772_v24 = vsel %vm771_vm8, %v3901_v55, %v768_v14  ;;  %v760_v55 = vand.u32 2147483648, %v4601_v49  ;;  %v783_v56 = vadd.f32 %v3905_v42, %v782_v48 }
 0x3b7   :  { %v777_v26 = vsel %vm774_vm9, %v776_v17, %v772_v24  ;;  %v800_v28 = vmul.f32 %v796_v11, %v747_v22  ;;  %v757_v6 = vsel %vm756_vm14, %v4608_v41, %v753_v52  ;;  %v791_v49 = vor.u32 1.1754944e-38, %v790_v62 }
 0x3b8   :  { %v801_v35 = vmul.f32 %v797_v21, %v777_v26  ;;  %v761_v63 = vor.u32 1.1754944e-38, %v760_v55  ;;  %v787_v59 = vsel %vm786_vm2, %v3905_v42, %v783_v56 }
 0x3b9   :  { %v802_v40 = vadd.f32 %v800_v28, %v4513_v10  ;;  %v792_v15 = vsel %vm789_vm4, %v791_v49, %v787_v59 }
 0x3ba   :  { %v803_v45 = vadd.f32 %v801_v35, %v4517_v29  ;;  %v762_v13 = vsel %vm759_vm3, %v761_v63, %v757_v6 }
 0x3bb   :  { %3906 = vtanh.f32 %v802_v40 }
 0x3bc   :  { %3908 = vtanh.f32 %v803_v45 }
 0x3c1   :  { %v3907_v54 = vpop.eup %3906 }
 0x3c2   :  { %v3909_v57 = vpop.eup %3908  ;;  %v808_v2 = vrot.slane %v3907_v54, 1 }
 0x3c3   :  { %v809_v4 = vrot.slane %v3909_v57, 1 }
 0x3c4   :  { %v812_v61 = vsub.f32 %v4575_v5, %v808_v2 }
 0x3c5   :  { %v813_v11 = vsub.f32 %v4577_v1, %v809_v4 }
 0x3c6   :  { %v816_v12 = vrot.slane %v812_v61, 7 }
 0x3c7   :  { %v817_v14 = vrot.slane %v813_v11, 7 }
 0x3c8   :  { %v820_v16 = vmul.f32 %v816_v12, %v762_v13 }
 0x3c9   :  { %v821_v17 = vmul.f32 %v817_v14, %v792_v15 }
 0x3ca   :  { %v4627_v51 = vadd.f32 %v3907_v54, %v820_v16 }
 0x3cb   :  { %v4629_v20 = vadd.f32 %v3909_v57, %v821_v17 }
 0x3cc   :  { %v826_v41 = vrot.slane %v4627_v51, 2 }
 0x3cd   :  { %v827_v21 = vrot.slane %v4629_v20, 1 }
 0x3cf   :  { %v828_v42 = vsel %vm457_vm12, %v827_v21, %v826_v41 }
 0x3d0   :  { %3709 = vmatmul.msk.f32.vlgmr.msra.gmra.mxu1 %vm42_vm0, %v828_v42  ;;  %3710 = vmatmul.msk.f32.vlgmr.msra.gmra.mxu2 %vm42_vm0, %v828_v42 }
 0x3d1   :  { %3711 = vmatmul.msk.f32.vlgmr.msra.gmra.mxu3 %vm42_vm0, %v828_v42  ;;  %1257 = vmatpush.msra.mxu1 %v4400_v43 }
 0x3d2   :  { %1404 = vmatpush.msra.mxu2 %v4341_v23  ;;  %1424 = vmatpush.msra.mxu3 %v4375_v32 }
 0x3d3   :  { %1258 = vmatpush.msra.mxu1 %v4412_v47 }
 0x3d4   :  { %1405 = vmatpush.msra.mxu2 %v4350_v25  ;;  %1425 = vmatpush.msra.mxu3 %v4380_v33 }
 0x3d5   :  { %1259 = vmatpush.msra.mxu1 %v4421_v53 }
 0x3d6   :  { %1406 = vmatpush.msra.mxu2 %v4358_v27  ;;  %1426 = vmatpush.msra.mxu3 %v4386_v34 }
 0x3d7   :  { %1260 = vmatpush.msra.mxu1 %v4431_v58 }
 0x3d8   :  { %1407 = vmatpush.msra.mxu2 %v4367_v30  ;;  %1427 = vmatpush.msra.mxu3 %v4392_v38 }
 0x44d   :  { %v848_v23 = vpop.f32.mrf.mxu1 }
 0x44e   :  { %v893_v32 = vrot.slane %v848_v23, 5  ;;  %v895_v43 = vrot.slane %v848_v23, 6 }
 0x450   :  { %v901_v47 = vadd.f32 %v893_v32, %v4489_v9  ;;  %v903_v25 = vadd.f32 %v895_v43, %v4495_v18 }
 0x452   :  { %v3712_v33 = vmul.f32 -1.442695, %v901_v47  ;;  %v3714_v22 = vmul.f32 -1.442695, %v903_v25 }
 0x453   :  { %v868_v53 = vpop.f32.mrf.mxu2 }
 0x454   :  { %3910 = vpow2.f32 %v3712_v33  ;;  %v894_v27 = vrot.slane %v868_v53, 5  ;;  %v896_v24 = vrot.slane %v868_v53, 6  ;;  %v888_v54 = vpop.f32.mrf.mxu3 }
 0x455   :  { %3912 = vpow2.f32 %v3714_v22  ;;  %v981_v60 = vadd.f32 %v888_v54, %v4509_v50 }
 0x456   :  { %v902_v34 = vadd.f32 %v894_v27, %v4497_v19  ;;  %v904_v30 = vadd.f32 %v896_v24, %v4501_v36 }
 0x457   :  { %v983_v12 = vrot.slane %v981_v60, 5  ;;  %v984_v23 = vrot.slane %v981_v60, 6 }
 0x458   :  { %v3713_v58 = vmul.f32 -1.442695, %v902_v34  ;;  %v3715_v38 = vmul.f32 -1.442695, %v904_v30 }
 0x45a   :  { %v3911_v26 = vpop.eup %3910  ;;  %3914 = vpow2.f32 %v3713_v58 }
 0x45b   :  { %v3913_v28 = vpop.eup %3912  ;;  %v917_v35 = vadd.f32 1.0, %v3911_v26  ;;  %3916 = vpow2.f32 %v3715_v38 }
 0x45c   :  { %v919_v37 = vadd.f32 1.0, %v3913_v28 }
 0x45d   :  { %3918 = vrcp.f32 %v917_v35  ;;  %v932_v62 = vand.u32 2147483648, %v917_v35  ;;  %v930_v6 = vand.u32 2147483647, %v917_v35  ;;  %vm926_vm7 = vweird.f32 %v917_v35 }
 0x45e   :  { %3920 = vrcp.f32 %v919_v37  ;;  %v962_v61 = vand.u32 2147483648, %v919_v37  ;;  %v960_v11 = vand.u32 2147483647, %v919_v37  ;;  %vm956_vm9 = vweird.f32 %v919_v37 }
 0x45f   :  { %v933_v14 = vor.u32 1.1754944e-38, %v932_v62  ;;  %vm931_vm10 = vcmp.eq.f32.partialorder %v930_v6, 8.507059e+37 }
 0x460   :  { %v3915_v39 = vpop.eup %3914  ;;  %v963_v41 = vor.u32 1.1754944e-38, %v962_v61  ;;  %vm961_vm13 = vcmp.eq.f32.partialorder %v960_v11, 8.507059e+37  ;;  %v4692_v11 = vld [vmem:[%s5708_s1 + $0xb8] sm:$0xff] }
 0x461   :  { %v3917_v40 = vpop.eup %3916  ;;  %v4653_v45 = vadd.f32 1.0, %v3915_v39 }
 0x462   :  { %v4655_v46 = vadd.f32 1.0, %v3917_v40 }
 0x463   :  { %v3919_v48 = vpop.eup %3918  ;;  %3922 = vrcp.f32 %v4653_v45  ;;  %v947_v58 = vand.u32 2147483648, %v4653_v45  ;;  %vm941_vm2 = vweird.f32 %v4653_v45  ;;  %v945_v28 = vand.u32 2147483647, %v4653_v45 }
 0x464   :  { %v3921_v52 = vpop.eup %3920  ;;  %3924 = vrcp.f32 %v4655_v46  ;;  %v922_v55 = vmul.f32 %v3919_v48, %v917_v35  ;;  %vm927_vm5 = vweird.f32 %v3919_v48  ;;  %v977_v35 = vand.u32 2147483648, %v4655_v46 }
 0x465   :  { %v952_v56 = vmul.f32 %v3921_v52, %v919_v37  ;;  %vm957_vm6 = vweird.f32 %v3921_v52  ;;  %vm928_vm8 = vmor %vm926_vm7, %vm927_vm5  ;;  %vm971_vm4 = vweird.f32 %v4655_v46  ;;  %v975_v39 = vand.u32 2147483647, %v4655_v46 }
 0x466   :  { %v923_v57 = vsub.f32 1.0, %v922_v55  ;;  %vm958_vm11 = vmor %vm956_vm9, %vm957_vm6  ;;  %v948_v54 = vor.u32 1.1754944e-38, %v947_v58  ;;  %vm946_vm6 = vcmp.eq.f32.partialorder %v945_v28, 8.507059e+37 }
 0x467   :  { %v953_v2 = vsub.f32 1.0, %v952_v56  ;;  %vm976_vm7 = vcmp.eq.f32.partialorder %v975_v39, 8.507059e+37 }
 0x468   :  { %v924_v4 = vmul.f32 %v3919_v48, %v923_v57  ;;  %v978_v57 = vor.u32 1.1754944e-38, %v977_v35 }
 0x469   :  { %v4660_v3 = vpop.eup %3922  ;;  %v954_v59 = vmul.f32 %v3921_v52, %v953_v2 }
 0x46a   :  { %v3925_v63 = vpop.eup %3924  ;;  %v925_v49 = vadd.f32 %v3919_v48, %v924_v4  ;;  %v937_v13 = vmul.f32 %v4660_v3, %v4653_v45  ;;  %vm942_vm14 = vweird.f32 %v4660_v3 }
 0x46b   :  { %v955_v15 = vadd.f32 %v3921_v52, %v954_v59  ;;  %v967_v16 = vmul.f32 %v3925_v63, %v4655_v46  ;;  %vm972_vm15 = vweird.f32 %v3925_v63  ;;  %vm943_vm3 = vmor %vm941_vm2, %vm942_vm14 }
 0x46c   :  { %v929_v17 = vsel %vm928_vm8, %v3919_v48, %v925_v49  ;;  %v938_v47 = vsub.f32 1.0, %v937_v13  ;;  %vm973_vm5 = vmor %vm971_vm4, %vm972_vm15  ;;  %v4185_v49 = vld [vmem:[%s5708_s1 + $0xa8] sm:$0xff]  ;;  %v4704_v13 = vld [vmem:[%s5708_s1 + $0xa0] sm:$0xff] }
 0x46d   :  { %v934_v21 = vsel %vm931_vm10, %v933_v14, %v929_v17  ;;  %v959_v42 = vsel %vm958_vm11, %v3921_v52, %v955_v15  ;;  %v968_v33 = vsub.f32 1.0, %v967_v16  ;;  %v4188_v14 = vld [vmem:[%s5708_s1 + $0x90] sm:$0xff]  ;;  %v4189_v15 = vld [vmem:[%s5708_s1 + $0x98] sm:$0xff]  ;;  %v4716_v16 = vld [vmem:[%s5708_s1 + $0x88] sm:$0xff] }
 0x46e   :  { %v964_v32 = vsel %vm961_vm13, %v963_v41, %v959_v42  ;;  %v987_v43 = vmul.f32 %v983_v12, %v934_v21  ;;  %v939_v27 = vmul.f32 %v4660_v3, %v938_v47  ;;  %v4186_v12 = vld [vmem:[%s5708_s1 + $0xb0] sm:$0xff]  ;;  %v4191_v17 = vld [vmem:[%s5708_s1 + $0x78] sm:$0xff]  ;;  %v4192_v41 = vld [vmem:[%s5708_s1 + $0x80] sm:$0xff] }
 0x46f   :  { %v988_v25 = vmul.f32 %v984_v23, %v964_v32  ;;  %v969_v24 = vmul.f32 %v3925_v63, %v968_v33  ;;  %v4728_v21 = vld [vmem:[%s5708_s1 + $0x70] sm:$0xff]  ;;  %v4194_v42 = vld [vmem:[%s5708_s1 + $0x60] sm:$0xff]  ;;  %v4195_v23 = vld [vmem:[%s5708_s1 + $0x68] sm:$0xff] }
 0x470   :  { %v989_v22 = vadd.f32 %v987_v43, %v4513_v10  ;;  %v940_v34 = vadd.f32 %v4660_v3, %v939_v27 }
 0x471   :  { %v990_v53 = vadd.f32 %v988_v25, %v4517_v29  ;;  %v970_v38 = vadd.f32 %v3925_v63, %v969_v24 }
 0x472   :  { %3926 = vtanh.f32 %v989_v22  ;;  %v944_v48 = vsel %vm943_vm3, %v4660_v3, %v940_v34 }
 0x473   :  { %3928 = vtanh.f32 %v990_v53  ;;  %v974_v55 = vsel %vm973_vm5, %v3925_v63, %v970_v38  ;;  %v949_v60 = vsel %vm946_vm6, %v948_v54, %v944_v48 }
 0x474   :  { %v979_v2 = vsel %vm976_vm7, %v978_v57, %v974_v55 }
 0x478   :  { %v3927_v30 = vpop.eup %3926 }
 0x479   :  { %v3929_v26 = vpop.eup %3928  ;;  %v995_v37 = vrot.slane %v3927_v30, 1 }
 0x47a   :  { %v996_v40 = vrot.slane %v3929_v26, 1 }
 0x47b   :  { %v999_v52 = vsub.f32 %v4627_v51, %v995_v37 }
 0x47c   :  { %v1000_v56 = vsub.f32 %v4629_v20, %v996_v40 }
 0x47d   :  { %v1003_v45 = vrot.slane %v999_v52, 7 }
 0x47e   :  { %v1004_v62 = vrot.slane %v1000_v56, 7 }
 0x47f   :  { %v1007_v4 = vmul.f32 %v1003_v45, %v949_v60 }
 0x480   :  { %v1008_v6 = vmul.f32 %v1004_v62, %v979_v2 }
 0x481   :  { %v4679_v46 = vadd.f32 %v3927_v30, %v1007_v4 }
 0x482   :  { %v4681_v61 = vadd.f32 %v3929_v26, %v1008_v6 }
 0x483   :  { %v1013_v3 = vrot.slane %v4679_v46, 3 }
 0x484   :  { %v1014_v59 = vrot.slane %v4681_v61, 2 }
 0x486   :  { %v1015_v63 = vsel %vm457_vm12, %v1014_v59, %v1013_v3 }
 0x487   :  { %3716 = vmatmul.msk.f32.vlgmr.msra.gmra.mxu0 %vm42_vm0, %v1015_v63  ;;  %3717 = vmatmul.msk.f32.vlgmr.msrb.gmra.mxu1 %vm42_vm0, %v1015_v63 }
 0x488   :  { %3718 = vmatmul.msk.f32.vlgmr.msrb.gmra.mxu2 %vm42_vm0, %v1015_v63  ;;  %1444 = vmatpush.msra.mxu0 %v4692_v11 }
 0x489   :  { %1591 = vmatpush.msrb.mxu1 %v4185_v49  ;;  %1611 = vmatpush.msrb.mxu2 %v4186_v12 }
 0x48a   :  { %1445 = vmatpush.msra.mxu0 %v4704_v13 }
 0x48b   :  { %1592 = vmatpush.msrb.mxu1 %v4188_v14  ;;  %1612 = vmatpush.msrb.mxu2 %v4189_v15 }
 0x48c   :  { %1446 = vmatpush.msra.mxu0 %v4716_v16 }
 0x48d   :  { %1593 = vmatpush.msrb.mxu1 %v4191_v17  ;;  %1613 = vmatpush.msrb.mxu2 %v4192_v41 }
 0x48e   :  { %1447 = vmatpush.msra.mxu0 %v4728_v21 }
 0x48f   :  { %1594 = vmatpush.msrb.mxu1 %v4194_v42  ;;  %1614 = vmatpush.msrb.mxu2 %v4195_v23 }
 0x504   :  { %v1035_v32 = vpop.f32.mrf.mxu0  ;;  %v1055_v43 = vpop.f32.mrf.mxu1 }
 0x505   :  { %v1080_v47 = vrot.slane %v1035_v32, 4  ;;  %v1082_v25 = vrot.slane %v1035_v32, 5  ;;  %v1081_v33 = vrot.slane %v1055_v43, 4  ;;  %v1083_v22 = vrot.slane %v1055_v43, 5 }
 0x507   :  { %v1088_v53 = vadd.f32 %v1080_v47, %v4489_v9  ;;  %v1090_v27 = vadd.f32 %v1082_v25, %v4495_v18  ;;  %v1089_v24 = vadd.f32 %v1081_v33, %v4497_v19  ;;  %v1091_v34 = vadd.f32 %v1083_v22, %v4501_v36 }
 0x509   :  { %v3719_v30 = vmul.f32 -1.442695, %v1088_v53  ;;  %v3721_v58 = vmul.f32 -1.442695, %v1090_v27  ;;  %v3720_v38 = vmul.f32 -1.442695, %v1089_v24 }
 0x50a   :  { %v3722_v26 = vmul.f32 -1.442695, %v1091_v34 }
 0x50b   :  { %3930 = vpow2.f32 %v3719_v30  ;;  %v1075_v56 = vpop.f32.mrf.mxu2 }
 0x50c   :  { %3932 = vpow2.f32 %v3721_v58  ;;  %v1168_v2 = vadd.f32 %v1075_v56, %v4509_v50 }
 0x50d   :  { %3934 = vpow2.f32 %v3720_v38 }
 0x50e   :  { %3936 = vpow2.f32 %v3722_v26  ;;  %v1170_v41 = vrot.slane %v1168_v2, 4  ;;  %v1171_v53 = vrot.slane %v1168_v2, 5 }
 0x511   :  { %v3931_v28 = vpop.eup %3930 }
 0x512   :  { %v3933_v35 = vpop.eup %3932  ;;  %v1104_v37 = vadd.f32 1.0, %v3931_v28 }
 0x513   :  { %v3935_v39 = vpop.eup %3934  ;;  %v1106_v40 = vadd.f32 1.0, %v3933_v35 }
 0x514   :  { %v3937_v48 = vpop.eup %3936  ;;  %3938 = vrcp.f32 %v1104_v37  ;;  %v4741_v52 = vadd.f32 1.0, %v3935_v39  ;;  %v1119_v4 = vand.u32 2147483648, %v1104_v37  ;;  %v1117_v63 = vand.u32 2147483647, %v1104_v37 }
 0x515   :  { %3940 = vrcp.f32 %v1106_v40  ;;  %v4743_v54 = vadd.f32 1.0, %v3937_v48  ;;  %v1149_v49 = vand.u32 2147483648, %v1106_v40  ;;  %v1147_v15 = vand.u32 2147483647, %v1106_v40 }
 0x516   :  { %3942 = vrcp.f32 %v4741_v52  ;;  %vm1113_vm10 = vweird.f32 %v1104_v37  ;;  %v1120_v23 = vor.u32 1.1754944e-38, %v1119_v4  ;;  %vm1143_vm13 = vweird.f32 %v1106_v40 }
 0x517   :  { %3944 = vrcp.f32 %v4743_v54  ;;  %vm1118_vm14 = vcmp.eq.f32.partialorder %v1117_v63, 8.507059e+37  ;;  %v1150_v25 = vor.u32 1.1754944e-38, %v1149_v49  ;;  %vm1148_vm2 = vcmp.eq.f32.partialorder %v1147_v15, 8.507059e+37 }
 0x518   :  { %vm1128_vm5 = vweird.f32 %v4741_v52  ;;  %v1132_v56 = vand.u32 2147483647, %v4741_v52  ;;  %vm1158_vm7 = vweird.f32 %v4743_v54 }
 0x51a   :  { %v3939_v55 = vpop.eup %3938 }
 0x51b   :  { %v3941_v57 = vpop.eup %3940  ;;  %v1109_v45 = vmul.f32 %v3939_v55, %v1104_v37  ;;  %vm1114_vm8 = vweird.f32 %v3939_v55 }
 0x51c   :  { %v1139_v60 = vmul.f32 %v3941_v57, %v1106_v40  ;;  %v4748_v3 = vpop.eup %3942  ;;  %vm1144_vm9 = vweird.f32 %v3941_v57  ;;  %vm1115_vm11 = vmor %vm1113_vm10, %vm1114_vm8  ;;  %v1134_v40 = vand.u32 2147483648, %v4741_v52 }
 0x51d   :  { %v1110_v62 = vsub.f32 1.0, %v1109_v45  ;;  %v3945_v12 = vpop.eup %3944  ;;  %v1124_v42 = vmul.f32 %v4748_v3, %v4741_v52  ;;  %vm1145_vm15 = vmor %vm1143_vm13, %vm1144_vm9  ;;  %vm1129_vm3 = vweird.f32 %v4748_v3  ;;  %vm1133_vm9 = vcmp.eq.f32.partialorder %v1132_v56, 8.507059e+37 }
 0x51e   :  { %v1140_v6 = vsub.f32 1.0, %v1139_v60  ;;  %v1154_v43 = vmul.f32 %v3945_v12, %v4743_v54  ;;  %vm1159_vm4 = vweird.f32 %v3945_v12  ;;  %vm1130_vm6 = vmor %vm1128_vm5, %vm1129_vm3  ;;  %v1162_v60 = vand.u32 2147483647, %v4743_v54 }
 0x51f   :  { %v1111_v59 = vmul.f32 %v3939_v55, %v1110_v62  ;;  %v1125_v34 = vsub.f32 1.0, %v1124_v42  ;;  %vm1160_vm8 = vmor %vm1158_vm7, %vm1159_vm4 }
 0x520   :  { %v1141_v14 = vmul.f32 %v3941_v57, %v1140_v6  ;;  %v1155_v58 = vsub.f32 1.0, %v1154_v43  ;;  %v1135_v6 = vor.u32 1.1754944e-38, %v1134_v40  ;;  %vm1163_vm10 = vcmp.eq.f32.partialorder %v1162_v60, 8.507059e+37 }
 0x521   :  { %v1112_v17 = vadd.f32 %v3939_v55, %v1111_v59  ;;  %v1126_v28 = vmul.f32 %v4748_v3, %v1125_v34 }
 0x522   :  { %v1142_v32 = vadd.f32 %v3941_v57, %v1141_v14  ;;  %v1156_v35 = vmul.f32 %v3945_v12, %v1155_v58 }
 0x523   :  { %v1116_v47 = vsel %vm1115_vm11, %v3939_v55, %v1112_v17  ;;  %v1127_v37 = vadd.f32 %v4748_v3, %v1126_v28 }
 0x524   :  { %v1121_v33 = vsel %vm1118_vm14, %v1120_v23, %v1116_v47  ;;  %v1146_v22 = vsel %vm1145_vm15, %v3941_v57, %v1142_v32  ;;  %v1157_v48 = vadd.f32 %v3945_v12, %v1156_v35  ;;  %v1164_v57 = vand.u32 2147483648, %v4743_v54 }
 0x525   :  { %v1151_v27 = vsel %vm1148_vm2, %v1150_v25, %v1146_v22  ;;  %v1174_v24 = vmul.f32 %v1170_v41, %v1121_v33  ;;  %v1131_v2 = vsel %vm1130_vm6, %v4748_v3, %v1127_v37 }
 0x526   :  { %v1175_v30 = vmul.f32 %v1171_v53, %v1151_v27  ;;  %v1161_v59 = vsel %vm1160_vm8, %v3945_v12, %v1157_v48  ;;  %v1165_v49 = vor.u32 1.1754944e-38, %v1164_v57  ;;  %v1136_v14 = vsel %vm1133_vm9, %v1135_v6, %v1131_v2 }
 0x527   :  { %v1176_v38 = vadd.f32 %v1174_v24, %v4513_v10 }
 0x528   :  { %v1177_v26 = vadd.f32 %v1175_v30, %v4517_v29  ;;  %v1166_v17 = vsel %vm1163_vm10, %v1165_v49, %v1161_v59 }
 0x529   :  { %3946 = vtanh.f32 %v1176_v38 }
 0x52a   :  { %3948 = vtanh.f32 %v1177_v26 }
 0x52f   :  { %v3947_v39 = vpop.eup %3946 }
 0x530   :  { %v3949_v55 = vpop.eup %3948  ;;  %v1182_v45 = vrot.slane %v3947_v39, 1 }
 0x531   :  { %v1183_v62 = vrot.slane %v3949_v55, 1 }
 0x532   :  { %v1186_v4 = vsub.f32 %v4679_v46, %v1182_v45 }
 0x533   :  { %v1187_v63 = vsub.f32 %v4681_v61, %v1183_v62 }
 0x534   :  { %v1190_v52 = vrot.slane %v1186_v4, 7 }
 0x535   :  { %v1191_v15 = vrot.slane %v1187_v63, 7 }
 0x536   :  { %v1194_v41 = vmul.f32 %v1190_v52, %v1136_v14 }
 0x537   :  { %v1195_v42 = vmul.f32 %v1191_v15, %v1166_v17 }
 0x538   :  { %v4767_v54 = vadd.f32 %v3947_v39, %v1194_v41 }
 0x539   :  { %v4769_v23 = vadd.f32 %v3949_v55, %v1195_v42 }
 0x53a   :  { %v1200_v3 = vrot.slane %v4767_v54, 4 }
 0x53b   :  { %v1201_v32 = vrot.slane %v4769_v23, 3 }
 0x53d   :  { %v1202_v12 = vsel %vm457_vm12, %v1201_v32, %v1200_v3 }
 0x53e   :  { %3723 = vmatmul.msk.f32.vlgmr.msrb.gmra.mxu3 %vm42_vm0, %v1202_v12  ;;  %3724 = vmatmul.msk.f32.vlgmr.msrb.gmra.mxu0 %vm42_vm0, %v1202_v12 }
 0x53f   :  { %3725 = vmatmul.msk.f32.vlgmr.msra.gmra.mxu1 %vm42_vm0, %v1202_v12  ;;  %1631 = vmatpush.msrb.mxu3 %v4692_v11 }
 0x541   :  { %1632 = vmatpush.msrb.mxu3 %v4704_v13 }
 0x543   :  { %1633 = vmatpush.msrb.mxu3 %v4716_v16 }
 0x545   :  { %1634 = vmatpush.msrb.mxu3 %v4728_v21 }
 0x5bb   :  { %v1242_v43 = vpop.f32.mrf.mxu0 }
 0x5bc   :  { %v1268_v47 = vrot.slane %v1242_v43, 3  ;;  %v1270_v25 = vrot.slane %v1242_v43, 4  ;;  %v1262_v55 = vpop.f32.mrf.mxu1 }
 0x5bd   :  { %v1355_v60 = vadd.f32 %v1262_v55, %v4509_v50 }
 0x5be   :  { %v1276_v33 = vadd.f32 %v1268_v47, %v4497_v19  ;;  %v1278_v53 = vadd.f32 %v1270_v25, %v4501_v36 }
 0x5bf   :  { %v1357_v17 = vrot.slane %v1355_v60, 3  ;;  %v1358_v25 = vrot.slane %v1355_v60, 4 }
 0x5c0   :  { %v3727_v34 = vmul.f32 -1.442695, %v1276_v33  ;;  %v3729_v13 = vmul.f32 -1.442695, %v1278_v53 }
 0x5c1   :  { %v1222_v22 = vpop.f32.mrf.mxu3 }
 0x5c2   :  { %v1267_v27 = vrot.slane %v1222_v22, 3  ;;  %v1269_v24 = vrot.slane %v1222_v22, 4  ;;  %3950 = vpow2.f32 %v3727_v34 }
 0x5c4   :  { %v1275_v30 = vadd.f32 %v1267_v27, %v4489_v9  ;;  %v1277_v11 = vadd.f32 %v1269_v24, %v4495_v18 }
 0x5c6   :  { %v3726_v58 = vmul.f32 -1.442695, %v1275_v30  ;;  %v3728_v16 = vmul.f32 -1.442695, %v1277_v11 }
 0x5c8   :  { %3952 = vpow2.f32 %v3726_v58  ;;  %v3951_v21 = vpop.eup %3950 }
 0x5c9   :  { %3954 = vpow2.f32 %v3728_v16  ;;  %v4785_v39 = vadd.f32 1.0, %v3951_v21 }
 0x5ca   :  { %3956 = vpow2.f32 %v3729_v13 }
 0x5cb   :  { %vm1315_vm8 = vweird.f32 %v4785_v39 }
 0x5ce   :  { %v3953_v38 = vpop.eup %3952 }
 0x5cf   :  { %v3955_v26 = vpop.eup %3954  ;;  %v1291_v28 = vadd.f32 1.0, %v3953_v38 }
 0x5d0   :  { %v3957_v35 = vpop.eup %3956  ;;  %v1293_v37 = vadd.f32 1.0, %v3955_v26  ;;  %v1321_v26 = vand.u32 2147483648, %v4785_v39 }
 0x5d1   :  { %3958 = vrcp.f32 %v1291_v28  ;;  %v4787_v40 = vadd.f32 1.0, %v3957_v35  ;;  %v1306_v2 = vand.u32 2147483648, %v1291_v28  ;;  %v1304_v63 = vand.u32 2147483647, %v1291_v28 }
 0x5d2   :  { %3960 = vrcp.f32 %v1293_v37  ;;  %v1336_v49 = vand.u32 2147483648, %v1293_v37  ;;  %v1334_v15 = vand.u32 2147483647, %v1293_v37  ;;  %vm1300_vm14 = vweird.f32 %v1291_v28 }
 0x5d3   :  { %3962 = vrcp.f32 %v4785_v39  ;;  %v1307_v3 = vor.u32 1.1754944e-38, %v1306_v2  ;;  %vm1330_vm2 = vweird.f32 %v1293_v37  ;;  %vm1305_vm3 = vcmp.eq.f32.partialorder %v1304_v63, 8.507059e+37 }
 0x5d4   :  { %3964 = vrcp.f32 %v4787_v40  ;;  %v1337_v47 = vor.u32 1.1754944e-38, %v1336_v49  ;;  %vm1335_vm5 = vcmp.eq.f32.partialorder %v1334_v15, 8.507059e+37  ;;  %vm1345_vm10 = vweird.f32 %v4787_v40 }
 0x5d7   :  { %v3959_v48 = vpop.eup %3958 }
 0x5d8   :  { %v3961_v56 = vpop.eup %3960  ;;  %v1296_v57 = vmul.f32 %v3959_v48, %v1291_v28  ;;  %vm1301_vm11 = vweird.f32 %v3959_v48 }
 0x5d9   :  { %v1326_v45 = vmul.f32 %v3961_v56, %v1293_v37  ;;  %v4792_v6 = vpop.eup %3962  ;;  %vm1331_vm13 = vweird.f32 %v3961_v56  ;;  %vm1302_vm15 = vmor %vm1300_vm14, %vm1301_vm11  ;;  %v1319_v37 = vand.u32 2147483647, %v4785_v39 }
 0x5da   :  { %v1297_v62 = vsub.f32 1.0, %v1296_v57  ;;  %v3965_v52 = vpop.eup %3964  ;;  %v1311_v42 = vmul.f32 %v4792_v6, %v4785_v39  ;;  %vm1332_vm4 = vmor %vm1330_vm2, %vm1331_vm13  ;;  %vm1316_vm6 = vweird.f32 %v4792_v6 }
 0x5db   :  { %v1327_v4 = vsub.f32 1.0, %v1326_v45  ;;  %v1341_v12 = vmul.f32 %v3965_v52, %v4787_v40  ;;  %vm1346_vm7 = vweird.f32 %v3965_v52  ;;  %vm1317_vm9 = vmor %vm1315_vm8, %vm1316_vm6  ;;  %vm1320_vm13 = vcmp.eq.f32.partialorder %v1319_v37, 8.507059e+37 }
 0x5dc   :  { %v1298_v59 = vmul.f32 %v3959_v48, %v1297_v62  ;;  %v1312_v24 = vsub.f32 1.0, %v1311_v42  ;;  %vm1347_vm11 = vmor %vm1345_vm10, %vm1346_vm7  ;;  %v1322_v62 = vor.u32 1.1754944e-38, %v1321_v26 }
 0x5dd   :  { %v1328_v14 = vmul.f32 %v3961_v56, %v1327_v4  ;;  %v1342_v30 = vsub.f32 1.0, %v1341_v12 }
 0x5de   :  { %v1299_v41 = vadd.f32 %v3959_v48, %v1298_v59  ;;  %v1313_v58 = vmul.f32 %v4792_v6, %v1312_v24 }
 0x5df   :  { %v1329_v32 = vadd.f32 %v3961_v56, %v1328_v14  ;;  %v1343_v16 = vmul.f32 %v3965_v52, %v1342_v30 }
 0x5e0   :  { %v1303_v43 = vsel %vm1302_vm15, %v3959_v48, %v1299_v41  ;;  %v1314_v21 = vadd.f32 %v4792_v6, %v1313_v58  ;;  %v1351_v48 = vand.u32 2147483648, %v4787_v40 }
 0x5e1   :  { %v1308_v33 = vsel %vm1305_vm3, %v1307_v3, %v1303_v43  ;;  %v1333_v22 = vsel %vm1332_vm4, %v3961_v56, %v1329_v32  ;;  %v1344_v28 = vadd.f32 %v3965_v52, %v1343_v16  ;;  %v1349_v56 = vand.u32 2147483647, %v4787_v40 }
 0x5e2   :  { %v1338_v53 = vsel %vm1335_vm5, %v1337_v47, %v1333_v22  ;;  %v1361_v27 = vmul.f32 %v1357_v17, %v1308_v33  ;;  %v1318_v45 = vsel %vm1317_vm9, %v4792_v6, %v1314_v21  ;;  %v1352_v39 = vor.u32 1.1754944e-38, %v1351_v48 }
 0x5e3   :  { %v1362_v34 = vmul.f32 %v1358_v25, %v1338_v53  ;;  %v1348_v2 = vsel %vm1347_vm11, %v3965_v52, %v1344_v28  ;;  %vm1350_vm14 = vcmp.eq.f32.partialorder %v1349_v56, 8.507059e+37  ;;  %v1323_v63 = vsel %vm1320_vm13, %v1322_v62, %v1318_v45 }
 0x5e4   :  { %v1363_v11 = vadd.f32 %v1361_v27, %v4513_v10  ;;  %v1353_v14 = vsel %vm1350_vm14, %v1352_v39, %v1348_v2 }
 0x5e5   :  { %v1364_v13 = vadd.f32 %v1362_v34, %v4517_v29 }
 0x5e6   :  { %3966 = vtanh.f32 %v1363_v11 }
 0x5e7   :  { %3968 = vtanh.f32 %v1364_v13 }
 0x5ec   :  { %v3967_v38 = vpop.eup %3966 }
 0x5ed   :  { %v3969_v35 = vpop.eup %3968  ;;  %v1369_v55 = vrot.slane %v3967_v38, 1 }
 0x5ee   :  { %v1370_v57 = vrot.slane %v3969_v35, 1 }
 0x5ef   :  { %v1373_v60 = vsub.f32 %v4767_v54, %v1369_v55 }
 0x5f0   :  { %v1374_v4 = vsub.f32 %v4769_v23, %v1370_v57 }
 0x5f1   :  { %v1377_v59 = vrot.slane %v1373_v60, 7 }
 0x5f2   :  { %v1378_v49 = vrot.slane %v1374_v4, 7 }
 0x5f3   :  { %v1381_v15 = vmul.f32 %v1377_v59, %v1323_v63 }
 0x5f4   :  { %v1382_v17 = vmul.f32 %v1378_v49, %v1353_v14 }
 0x5f5   :  { %v4811_v40 = vadd.f32 %v3967_v38, %v1381_v15 }
 0x5f6   :  { %v4813_v41 = vadd.f32 %v3969_v35, %v1382_v17 }
 0x5f7   :  { %v1387_v6 = vrot.slane %v4811_v40, 5 }
 0x5f8   :  { %v1388_v42 = vrot.slane %v4813_v41, 4 }
 0x5fa   :  { %v1389_v52 = vsel %vm457_vm12, %v1388_v42, %v1387_v6 }
 0x5fb   :  { %3730 = vmatmul.msk.f32.vlgmr.msra.gmra.mxu2 %vm42_vm0, %v1389_v52  ;;  %3731 = vmatmul.msk.f32.vlgmr.msra.gmra.mxu3 %vm42_vm0, %v1389_v52 }
 0x5fc   :  { %3732 = vmatmul.msk.f32.vlgmr.msra.gmra.mxu0 %vm42_vm0, %v1389_v52 }
 0x679   :  { %v1449_v48 = vpop.f32.mrf.mxu0 }
 0x67a   :  { %v1542_v45 = vadd.f32 %v1449_v48, %v4509_v50 }
 0x67c   :  { %v1544_v17 = vrot.slane %v1542_v45, 2 }
 0x67e   :  { %v1409_v3 = vpop.f32.mrf.mxu2  ;;  %v1429_v32 = vpop.f32.mrf.mxu3 }
 0x67f   :  { %v1454_v12 = vrot.slane %v1409_v3, 2  ;;  %v1456_v43 = vrot.slane %v1409_v3, 3  ;;  %v1455_v47 = vrot.slane %v1429_v32, 2  ;;  %v1457_v25 = vrot.slane %v1429_v32, 3 }
 0x681   :  { %v1462_v33 = vadd.f32 %v1454_v12, %v4489_v9  ;;  %v1464_v22 = vadd.f32 %v1456_v43, %v4495_v18  ;;  %v1463_v53 = vadd.f32 %v1455_v47, %v4497_v19  ;;  %v1465_v27 = vadd.f32 %v1457_v25, %v4501_v36 }
 0x682   :  { %v1545_v47 = vrot.slane %v1542_v45, 3 }
 0x683   :  { %v3733_v24 = vmul.f32 -1.442695, %v1462_v33  ;;  %v3735_v34 = vmul.f32 -1.442695, %v1464_v22  ;;  %v3734_v30 = vmul.f32 -1.442695, %v1463_v53 }
 0x684   :  { %v3736_v11 = vmul.f32 -1.442695, %v1465_v27 }
 0x685   :  { %3970 = vpow2.f32 %v3733_v24 }
 0x686   :  { %3972 = vpow2.f32 %v3735_v34 }
 0x687   :  { %3974 = vpow2.f32 %v3734_v30 }
 0x688   :  { %3976 = vpow2.f32 %v3736_v11 }
 0x68b   :  { %v3971_v13 = vpop.eup %3970 }
 0x68c   :  { %v3973_v58 = vpop.eup %3972  ;;  %v1478_v16 = vadd.f32 1.0, %v3971_v13 }
 0x68d   :  { %v3975_v21 = vpop.eup %3974  ;;  %v1480_v38 = vadd.f32 1.0, %v3973_v58 }
 0x68e   :  { %v3977_v26 = vpop.eup %3976  ;;  %3978 = vrcp.f32 %v1478_v16  ;;  %v4825_v28 = vadd.f32 1.0, %v3975_v21  ;;  %v1493_v62 = vand.u32 2147483648, %v1478_v16  ;;  %v1491_v59 = vand.u32 2147483647, %v1478_v16 }
 0x68f   :  { %3980 = vrcp.f32 %v1480_v38  ;;  %v4827_v35 = vadd.f32 1.0, %v3977_v26  ;;  %v1523_v63 = vand.u32 2147483648, %v1480_v38  ;;  %v1521_v15 = vand.u32 2147483647, %v1480_v38 }
 0x690   :  { %3982 = vrcp.f32 %v4825_v28  ;;  %vm1487_vm3 = vweird.f32 %v1478_v16  ;;  %v1494_v42 = vor.u32 1.1754944e-38, %v1493_v62  ;;  %vm1517_vm5 = vweird.f32 %v1480_v38 }
 0x691   :  { %3984 = vrcp.f32 %v4827_v35  ;;  %vm1492_vm6 = vcmp.eq.f32.partialorder %v1491_v59, 8.507059e+37  ;;  %v1524_v12 = vor.u32 1.1754944e-38, %v1523_v63  ;;  %vm1522_vm8 = vcmp.eq.f32.partialorder %v1521_v15, 8.507059e+37 }
 0x692   :  { %vm1502_vm11 = vweird.f32 %v4825_v28  ;;  %v1506_v48 = vand.u32 2147483647, %v4825_v28  ;;  %vm1532_vm14 = vweird.f32 %v4827_v35 }
 0x694   :  { %v3979_v37 = vpop.eup %3978 }
 0x695   :  { %v3981_v55 = vpop.eup %3980  ;;  %v1483_v56 = vmul.f32 %v3979_v37, %v1478_v16  ;;  %vm1488_vm15 = vweird.f32 %v3979_v37 }
 0x696   :  { %v1513_v57 = vmul.f32 %v3981_v55, %v1480_v38  ;;  %v4832_v4 = vpop.eup %3982  ;;  %vm1518_vm2 = vweird.f32 %v3981_v55  ;;  %vm1489_vm4 = vmor %vm1487_vm3, %vm1488_vm15  ;;  %v1508_v38 = vand.u32 2147483648, %v4825_v28 }
 0x697   :  { %v1484_v60 = vsub.f32 1.0, %v1483_v56  ;;  %v3985_v49 = vpop.eup %3984  ;;  %v1498_v3 = vmul.f32 %v4832_v4, %v4825_v28  ;;  %vm1519_vm7 = vmor %vm1517_vm5, %vm1518_vm2  ;;  %vm1503_vm9 = vweird.f32 %v4832_v4  ;;  %vm1507_vm2 = vcmp.eq.f32.partialorder %v1506_v48, 8.507059e+37 }
 0x698   :  { %v1514_v2 = vsub.f32 1.0, %v1513_v57  ;;  %v1528_v43 = vmul.f32 %v3985_v49, %v4827_v35  ;;  %vm1533_vm10 = vweird.f32 %v3985_v49  ;;  %vm1504_vm13 = vmor %vm1502_vm11, %vm1503_vm9  ;;  %v1536_v57 = vand.u32 2147483647, %v4827_v35 }
 0x699   :  { %v1485_v39 = vmul.f32 %v3979_v37, %v1484_v60  ;;  %v1499_v24 = vsub.f32 1.0, %v1498_v3  ;;  %vm1534_vm15 = vmor %vm1532_vm14, %vm1533_vm10 }
 0x69a   :  { %v1515_v14 = vmul.f32 %v3981_v55, %v1514_v2  ;;  %v1529_v34 = vsub.f32 1.0, %v1528_v43  ;;  %v1509_v2 = vor.u32 1.1754944e-38, %v1508_v38  ;;  %vm1537_vm3 = vcmp.eq.f32.partialorder %v1536_v57, 8.507059e+37 }
 0x69b   :  { %v1486_v6 = vadd.f32 %v3979_v37, %v1485_v39  ;;  %v1500_v13 = vmul.f32 %v4832_v4, %v1499_v24 }
 0x69c   :  { %v1516_v52 = vadd.f32 %v3981_v55, %v1515_v14  ;;  %v1530_v58 = vmul.f32 %v3985_v49, %v1529_v34 }
 0x69d   :  { %v1490_v32 = vsel %vm1489_vm4, %v3979_v37, %v1486_v6  ;;  %v1501_v16 = vadd.f32 %v4832_v4, %v1500_v13 }
 0x69e   :  { %v1495_v25 = vsel %vm1492_vm6, %v1494_v42, %v1490_v32  ;;  %v1520_v33 = vsel %vm1519_vm7, %v3981_v55, %v1516_v52  ;;  %v1531_v26 = vadd.f32 %v3985_v49, %v1530_v58  ;;  %v1538_v55 = vand.u32 2147483648, %v4827_v35 }
 0x69f   :  { %v1525_v22 = vsel %vm1522_vm8, %v1524_v12, %v1520_v33  ;;  %v1548_v53 = vmul.f32 %v1544_v17, %v1495_v25  ;;  %v1505_v60 = vsel %vm1504_vm13, %v4832_v4, %v1501_v16  ;;  %vm1759_vm13 = vcmask 1040384  }
 0x6a0   :  { %v1549_v27 = vmul.f32 %v1545_v47, %v1525_v22  ;;  %v1535_v39 = vsel %vm1534_vm15, %v3985_v49, %v1531_v26  ;;  %v1539_v28 = vor.u32 1.1754944e-38, %v1538_v55  ;;  %v1510_v14 = vsel %vm1507_vm2, %v1509_v2, %v1505_v60 }
 0x6a1   :  { %v1550_v30 = vadd.f32 %v1548_v53, %v4513_v10  ;;  %vm1762_vm15 = vcmask 1041408  }
 0x6a2   :  { %v1551_v11 = vadd.f32 %v1549_v27, %v4517_v29  ;;  %v1540_v17 = vsel %vm1537_vm3, %v1539_v28, %v1535_v39 }
 0x6a3   :  { %3986 = vtanh.f32 %v1550_v30 }
 0x6a4   :  { %3988 = vtanh.f32 %v1551_v11 }
 0x6a9   :  { %v3987_v21 = vpop.eup %3986 }
 0x6aa   :  { %v3989_v37 = vpop.eup %3988  ;;  %v1556_v56 = vrot.slane %v3987_v21, 1 }
 0x6ab   :  { %v1557_v45 = vrot.slane %v3989_v37, 1 }
 0x6ac   :  { %v1560_v62 = vsub.f32 %v4811_v40, %v1556_v56 }
 0x6ad   :  { %v1561_v59 = vsub.f32 %v4813_v41, %v1557_v45 }
 0x6ae   :  { %v1564_v63 = vrot.slane %v1560_v62, 7 }
 0x6af   :  { %v1565_v15 = vrot.slane %v1561_v59, 7 }
 0x6b0   :  { %v1568_v6 = vmul.f32 %v1564_v63, %v1510_v14 }
 0x6b1   :  { %v1569_v42 = vmul.f32 %v1565_v15, %v1540_v17 }
 0x6b2   :  { %v4851_v35 = vadd.f32 %v3987_v21, %v1568_v6 }
 0x6b3   :  { %v4853_v52 = vadd.f32 %v3989_v37, %v1569_v42 }
 0x6b4   :  { %v1574_v4 = vrot.slane %v4851_v35, 6 }
 0x6b5   :  { %v1575_v3 = vrot.slane %v4853_v52, 5 }
 0x6b7   :  { %v1576_v49 = vsel %vm457_vm12, %v1575_v3, %v1574_v4 }
 0x6b8   :  { %3737 = vmatmul.msk.f32.vlgmr.msrb.gmra.mxu1 %vm42_vm0, %v1576_v49  ;;  %3738 = vmatmul.msk.f32.vlgmr.msrb.gmra.mxu2 %vm42_vm0, %v1576_v49 }
 0x6b9   :  { %3739 = vmatmul.msk.f32.vlgmr.msrb.gmra.mxu3 %vm42_vm0, %v1576_v49 }
 0x735   :  { %v1596_v32 = vpop.f32.mrf.mxu1 }
 0x736   :  { %v1641_v12 = vrot.slane %v1596_v32, 1  ;;  %v1643_v43 = vrot.slane %v1596_v32, 2 }
 0x738   :  { %v1649_v47 = vadd.f32 %v1641_v12, %v4489_v9  ;;  %v1651_v25 = vadd.f32 %v1643_v43, %v4495_v18 }
 0x73a   :  { %v3740_v33 = vmul.f32 -1.442695, %v1649_v47  ;;  %v3742_v22 = vmul.f32 -1.442695, %v1651_v25 }
 0x73b   :  { %v1616_v53 = vpop.f32.mrf.mxu2 }
 0x73c   :  { %3990 = vpow2.f32 %v3740_v33  ;;  %v1642_v27 = vrot.slane %v1616_v53, 1  ;;  %v1644_v24 = vrot.slane %v1616_v53, 2 }
 0x73d   :  { %3992 = vpow2.f32 %v3742_v22 }
 0x73e   :  { %v1650_v34 = vadd.f32 %v1642_v27, %v4497_v19  ;;  %v1652_v30 = vadd.f32 %v1644_v24, %v4501_v36  ;;  %v1636_v19 = vpop.f32.mrf.mxu3 }
 0x73f   :  { %v1729_v45 = vadd.f32 %v1636_v19, %v4509_v50 }
 0x740   :  { %v3741_v11 = vmul.f32 -1.442695, %v1650_v34  ;;  %v3743_v13 = vmul.f32 -1.442695, %v1652_v30 }
 0x741   :  { %v1731_v6 = vrot.slane %v1729_v45, 1  ;;  %v1732_v47 = vrot.slane %v1729_v45, 2 }
 0x742   :  { %v3991_v58 = vpop.eup %3990  ;;  %3994 = vpow2.f32 %v3741_v11 }
 0x743   :  { %v3993_v16 = vpop.eup %3992  ;;  %v1665_v21 = vadd.f32 1.0, %v3991_v58  ;;  %3996 = vpow2.f32 %v3743_v13 }
 0x744   :  { %v1667_v9 = vadd.f32 1.0, %v3993_v16 }
 0x745   :  { %3998 = vrcp.f32 %v1665_v21  ;;  %v1680_v60 = vand.u32 2147483648, %v1665_v21  ;;  %v1678_v39 = vand.u32 2147483647, %v1665_v21  ;;  %vm1674_vm6 = vweird.f32 %v1665_v21 }
 0x746   :  { %4000 = vrcp.f32 %v1667_v9  ;;  %v1710_v59 = vand.u32 2147483648, %v1667_v9  ;;  %v1708_v14 = vand.u32 2147483647, %v1667_v9  ;;  %vm1704_vm8 = vweird.f32 %v1667_v9 }
 0x747   :  { %v1681_v50 = vor.u32 1.1754944e-38, %v1680_v60  ;;  %vm1679_vm9 = vcmp.eq.f32.partialorder %v1678_v39, 8.507059e+37 }
 0x748   :  { %v3995_v18 = vpop.eup %3994  ;;  %v1711_v32 = vor.u32 1.1754944e-38, %v1710_v59  ;;  %vm1709_vm11 = vcmp.eq.f32.partialorder %v1708_v14, 8.507059e+37 }
 0x749   :  { %v3997_v38 = vpop.eup %3996  ;;  %v4865_v26 = vadd.f32 1.0, %v3995_v18 }
 0x74a   :  { %v4867_v37 = vadd.f32 1.0, %v3997_v38 }
 0x74b   :  { %v3999_v48 = vpop.eup %3998  ;;  %4002 = vrcp.f32 %v4865_v26  ;;  %v1695_v16 = vand.u32 2147483648, %v4865_v26  ;;  %vm1689_vm3 = vweird.f32 %v4865_v26 }
 0x74c   :  { %v4001_v36 = vpop.eup %4000  ;;  %4004 = vrcp.f32 %v4867_v37  ;;  %v1670_v55 = vmul.f32 %v3999_v48, %v1665_v21  ;;  %vm1675_vm4 = vweird.f32 %v3999_v48  ;;  %v1725_v18 = vand.u32 2147483648, %v4867_v37 }
 0x74d   :  { %v1700_v56 = vmul.f32 %v4001_v36, %v1667_v9  ;;  %vm1705_vm5 = vweird.f32 %v4001_v36  ;;  %vm1676_vm7 = vmor %vm1674_vm6, %vm1675_vm4  ;;  %v1723_v19 = vand.u32 2147483647, %v4867_v37  ;;  %v1696_v45 = vor.u32 1.1754944e-38, %v1695_v16 }
 0x74e   :  { %v1671_v57 = vsub.f32 1.0, %v1670_v55  ;;  %vm1706_vm10 = vmor %vm1704_vm8, %vm1705_vm5  ;;  %vm1719_vm5 = vweird.f32 %v4867_v37  ;;  %v1726_v60 = vor.u32 1.1754944e-38, %v1725_v18 }
 0x74f   :  { %v1701_v62 = vsub.f32 1.0, %v1700_v56 }
 0x750   :  { %v1672_v2 = vmul.f32 %v3999_v48, %v1671_v57 }
 0x751   :  { %v4872_v28 = vpop.eup %4002  ;;  %v1702_v63 = vmul.f32 %v4001_v36, %v1701_v62 }
 0x752   :  { %v4874_v15 = vpop.eup %4004  ;;  %v1673_v17 = vadd.f32 %v3999_v48, %v1672_v2  ;;  %v1685_v42 = vmul.f32 %v4872_v28, %v4865_v26  ;;  %vm1690_vm14 = vweird.f32 %v4872_v28 }
 0x753   :  { %v1703_v4 = vadd.f32 %v4001_v36, %v1702_v63  ;;  %v1715_v3 = vmul.f32 %v4874_v15, %v4867_v37  ;;  %vm1720_vm2 = vweird.f32 %v4874_v15  ;;  %vm4892_vm4 = vmor %vm1689_vm3, %vm1690_vm14  ;;  %vm1774_vm14 = vcmask 1045504  }
 0x754   :  { %v1677_v49 = vsel %vm1676_vm7, %v3999_v48, %v1673_v17  ;;  %v1686_v53 = vsub.f32 1.0, %v1685_v42  ;;  %v1760_v48 = vsel %vm1759_vm13, %v4525_v44, %v4575_v5  ;;  %vm4907_vm6 = vmor %vm1719_vm5, %vm1720_vm2  ;;  %vm1765_vm7 = vcmask 1042432  }
 0x755   :  { %v1682_v12 = vsel %vm1679_vm9, %v1681_v50, %v1677_v49  ;;  %v1707_v43 = vsel %vm1706_vm10, %v4001_v36, %v1703_v4  ;;  %v1716_v27 = vsub.f32 1.0, %v1715_v3  ;;  %v1763_v56 = vsel %vm1762_vm15, %v1760_v48, %v4627_v51 }
 0x756   :  { %v1712_v25 = vsel %vm1709_vm11, %v1711_v32, %v1707_v43  ;;  %v1735_v33 = vmul.f32 %v1731_v6, %v1682_v12  ;;  %v1687_v30 = vmul.f32 %v4872_v28, %v1686_v53  ;;  %vm1768_vm9 = vcmask 1043456  }
 0x757   :  { %v1736_v22 = vmul.f32 %v1732_v47, %v1712_v25  ;;  %v1717_v11 = vmul.f32 %v4874_v15, %v1716_v27  ;;  %vm1771_vm10 = vcmask 1044480   ;;  %vm1724_vm11 = vcmp.eq.f32.partialorder %v1723_v19, 8.507059e+37 }
 0x758   :  { %v1737_v24 = vadd.f32 %v1735_v33, %v4513_v10  ;;  %v1688_v13 = vadd.f32 %v4872_v28, %v1687_v30  ;;  %v1766_v39 = vsel %vm1765_vm7, %v1763_v56, %v4679_v46  ;;  %vm5712_vm2 = vcmask 1046528  }
 0x759   :  { %v1738_v34 = vadd.f32 %v1736_v22, %v4517_v29  ;;  %v1718_v21 = vadd.f32 %v4874_v15, %v1717_v11  ;;  %v1693_v29 = vand.u32 2147483647, %v4865_v26  ;;  %vm1785_vm3 = vcmask 261127  }
 0x75a   :  { %4006 = vtanh.f32 %v1737_v24  ;;  %v1692_v26 = vsel %vm4892_vm4, %v4872_v28, %v1688_v13  ;;  %v1769_v28 = vsel %vm1768_vm9, %v1766_v39, %v4767_v54  ;;  %v1761_v46 = vsel %vm1759_vm13, %v4523_v7, %v4577_v1 }
 0x75b   :  { %4008 = vtanh.f32 %v1738_v34  ;;  %v1722_v44 = vsel %vm4907_vm6, %v4874_v15, %v1718_v21  ;;  %vm1694_vm8 = vcmp.eq.f32.partialorder %v1693_v29, 8.507059e+37  ;;  %v1772_v15 = vsel %vm1771_vm10, %v1769_v28, %v4811_v40 }
 0x75c   :  { %v1697_v62 = vsel %vm1694_vm8, %v1696_v45, %v1692_v26  ;;  %v1727_v59 = vsel %vm1724_vm11, %v1726_v60, %v1722_v44  ;;  %v1775_v17 = vsel %vm1774_vm14, %v1772_v15, %v4851_v35  ;;  %vm1787_vm4 = vcmask 253952  }
 0x75d   :  { %v1764_v50 = vsel %vm1762_vm15, %v1761_v46, %v4629_v20 }
 0x75e   :  { %v1767_v40 = vsel %vm1765_vm7, %v1764_v50, %v4681_v61 }
 0x760   :  { %v4007_v58 = vpop.eup %4006 }
 0x761   :  { %v4009_v10 = vpop.eup %4008  ;;  %v1743_v9 = vrot.slane %v4007_v58, 1 }
 0x762   :  { %v1744_v36 = vrot.slane %v4009_v10, 1 }
 0x763   :  { %v1747_v55 = vsub.f32 %v4851_v35, %v1743_v9  ;;  %v1770_v35 = vsel %vm1768_vm9, %v1767_v40, %v4769_v23 }
 0x764   :  { %v1748_v5 = vsub.f32 %v4853_v52, %v1744_v36  ;;  %v1773_v7 = vsel %vm1771_vm10, %v1770_v35, %v4813_v41  ;;  %v4196_v36 = vld [vmem:[%s5707_s0] sm:$0xff] }
 0x765   :  { %v1751_v37 = vrot.slane %v1747_v55, 7  ;;  %v1776_v1 = vsel %vm1774_vm14, %v1773_v7, %v4853_v52 }
 0x766   :  { %v1752_v51 = vrot.slane %v1748_v5, 7  ;;  %v4949_v5 = vld [vmem:[%s5709_s2 + $0xa8] sm:$0xff] }
 0x767   :  { %v1755_v2 = vmul.f32 %v1751_v37, %v1697_v62  ;;  %v4197_v62 = vld [vmem:[%s5707_s0 + $0x8] sm:$0xff] }
 0x768   :  { %v1756_v63 = vmul.f32 %v1752_v51, %v1727_v59 }
 0x769   :  { %v1757_v14 = vadd.f32 %v4007_v58, %v1755_v2 }
 0x76a   :  { %v1758_v6 = vadd.f32 %v4009_v10, %v1756_v63 }
 0x76b   :  { %v1778_v42 = vsel %vm5712_vm2, %v1775_v17, %v1757_v14  ;;  %1786 = vst.msk [vmem:[#allocation4 - $0x7] sm:$0x80] %vm1785_vm3, %v1757_v14 }
 0x76c   :  { %v1789_v54 = vsel %vm42_vm0, %v1778_v42, -inf  ;;  %v1782_v4 = vrot.slane %v1758_v6, 7  ;;  %v1779_v3 = vsel %vm5712_vm2, %v1776_v1, %v1758_v6 }
 0x76d   :  { %1790 = vmax.xlane.f32.xlu2 %v1789_v54  ;;  %v1792_v49 = vsel %vm42_vm0, %v1779_v3, -inf }
 0x76e   :  { %1788 = vst.msk [vmem:[#allocation4 + $0x1] sm:$0x1] %vm1787_vm4, %v1782_v4 }
 0x775   :  { %1793 = vmax.xlane.f32.xlu2 %v1792_v49 }
 0x7e0   :  { %v1791_v20 = vpop.xlane.xlu2 %1790 }
 0x7e1   :  { %v1795_v32 = vsub.f32 %v1778_v42, %v1791_v20  ;;  %v4263_v42 = vmov 32.0  }
 0x7e3   :  { %v1797_v12 = vmul.f32 1.442695, %v1795_v32 }
 0x7e5   :  { %4010 = vpow2.f32 %v1797_v12 }
 0x7e8   :  { %v1794_v61 = vpop.xlane.xlu2 %1793 }
 0x7e9   :  { %v1796_v43 = vsub.f32 %v1779_v3, %v1794_v61 }
 0x7eb   :  { %v4011_v47 = vpop.eup %4010  ;;  %v1799_v23 = vmul.f32 1.442695, %v1796_v43 }
 0x7ec   :  { %v1801_v25 = vsel %vm42_vm0, %v4011_v47, 0.0 }
 0x7ed   :  { %4012 = vpow2.f32 %v1799_v23  ;;  %1802 = vadd.xlane.f32.xlu0 %v1801_v25  ;;  %v22_v23 = vld [vmem:[%s5709_s2 + $0x10] sm:$0xff]  ;;  %v21_v25 = vld [vmem:[%s5709_s2 + $0x8] sm:$0xff] }
 0x7f3   :  { %v4013_v41 = vpop.eup %4012 }
 0x7f4   :  { %v1804_v52 = vsel %vm42_vm0, %v4013_v41, 0.0 }
 0x7f5   :  { %1805 = vadd.xlane.f32.xlu1 %v1804_v52 }
 0x860   :  { %v1803_v33 = vpop.xlane.xlu0 %1802 }
 0x861   :  { %4014 = vrcp.f32 %v1803_v33  ;;  %v1818_v34 = vand.u32 2147483648, %v1803_v33  ;;  %v1816_v11 = vand.u32 2147483647, %v1803_v33  ;;  %vm1812_vm6 = vweird.f32 %v1803_v33 }
 0x863   :  { %v1819_v16 = vor.u32 1.1754944e-38, %v1818_v34  ;;  %vm1817_vm11 = vcmp.eq.f32.partialorder %v1816_v11, 8.507059e+37  ;;  %v36_v11 = vld [vmem:[%s5709_s2 + $0x80] sm:$0xff] }
 0x867   :  { %v4015_v22 = vpop.eup %4014 }
 0x868   :  { %v1808_v53 = vmul.f32 %v4015_v22, %v1803_v33  ;;  %v1806_v27 = vpop.xlane.xlu1 %1805  ;;  %vm1813_vm5 = vweird.f32 %v4015_v22 }
 0x869   :  { %4016 = vrcp.f32 %v1806_v27  ;;  %vm1814_vm8 = vmor %vm1812_vm6, %vm1813_vm5  ;;  %v1833_v38 = vand.u32 2147483648, %v1806_v27  ;;  %v1831_v19 = vand.u32 2147483647, %v1806_v27  ;;  %vm1827_vm4 = vweird.f32 %v1806_v27 }
 0x86a   :  { %v1809_v24 = vsub.f32 1.0, %v1808_v53  ;;  %4018 = vrcp.f32 %v4263_v42  ;;  %v39_v53 = vld [vmem:[%s5709_s2 + $0x98] sm:$0xff] }
 0x86b   :  { %v1834_v57 = vor.u32 1.1754944e-38, %v1833_v38  ;;  %vm1832_vm6 = vcmp.eq.f32.partialorder %v1831_v19, 8.507059e+37  ;;  %1980 = vmatpush.msra.mxu3 %v39_v53  ;;  %v32_v38 = vld [vmem:[%s5709_s2 + $0x60] sm:$0xff] }
 0x86c   :  { %v1810_v30 = vmul.f32 %v4015_v22, %v1809_v24  ;;  %v37_v24 = vld [vmem:[%s5709_s2 + $0x88] sm:$0xff] }
 0x86e   :  { %v1811_v13 = vadd.f32 %v4015_v22, %v1810_v30 }
 0x86f   :  { %v4017_v58 = vpop.eup %4016 }
 0x870   :  { %v1815_v21 = vsel %vm1814_vm8, %v4015_v22, %v1811_v13  ;;  %v1823_v10 = vmul.f32 %v4017_v58, %v1806_v27  ;;  %vm1828_vm3 = vweird.f32 %v4017_v58  ;;  %v4019_v54 = vpop.eup %4018  ;;  %v38_v27 = vld [vmem:[%s5709_s2 + $0x90] sm:$0xff] }
 0x871   :  { %v1820_v29 = vsel %vm1817_vm11, %v1819_v16, %v1815_v21  ;;  %vm1829_vm5 = vmor %vm1827_vm4, %vm1828_vm3  ;;  %v1897_v50 = vmul.f32 32.0, %v4019_v54  ;;  %vm1901_vm8 = vweird.f32 %v4019_v54  ;;  %1981 = vmatpush.msra.mxu3 %v38_v27  ;;  %v35_v16 = vld [vmem:[%s5709_s2 + $0x78] sm:$0xff]  ;;  %v3760_v27 = vld [vmem:[%s5708_s1 + $0x128] sm:$0xff] }
 0x872   :  { %v1821_v9 = vmul.f32 %v4011_v47, %v1820_v29  ;;  %v1824_v18 = vsub.f32 1.0, %v1823_v10  ;;  %v23_v47 = vld [vmem:[%s5709_s2 + $0x18] sm:$0xff]  ;;  %v34_v10 = vld [vmem:[%s5709_s2 + $0x70] sm:$0xff] }
 0x873   :  { %v1898_v4 = vsub.f32 1.0, %v1897_v50  ;;  %1966 = vmatpush.msra.mxu2 %v23_v47  ;;  %1982 = vmatpush.msra.mxu3 %v37_v24  ;;  %v3757_v24 = vld [vmem:[%s5708_s1 + $0x110] sm:$0xff] }
 0x874   :  { %v1825_v48 = vmul.f32 %v4017_v58, %v1824_v18  ;;  %v1837_v26 = vmul.f32 %v4196_v36, %v1821_v9  ;;  %v33_v9 = vld [vmem:[%s5709_s2 + $0x68] sm:$0xff] }
 0x875   :  { %1967 = vmatpush.msra.mxu2 %v22_v23  ;;  %1983 = vmatpush.msra.mxu3 %v36_v11  ;;  %v3751_v11 = vld [vmem:[%s5708_s1 + $0xe0] sm:$0xff] }
 0x876   :  { %v1826_v55 = vadd.f32 %v4017_v58, %v1825_v48  ;;  %v1839_v56 = vadd.f32 %v1837_v26, %v4482_v0  ;;  %v5020_v48 = vld [vmem:[%s5709_s2 + $0xa0] sm:$0xff]  ;;  %v31_v26 = vld [vmem:[%s5709_s2 + $0x58] sm:$0xff] }
 0x877   :  { %1968 = vmatpush.msra.mxu2 %v21_v25  ;;  %1984 = vmatpush.msra.mxu3 %v35_v16  ;;  %v1979_v47 = vperm.slane %v5020_v48, 1  ;;  %v5111_v16 = vld [vmem:[%s5708_s1 + $0x188] sm:$0xff] }
 0x878   :  { %v1830_v45 = vsel %vm1829_vm5, %v4017_v58, %v1826_v55  ;;  %v1841_v44 = vadd.f32 %v4196_v36, %v1839_v56 }
 0x879   :  { %v1835_v37 = vsel %vm1832_vm6, %v1834_v57, %v1830_v45  ;;  %1985 = vmatpush.msra.mxu3 %v34_v10  ;;  %v1941_v57 = vperm.slane %v5020_v48, 2  ;;  %v30_v45 = vld [vmem:[%s5709_s2 + $0x50] sm:$0xff] }
 0x87a   :  { %v1836_v60 = vmul.f32 %v4013_v41, %v1835_v37  ;;  %1861 = vmatpush.msrb.mxu0 %v1841_v44  ;;  %v20_v41 = vld [vmem:[%s5709_s2] sm:$0xff]  ;;  %v5121_v10 = vld [vmem:[%s5708_s1 + $0x170] sm:$0xff] }
 0x87b   :  { %3744 = vmatmul.msk.f32.vlgmr.msrb.gmra.mxu0 %vm91_vm1, %v4949_v5  ;;  %1969 = vmatpush.msra.mxu2 %v20_v41 }
 0x87c   :  { %v1838_v51 = vmul.f32 %v4197_v62, %v1836_v60  ;;  %1986 = vmatpush.msra.mxu3 %v33_v9  ;;  %v5133_v9 = vld [vmem:[%s5708_s1 + $0x158] sm:$0xff] }
 0x87e   :  { %v1840_v2 = vadd.f32 %v1838_v51, %v4487_v8  ;;  %1987 = vmatpush.msra.mxu3 %v32_v38  ;;  %v29_v51 = vld [vmem:[%s5709_s2 + $0x48] sm:$0xff]  ;;  %v5146_v38 = vld [vmem:[%s5708_s1 + $0x140] sm:$0xff] }
 0x880   :  { %v1842_v39 = vadd.f32 %v4197_v62, %v1840_v2  ;;  %1988 = vmatpush.msra.mxu3 %v31_v26  ;;  %v1944_v62 = vperm.slane %v5020_v48, 3  ;;  %v5175_v26 = vld [vmem:[%s5708_s1 + $0x148] sm:$0xff] }
 0x882   :  { %1881 = vmatpush.msra.mxu1 %v1842_v39  ;;  %1989 = vmatpush.msra.mxu3 %v30_v45  ;;  %v3774_v45 = vld [vmem:[%s5708_s1 + $0x198] sm:$0x3] }
 0x883   :  { %3745 = vmatmul.msk.f32.vlgmr.msra.gmra.mxu1 %vm91_vm1, %v4949_v5 }
 0x884   :  { %1990 = vmatpush.msra.mxu3 %v29_v51 }
 0x8f8   :  { %v4959_v59 = vpop.f32.mrf.mxu0 }
 0x8f9   :  { %v4962_v28 = vsub.f32 %v1841_v44, %v4959_v59 }
 0x8fb   :  { %v1888_v63 = vadd.f32 %v4962_v28, %v4482_v0  ;;  %v1899_v0 = vmul.f32 %v4019_v54, %v1898_v4 }
 0x8fd   :  { %v1890_v14 = vsel %vm42_vm0, %v1888_v63, 0.0  ;;  %v1900_v40 = vadd.f32 %v4019_v54, %v1899_v0 }
 0x8fe   :  { %1891 = vadd.xlane.f32.xlu2 %v1890_v14 }
 0x8ff   :  { %v1902_v35 = vsel %vm1901_vm8, %v4019_v54, %v1900_v40  ;;  %v26_v40 = vld [vmem:[%s5709_s2 + $0x30] sm:$0xff] }
 0x900   :  { %v4967_v15 = vpop.f32.mrf.mxu1 }
 0x901   :  { %v4970_v17 = vsub.f32 %v1842_v39, %v4967_v15 }
 0x903   :  { %v1889_v6 = vadd.f32 %v4970_v17, %v4487_v8 }
 0x905   :  { %v1893_v46 = vsel %vm42_vm0, %v1889_v6, 0.0 }
 0x906   :  { %1894 = vadd.xlane.f32.xlu0 %v1893_v46  ;;  %v27_v46 = vld [vmem:[%s5709_s2 + $0x38] sm:$0xff] }
 0x971   :  { %v1892_v7 = vpop.xlane.xlu2 %1891 }
 0x972   :  { %v1903_v1 = vmul.f32 %v1902_v35, %v1892_v7  ;;  %v24_v7 = vld [vmem:[%s5709_s2 + $0x20] sm:$0xff] }
 0x974   :  { %v1905_v3 = vsub.f32 %v1888_v63, %v1903_v1  ;;  %v28_v63 = vld [vmem:[%s5709_s2 + $0x40] sm:$0xff]  ;;  %v1947_v1 = vperm.slane %v5020_v48, 0  ;;  %v5156_v48 = vld [vmem:[%s5708_s1 + $0x190] sm:$0xff] }
 0x975   :  { %1991 = vmatpush.msra.mxu3 %v28_v63 }
 0x976   :  { %v1907_v49 = vmul.f32 %v1905_v3, %v1905_v3 }
 0x977   :  { %1992 = vmatpush.msra.mxu3 %v27_v46 }
 0x978   :  { %v1909_v20 = vsel %vm42_vm0, %v1907_v49, 0.0 }
 0x979   :  { %v1895_v32 = vpop.xlane.xlu0 %1894  ;;  %1910 = vadd.xlane.f32.xlu1 %v1909_v20  ;;  %1993 = vmatpush.msra.mxu3 %v26_v40 }
 0x97a   :  { %v1904_v8 = vmul.f32 %v1902_v35, %v1895_v32 }
 0x97c   :  { %v4976_v12 = vsub.f32 %v1889_v6, %v1904_v8 }
 0x97e   :  { %v1908_v61 = vmul.f32 %v4976_v12, %v4976_v12 }
 0x980   :  { %v1912_v43 = vsel %vm42_vm0, %v1908_v61, 0.0  ;;  %v3761_v61 = vld [vmem:[%s5708_s1 + $0x130] sm:$0xff] }
 0x981   :  { %1913 = vadd.xlane.f32.xlu2 %v1912_v43  ;;  %2144 = vmatpush.msrb.mxu2 %v3761_v61  ;;  %v3758_v43 = vld [vmem:[%s5708_s1 + $0x118] sm:$0xff] }
 0x983   :  { %2145 = vmatpush.msrb.mxu2 %v3758_v43 }
 0x9ec   :  { %v1911_v52 = vpop.xlane.xlu1 %1910 }
 0x9ed   :  { %v1915_v33 = vmul.f32 %v1911_v52, %v1902_v35  ;;  %v3759_v52 = vld [vmem:[%s5708_s1 + $0x120] sm:$0xff] }
 0x9ef   :  { %v1917_v22 = vadd.f32 1e-05, %v1915_v33  ;;  %v3756_v33 = vld [vmem:[%s5708_s1 + $0x108] sm:$0xff] }
 0x9f1   :  { %4020 = vrsqrt.f32 %v1917_v22  ;;  %vm1925_vm3 = vweird.f32 %v1917_v22 }
 0x9f4   :  { %v1914_v34 = vpop.xlane.xlu2 %1913 }
 0x9f5   :  { %v1916_v30 = vmul.f32 %v1914_v34, %v1902_v35  ;;  %v25_v35 = vld [vmem:[%s5709_s2 + $0x28] sm:$0xff]  ;;  %v3754_v34 = vld [vmem:[%s5708_s1 + $0xf8] sm:$0xff] }
 0x9f6   :  { %1994 = vmatpush.msra.mxu3 %v25_v35 }
 0x9f7   :  { %v4021_v13 = vpop.eup %4020  ;;  %v1918_v58 = vadd.f32 1e-05, %v1916_v30  ;;  %v3755_v30 = vld [vmem:[%s5708_s1 + $0x100] sm:$0xff] }
 0x9f8   :  { %v1920_v21 = vmul.f32 %v4021_v13, %v1917_v22  ;;  %vm1926_vm11 = vweird.f32 %v4021_v13  ;;  %1995 = vmatpush.msra.mxu3 %v24_v7  ;;  %2146 = vmatpush.msrb.mxu2 %v3755_v30 }
 0x9f9   :  { %4022 = vrsqrt.f32 %v1918_v58  ;;  %vm1927_vm4 = vmor %vm1925_vm3, %vm1926_vm11  ;;  %vm1935_vm6 = vweird.f32 %v1918_v58 }
 0x9fa   :  { %v1921_v29 = vmul.f32 %v4021_v13, %v1920_v21  ;;  %v5116_v21 = vld [vmem:[%s5708_s1 + $0x168] sm:$0xff] }
 0x9fc   :  { %v1922_v18 = vmul.f32 0.5, %v1921_v29  ;;  %v5128_v29 = vld [vmem:[%s5708_s1 + $0x150] sm:$0xff] }
 0x9fe   :  { %v1923_v19 = vsub.f32 1.5, %v1922_v18  ;;  %v5138_v18 = vld [vmem:[%s5708_s1 + $0x138] sm:$0xff] }
 0x9ff   :  { %v4023_v36 = vpop.eup %4022 }
 0xa00   :  { %v1924_v55 = vmul.f32 %v4021_v13, %v1923_v19  ;;  %v1930_v56 = vmul.f32 %v4023_v36, %v1918_v58  ;;  %vm1936_vm5 = vweird.f32 %v4023_v36  ;;  %v5104_v58 = vld [vmem:[%s5708_s1 + $0x180] sm:$0xff]  ;;  %v5161_v19 = vld [vmem:[%s5708_s1 + $0x178] sm:$0xff] }
 0xa01   :  { %vm1937_vm8 = vmor %vm1935_vm6, %vm1936_vm5  ;;  %2522 = vmatpush.msrb.mxu3 %v5104_v58 }
 0xa02   :  { %v1928_v44 = vsel %vm1927_vm4, %v4021_v13, %v1924_v55  ;;  %v1931_v37 = vmul.f32 %v4023_v36, %v1930_v56  ;;  %v3752_v13 = vld [vmem:[%s5708_s1 + $0xe8] sm:$0xff] }
 0xa03   :  { %v1939_v60 = vmul.f32 %v1928_v44, %v1905_v3  ;;  %2147 = vmatpush.msrb.mxu2 %v3752_v13  ;;  %2523 = vmatpush.msrb.mxu3 %v5116_v21  ;;  %v3775_v44 = vld [vmem:[%s5708_s1 + $0x1a0] sm:$0x3] }
 0xa04   :  { %v1932_v2 = vmul.f32 0.5, %v1931_v37  ;;  %v2078_v51 = vperm.slane %v3775_v44, 0 }
 0xa05   :  { %v1942_v39 = vmul.f32 %v1941_v57, %v1939_v60  ;;  %2524 = vmatpush.msrb.mxu3 %v5128_v29 }
 0xa06   :  { %v1933_v14 = vsub.f32 1.5, %v1932_v2 }
 0xa07   :  { %v1945_v6 = vadd.f32 %v1944_v62, %v1942_v39  ;;  %2525 = vmatpush.msrb.mxu3 %v5138_v18 }
 0xa08   :  { %v1934_v42 = vmul.f32 %v4023_v36, %v1933_v14 }
 0xa09   :  { %3746 = vmatmul.msk.f32.vlgmr.msra.gmra.mxu2 %vm42_vm0, %v1945_v6 }
 0xa0a   :  { %v1938_v54 = vsel %vm1937_vm8, %v4023_v36, %v1934_v42  ;;  %2208 = vmatpush.msra.mxu2 %v5156_v48  ;;  %v5168_v36 = vld [vmem:[%s5708_s1 + $0x160] sm:$0xff] }
 0xa0b   :  { %v1940_v50 = vmul.f32 %v1938_v54, %v4976_v12 }
 0xa0c   :  { %2209 = vmatpush.msra.mxu2 %v5161_v19 }
 0xa0d   :  { %v1943_v4 = vmul.f32 %v1941_v57, %v1940_v50 }
 0xa0e   :  { %2210 = vmatpush.msra.mxu2 %v5168_v36 }
 0xa0f   :  { %v1946_v0 = vadd.f32 %v1944_v62, %v1943_v4  ;;  %v2077_v62 = vperm.slane %v3774_v45, 0 }
 0xa10   :  { %2211 = vmatpush.msra.mxu2 %v5175_v26 }
 0xa11   :  { %3747 = vmatmul.msk.f32.gmra.mxu2 %vm42_vm0, %v1946_v0 }
 0xa8c   :  { %v1971_v3 = vpop.f32.mrf.mxu2 }
 0xa8d   :  { %v1972_v49 = vadd.f32 %v1971_v3, %v1947_v1 }
 0xa8f   :  { %v1977_v20 = vmax.f32 %v1972_v49, 0.0 }
 0xa91   :  { %1996 = vmatmul.f32.vlgmr.msra.gmra.mxu3 %v1977_v20 }
 0xa92   :  { %2729 = vmatpush.msra.mxu3 %v5111_v16 }
 0xa94   :  { %v1974_v32 = vpop.f32.mrf.mxu2  ;;  %2730 = vmatpush.msra.mxu3 %v5121_v10 }
 0xa95   :  { %v1975_v8 = vadd.f32 %v1974_v32, %v1947_v1 }
 0xa96   :  { %2731 = vmatpush.msra.mxu3 %v5133_v9 }
 0xa97   :  { %v1978_v12 = vmax.f32 %v1975_v8, 0.0 }
 0xa98   :  { %2732 = vmatpush.msra.mxu3 %v5146_v38 }
 0xa99   :  { %1999 = vmatmul.f32.gmra.mxu3 %v1978_v12 }
 0xb14   :  { %v1997_v23 = vpop.f32.mrf.mxu3 }
 0xb15   :  { %v1998_v25 = vadd.f32 %v1997_v23, %v1979_v47 }
 0xb17   :  { %v5060_v41 = vadd.f32 %v1998_v25, %v4962_v28 }
 0xb19   :  { %2020 = vmatpush.msra.mxu0 %v5060_v41 }
 0xb1a   :  { %3748 = vmatmul.msk.f32.vlgmr.msra.gmra.mxu0 %vm91_vm1, %v4949_v5 }
 0xb1b   :  { %2098 = vmatpush.msrb.mxu0 %v3759_v52  ;;  %v3776_v52 = vld [vmem:[%s5708_s1 + $0x1a8] sm:$0x3] }
 0xb1c   :  { %v2000_v22 = vpop.f32.mrf.mxu3 }
 0xb1d   :  { %v2001_v53 = vadd.f32 %v2000_v22, %v1979_v47  ;;  %2099 = vmatpush.msrb.mxu0 %v3756_v33  ;;  %v5249_v22 = vperm.slane %v3776_v52, 1 }
 0xb1f   :  { %v5072_v28 = vadd.f32 %v2001_v53, %v4970_v17  ;;  %v3753_v17 = vld [vmem:[%s5708_s1 + $0xf0] sm:$0xff] }
 0xb20   :  { %2100 = vmatpush.msrb.mxu0 %v3753_v17 }
 0xb21   :  { %2040 = vmatpush.msrb.mxu1 %v5072_v28 }
 0xb22   :  { %3749 = vmatmul.msk.f32.vlgmr.msrb.gmra.mxu1 %vm91_vm1, %v4949_v5  ;;  %v3750_v5 = vld [vmem:[%s5708_s1 + $0xd8] sm:$0xff] }
 0xb23   :  { %2121 = vmatpush.msra.mxu1 %v3760_v27  ;;  %2101 = vmatpush.msrb.mxu0 %v3750_v5 }
 0xb25   :  { %2122 = vmatpush.msra.mxu1 %v3757_v24  ;;  %2168 = vmatpush.msra.mxu0 %v5104_v58 }
 0xb27   :  { %2123 = vmatpush.msra.mxu1 %v3754_v34  ;;  %2169 = vmatpush.msra.mxu0 %v5116_v21 }
 0xb29   :  { %2124 = vmatpush.msra.mxu1 %v3751_v11  ;;  %2170 = vmatpush.msra.mxu0 %v5128_v29  ;;  %v2079_v11 = vperm.slane %v3776_v52, 0 }
 0xb2b   :  { %2188 = vmatpush.msrb.mxu1 %v5111_v16  ;;  %2171 = vmatpush.msra.mxu0 %v5138_v18 }
 0xb2d   :  { %2189 = vmatpush.msrb.mxu1 %v5121_v10 }
 0xb2f   :  { %2190 = vmatpush.msrb.mxu1 %v5133_v9 }
 0xb31   :  { %2191 = vmatpush.msrb.mxu1 %v5146_v38 }
 0xb97   :  { %v5181_v55 = vpop.f32.mrf.mxu0 }
 0xb98   :  { %v2047_v56 = vadd.f32 %v5181_v55, %v4959_v59 }
 0xb9a   :  { %3777 = vmatmul.msk.f32.vlgmr.msrb.gmra.mxu0 %vm42_vm0, %v2047_v56  ;;  %3779 = vmatmul.msk.f32.vlgmr.msra.gmra.mxu1 %vm42_vm0, %v2047_v56 }
 0xb9b   :  { %3781 = vmatmul.msk.f32.vlgmr.msrb.gmra.mxu2 %vm42_vm0, %v2047_v56  ;;  %2339 = vmatpush.msrb.mxu0 %v5104_v58 }
 0xb9c   :  { %2359 = vmatpush.msra.mxu1 %v5111_v16  ;;  %2379 = vmatpush.msrb.mxu2 %v5156_v48 }
 0xb9d   :  { %2340 = vmatpush.msrb.mxu0 %v5116_v21 }
 0xb9e   :  { %2360 = vmatpush.msra.mxu1 %v5121_v10  ;;  %2380 = vmatpush.msrb.mxu2 %v5161_v19 }
 0xb9f   :  { %v5194_v57 = vpop.f32.mrf.mxu1  ;;  %2341 = vmatpush.msrb.mxu0 %v5128_v29 }
 0xba0   :  { %v2048_v59 = vadd.f32 %v5194_v57, %v4967_v15  ;;  %2361 = vmatpush.msra.mxu1 %v5133_v9  ;;  %2381 = vmatpush.msrb.mxu2 %v5168_v36 }
 0xba1   :  { %2342 = vmatpush.msrb.mxu0 %v5138_v18 }
 0xba2   :  { %3778 = vmatmul.msk.f32.gmra.mxu0 %vm42_vm0, %v2048_v59  ;;  %3780 = vmatmul.msk.f32.gmra.mxu1 %vm42_vm0, %v2048_v59 }
 0xba3   :  { %3782 = vmatmul.msk.f32.gmra.mxu2 %vm42_vm0, %v2048_v59  ;;  %2362 = vmatpush.msra.mxu1 %v5146_v38 }
 0xba4   :  { %2382 = vmatpush.msrb.mxu2 %v5175_v26 }
 0xbaa   :  { %2172 = vmatmul.f32.vlgmr.msra.gmra.mxu0 %v4262_v31  ;;  %2192 = vmatmul.f32.vlgmr.msrb.gmra.mxu1 %v4262_v31 }
 0xbab   :  { %2212 = vmatmul.f32.vlgmr.msra.gmra.mxu2 %v4262_v31  ;;  %2542 = vmatpush.msra.mxu0 %v5111_v16 }
 0xbac   :  { %2562 = vmatpush.msrb.mxu1 %v5156_v48  ;;  %2709 = vmatpush.msra.mxu2 %v5104_v58 }
 0xbad   :  { %2543 = vmatpush.msra.mxu0 %v5121_v10 }
 0xbae   :  { %2563 = vmatpush.msrb.mxu1 %v5161_v19  ;;  %2710 = vmatpush.msra.mxu2 %v5116_v21 }
 0xbaf   :  { %2544 = vmatpush.msra.mxu0 %v5133_v9 }
 0xbb0   :  { %2564 = vmatpush.msrb.mxu1 %v5168_v36  ;;  %2711 = vmatpush.msra.mxu2 %v5128_v29 }
 0xbb1   :  { %2545 = vmatpush.msra.mxu0 %v5146_v38 }
 0xbb2   :  { %2565 = vmatpush.msrb.mxu1 %v5175_v26  ;;  %2712 = vmatpush.msra.mxu2 %v5138_v18 }
 0xc17   :  { %v2103_v31 = vpop.f32.mrf.mxu0  ;;  %v2126_v15 = vpop.f32.mrf.mxu1 }
 0xc18   :  { %v5228_v2 = vadd.f32 %v2103_v31, %v2077_v62  ;;  %v5230_v39 = vadd.f32 %v2126_v15, %v2078_v51 }
 0xc1e   :  { %v2149_v0 = vpop.f32.mrf.mxu2 }
 0xc1f   :  { %v2106_v37 = vpop.f32.mrf.mxu0  ;;  %v2129_v60 = vpop.f32.mrf.mxu1 }
 0xc20   :  { %v5232_v63 = vadd.f32 %v2106_v37, %v2077_v62  ;;  %v5234_v14 = vadd.f32 %v2129_v60, %v2078_v51 }
 0xc26   :  { %v2152_v61 = vpop.f32.mrf.mxu2 }
 0xc27   :  { %v2173_v6 = vpop.f32.mrf.mxu0  ;;  %v2193_v46 = vpop.f32.mrf.mxu1 }
 0xc28   :  { %v2218_v42 = vrot.slane %v2173_v6, 1  ;;  %v2224_v54 = vadd.f32 %v2173_v6, %v5228_v2  ;;  %v2219_v50 = vrot.slane %v2193_v46, 1  ;;  %v2225_v4 = vadd.f32 %v2193_v46, %v5230_v39 }
 0xc2a   :  { %v2226_v40 = vadd.f32 %v2218_v42, %v5232_v63  ;;  %v3783_v35 = vmul.f32 -1.442695, %v2224_v54  ;;  %v2227_v7 = vadd.f32 %v2219_v50, %v5234_v14  ;;  %v3784_v1 = vmul.f32 -1.442695, %v2225_v4 }
 0xc2c   :  { %4024 = vpow2.f32 %v3783_v35  ;;  %v3785_v3 = vmul.f32 -1.442695, %v2226_v40  ;;  %v3786_v49 = vmul.f32 -1.442695, %v2227_v7  ;;  %v5260_v7 = vadd.f32 %v2149_v0, %v2079_v11 }
 0xc2d   :  { %4026 = vpow2.f32 %v3784_v1 }
 0xc2e   :  { %4028 = vpow2.f32 %v3785_v3  ;;  %v2213_v27 = vpop.f32.mrf.mxu2 }
 0xc2f   :  { %4030 = vpow2.f32 %v3786_v49  ;;  %v2304_v56 = vadd.f32 %v2213_v27, %v5249_v22 }
 0xc31   :  { %v2306_v46 = vrot.slane %v2304_v56, 1 }
 0xc32   :  { %v4025_v20 = vpop.eup %4024 }
 0xc33   :  { %v4027_v32 = vpop.eup %4026  ;;  %v2240_v8 = vadd.f32 1.0, %v4025_v20  ;;  %v5262_v20 = vadd.f32 %v2152_v61, %v2079_v11 }
 0xc34   :  { %v4029_v12 = vpop.eup %4028  ;;  %v5240_v43 = vadd.f32 1.0, %v4027_v32 }
 0xc35   :  { %v4031_v47 = vpop.eup %4030  ;;  %v2242_v23 = vadd.f32 1.0, %v4029_v12  ;;  %4032 = vrcp.f32 %v2240_v8  ;;  %v2255_v13 = vand.u32 2147483648, %v2240_v8  ;;  %v2253_v31 = vand.u32 2147483647, %v2240_v8 }
 0xc36   :  { %v5242_v25 = vadd.f32 1.0, %v4031_v47  ;;  %4034 = vrcp.f32 %v5240_v43  ;;  %vm2249_vm11 = vweird.f32 %v2240_v8  ;;  %v2270_v52 = vand.u32 2147483648, %v5240_v43 }
 0xc37   :  { %4036 = vrcp.f32 %v2242_v23  ;;  %v2285_v37 = vand.u32 2147483648, %v2242_v23  ;;  %v2283_v51 = vand.u32 2147483647, %v2242_v23  ;;  %v2256_v6 = vor.u32 1.1754944e-38, %v2255_v13 }
 0xc38   :  { %4038 = vrcp.f32 %v5242_v25  ;;  %vm2254_vm5 = vcmp.eq.f32.partialorder %v2253_v31, 8.507059e+37  ;;  %vm2279_vm6 = vweird.f32 %v2242_v23  ;;  %v2298_v27 = vand.u32 2147483647, %v5242_v25 }
 0xc39   :  { %v2286_v35 = vor.u32 1.1754944e-38, %v2285_v37  ;;  %vm2284_vm2 = vcmp.eq.f32.partialorder %v2283_v51, 8.507059e+37 }
 0xc3b   :  { %v4033_v33 = vpop.eup %4032 }
 0xc3c   :  { %v5251_v53 = vpop.eup %4034  ;;  %v2245_v24 = vmul.f32 %v4033_v33, %v2240_v8  ;;  %vm2250_vm1 = vweird.f32 %v4033_v33 }
 0xc3d   :  { %v4037_v17 = vpop.eup %4036  ;;  %v2260_v45 = vmul.f32 %v5251_v53, %v5240_v43  ;;  %vm2251_vm4 = vmor %vm2249_vm11, %vm2250_vm1  ;;  %vm2265_vm1 = vweird.f32 %v5251_v53 }
 0xc3e   :  { %v5253_v34 = vpop.eup %4038  ;;  %v2246_v30 = vsub.f32 1.0, %v2245_v24  ;;  %v2275_v5 = vmul.f32 %v4037_v17, %v2242_v23  ;;  %vm2280_vm3 = vweird.f32 %v4037_v17  ;;  %v2268_v24 = vand.u32 2147483647, %v5240_v43 }
 0xc3f   :  { %v2290_v44 = vmul.f32 %v5253_v34, %v5242_v25  ;;  %v2261_v50 = vsub.f32 1.0, %v2260_v45  ;;  %vm2281_vm8 = vmor %vm2279_vm6, %vm2280_vm3  ;;  %vm2295_vm11 = vweird.f32 %v5253_v34  ;;  %vm2294_vm3 = vweird.f32 %v5242_v25 }
 0xc40   :  { %v2247_v59 = vmul.f32 %v4033_v33, %v2246_v30  ;;  %v2276_v15 = vsub.f32 1.0, %v2275_v5  ;;  %vm2299_vm6 = vcmp.eq.f32.partialorder %v2298_v27, 8.507059e+37 }
 0xc41   :  { %v2291_v4 = vsub.f32 1.0, %v2290_v44  ;;  %v2262_v12 = vmul.f32 %v5251_v53, %v2261_v50 }
 0xc42   :  { %v2248_v60 = vadd.f32 %v4033_v33, %v2247_v59  ;;  %v2277_v62 = vmul.f32 %v4037_v17, %v2276_v15 }
 0xc43   :  { %v2292_v47 = vmul.f32 %v5253_v34, %v2291_v4  ;;  %v2263_v61 = vadd.f32 %v5251_v53, %v2262_v12 }
 0xc44   :  { %v2252_v42 = vsel %vm2251_vm4, %v4033_v33, %v2248_v60  ;;  %v2278_v54 = vadd.f32 %v4037_v17, %v2277_v62  ;;  %v2300_v33 = vand.u32 2147483648, %v5242_v25 }
 0xc45   :  { %v2257_v40 = vsel %vm2254_vm5, %v2256_v6, %v2252_v42  ;;  %v2293_v0 = vadd.f32 %v5253_v34, %v2292_v47  ;;  %vm2296_vm5 = vmor %vm2294_vm3, %vm2295_vm11 }
 0xc46   :  { %v2282_v1 = vsel %vm2281_vm8, %v4037_v17, %v2278_v54  ;;  %v2309_v3 = vmul.f32 %v2304_v56, %v2257_v40  ;;  %v2271_v56 = vor.u32 1.1754944e-38, %v2270_v52  ;;  %v2301_v59 = vor.u32 1.1754944e-38, %v2300_v33 }
 0xc47   :  { %v2287_v49 = vsel %vm2284_vm2, %v2286_v35, %v2282_v1  ;;  %vm2264_vm2 = vweird.f32 %v5240_v43  ;;  %v2297_v30 = vsel %vm2296_vm5, %v5253_v34, %v2293_v0  ;;  %vm2269_vm8 = vcmp.eq.f32.partialorder %v2268_v24, 8.507059e+37 }
 0xc48   :  { %v2310_v32 = vmul.f32 %v2306_v46, %v2287_v49  ;;  %v2311_v8 = vadd.f32 %v2309_v3, %v5260_v7  ;;  %vm2266_vm4 = vmor %vm2264_vm2, %vm2265_vm1  ;;  %v2302_v15 = vsel %vm2299_vm6, %v2301_v59, %v2297_v30 }
 0xc49   :  { %v2267_v11 = vsel %vm2266_vm4, %v5251_v53, %v2263_v61 }
 0xc4a   :  { %v2312_v23 = vadd.f32 %v2310_v32, %v5262_v20  ;;  %4040 = vtanh.f32 %v2311_v8  ;;  %v2272_v45 = vsel %vm2269_vm8, %v2271_v56, %v2267_v11 }
 0xc4c   :  { %4042 = vtanh.f32 %v2312_v23 }
 0xc50   :  { %v4041_v17 = vpop.eup %4040 }
 0xc51   :  { %v2315_v5 = vsub.f32 0.0, %v4041_v17 }
 0xc52   :  { %v4043_v13 = vpop.eup %4042 }
 0xc53   :  { %v2316_v31 = vsub.f32 0.0, %v4043_v13  ;;  %v2317_v25 = vmul.f32 %v2315_v5, %v2272_v45 }
 0xc55   :  { %v2318_v44 = vmul.f32 %v2316_v31, %v2302_v15  ;;  %v5282_v43 = vadd.f32 %v4041_v17, %v2317_v25 }
 0xc57   :  { %v5280_v37 = vadd.f32 %v4043_v13, %v2318_v44 }
 0xc59   :  { %v2323_v60 = vrot.slane %v5280_v37, 7 }
 0xc5b   :  { %v2324_v34 = vsel %vm457_vm12, %v2323_v60, %v5282_v43 }
 0xc5c   :  { %3787 = vmatmul.msk.f32.vlgmr.msrb.gmra.mxu0 %vm42_vm0, %v2324_v34  ;;  %3788 = vmatmul.msk.f32.vlgmr.msra.gmra.mxu1 %vm42_vm0, %v2324_v34 }
 0xc5d   :  { %3789 = vmatmul.msk.f32.vlgmr.msrb.gmra.mxu2 %vm42_vm0, %v2324_v34  ;;  %2749 = vmatpush.msrb.mxu0 %v5156_v48 }
 0xc5e   :  { %2896 = vmatpush.msra.mxu1 %v5104_v58  ;;  %2916 = vmatpush.msrb.mxu2 %v5111_v16 }
 0xc5f   :  { %2750 = vmatpush.msrb.mxu0 %v5161_v19 }
 0xc60   :  { %2897 = vmatpush.msra.mxu1 %v5116_v21  ;;  %2917 = vmatpush.msrb.mxu2 %v5121_v10 }
 0xc61   :  { %2751 = vmatpush.msrb.mxu0 %v5168_v36 }
 0xc62   :  { %2898 = vmatpush.msra.mxu1 %v5128_v29  ;;  %2918 = vmatpush.msrb.mxu2 %v5133_v9 }
 0xc63   :  { %2752 = vmatpush.msrb.mxu0 %v5175_v26 }
 0xc64   :  { %2899 = vmatpush.msra.mxu1 %v5138_v18  ;;  %2919 = vmatpush.msrb.mxu2 %v5146_v38 }
 0xcd9   :  { %v2344_v53 = vpop.f32.mrf.mxu0  ;;  %v2364_v62 = vpop.f32.mrf.mxu1 }
 0xcda   :  { %v2389_v51 = vrot.slane %v2344_v53, 7  ;;  %v2397_v6 = vadd.f32 %v2344_v53, %v5232_v63  ;;  %v2390_v46 = vrot.slane %v2364_v62, 7  ;;  %v2398_v42 = vadd.f32 %v2364_v62, %v5234_v14 }
 0xcdc   :  { %v2395_v54 = vadd.f32 %v2389_v51, %v5228_v2  ;;  %v3792_v50 = vmul.f32 -1.442695, %v2397_v6  ;;  %v2396_v4 = vadd.f32 %v2390_v46, %v5230_v39  ;;  %v3793_v40 = vmul.f32 -1.442695, %v2398_v42 }
 0xcde   :  { %v3790_v35 = vmul.f32 -1.442695, %v2395_v54  ;;  %4044 = vpow2.f32 %v3792_v50  ;;  %v3791_v1 = vmul.f32 -1.442695, %v2396_v4 }
 0xcdf   :  { %4046 = vpow2.f32 %v3793_v40 }
 0xce0   :  { %4048 = vpow2.f32 %v3790_v35  ;;  %v2384_v27 = vpop.f32.mrf.mxu2 }
 0xce1   :  { %4050 = vpow2.f32 %v3791_v1  ;;  %v2475_v31 = vadd.f32 %v2384_v27, %v5249_v22 }
 0xce3   :  { %v2477_v54 = vrot.slane %v2475_v31, 7 }
 0xce4   :  { %v4045_v3 = vpop.eup %4044 }
 0xce5   :  { %v4047_v49 = vpop.eup %4046  ;;  %v2413_v32 = vadd.f32 1.0, %v4045_v3 }
 0xce6   :  { %v4049_v8 = vpop.eup %4048  ;;  %v5306_v23 = vadd.f32 1.0, %v4047_v49 }
 0xce7   :  { %v4051_v12 = vpop.eup %4050  ;;  %v2411_v47 = vadd.f32 1.0, %v4049_v8  ;;  %4052 = vrcp.f32 %v2413_v32  ;;  %v2456_v30 = vand.u32 2147483648, %v2413_v32  ;;  %v2454_v13 = vand.u32 2147483647, %v2413_v32 }
 0xce8   :  { %v5308_v0 = vadd.f32 1.0, %v4051_v12  ;;  %vm2450_vm11 = vweird.f32 %v2413_v32 }
 0xce9   :  { %4054 = vrcp.f32 %v2411_v47  ;;  %v2426_v59 = vand.u32 2147483648, %v2411_v47  ;;  %v2424_v44 = vand.u32 2147483647, %v2411_v47  ;;  %v2457_v60 = vor.u32 1.1754944e-38, %v2456_v30 }
 0xcea   :  { %4056 = vrcp.f32 %v5306_v23  ;;  %vm2420_vm4 = vweird.f32 %v2411_v47  ;;  %vm2455_vm5 = vcmp.eq.f32.partialorder %v2454_v13, 8.507059e+37  ;;  %v2441_v27 = vand.u32 2147483648, %v5308_v0 }
 0xceb   :  { %4058 = vrcp.f32 %v5308_v0  ;;  %v2427_v6 = vor.u32 1.1754944e-38, %v2426_v59  ;;  %vm2425_vm8 = vcmp.eq.f32.partialorder %v2424_v44, 8.507059e+37 }
 0xcec   :  { %v2442_v44 = vor.u32 1.1754944e-38, %v2441_v27 }
 0xced   :  { %v4053_v61 = vpop.eup %4052 }
 0xcee   :  { %v2446_v52 = vmul.f32 %v4053_v61, %v2413_v32  ;;  %vm2451_vm1 = vweird.f32 %v4053_v61 }
 0xcef   :  { %v4055_v33 = vpop.eup %4054  ;;  %vm2452_vm3 = vmor %vm2450_vm11, %vm2451_vm1 }
 0xcf0   :  { %v2416_v24 = vmul.f32 %v4055_v33, %v2411_v47  ;;  %v2447_v17 = vsub.f32 1.0, %v2446_v52  ;;  %v5312_v56 = vpop.eup %4056  ;;  %vm2421_vm2 = vweird.f32 %v4055_v33 }
 0xcf1   :  { %v4059_v15 = vpop.eup %4058  ;;  %v2461_v51 = vmul.f32 %v5312_v56, %v5306_v23  ;;  %vm2422_vm6 = vmor %vm2420_vm4, %vm2421_vm2  ;;  %vm2466_vm1 = vweird.f32 %v5312_v56  ;;  %vm2435_vm2 = vweird.f32 %v5308_v0 }
 0xcf2   :  { %v2417_v5 = vsub.f32 1.0, %v2416_v24  ;;  %v2448_v11 = vmul.f32 %v4053_v61, %v2447_v17  ;;  %v2431_v62 = vmul.f32 %v4059_v15, %v5308_v0  ;;  %vm2436_vm11 = vweird.f32 %v4059_v15 }
 0xcf3   :  { %v2462_v3 = vsub.f32 1.0, %v2461_v51  ;;  %v2471_v24 = vand.u32 2147483648, %v5306_v23  ;;  %v2439_v17 = vand.u32 2147483647, %v5308_v0 }
 0xcf4   :  { %v2418_v45 = vmul.f32 %v4055_v33, %v2417_v5  ;;  %v2449_v25 = vadd.f32 %v4053_v61, %v2448_v11  ;;  %v2432_v1 = vsub.f32 1.0, %v2431_v62  ;;  %v2469_v11 = vand.u32 2147483647, %v5306_v23 }
 0xcf5   :  { %v2463_v8 = vmul.f32 %v5312_v56, %v2462_v3 }
 0xcf6   :  { %v2419_v34 = vadd.f32 %v4055_v33, %v2418_v45  ;;  %v2453_v53 = vsel %vm2452_vm3, %v4053_v61, %v2449_v25  ;;  %v2433_v32 = vmul.f32 %v4059_v15, %v2432_v1  ;;  %vm2465_vm3 = vweird.f32 %v5306_v23 }
 0xcf7   :  { %v2458_v46 = vsel %vm2455_vm5, %v2457_v60, %v2453_v53  ;;  %v2464_v52 = vadd.f32 %v5312_v56, %v2463_v8  ;;  %vm2467_vm4 = vmor %vm2465_vm3, %vm2466_vm1  ;;  %v2472_v25 = vor.u32 1.1754944e-38, %v2471_v24 }
 0xcf8   :  { %v2423_v42 = vsel %vm2422_vm6, %v4055_v33, %v2419_v34  ;;  %v2481_v50 = vmul.f32 %v2475_v31, %v2458_v46  ;;  %v2434_v47 = vadd.f32 %v4059_v15, %v2433_v32  ;;  %vm2437_vm5 = vmor %vm2435_vm2, %vm2436_vm11  ;;  %vm2440_vm6 = vcmp.eq.f32.partialorder %v2439_v17, 8.507059e+37 }
 0xcf9   :  { %v2428_v4 = vsel %vm2425_vm8, %v2427_v6, %v2423_v42  ;;  %v2468_v31 = vsel %vm2467_vm4, %v5312_v56, %v2464_v52  ;;  %vm2470_vm8 = vcmp.eq.f32.partialorder %v2469_v11, 8.507059e+37 }
 0xcfa   :  { %v2480_v40 = vmul.f32 %v2477_v54, %v2428_v4  ;;  %v2483_v35 = vadd.f32 %v2481_v50, %v5262_v20  ;;  %v2438_v13 = vsel %vm2437_vm5, %v4059_v15, %v2434_v47  ;;  %v2473_v0 = vsel %vm2470_vm8, %v2472_v25, %v2468_v31 }
 0xcfb   :  { %v2443_v34 = vsel %vm2440_vm6, %v2442_v44, %v2438_v13 }
 0xcfc   :  { %v2482_v49 = vadd.f32 %v2480_v40, %v5260_v7  ;;  %4060 = vtanh.f32 %v2483_v35 }
 0xcfe   :  { %4062 = vtanh.f32 %v2482_v49 }
 0xd02   :  { %v4061_v12 = vpop.eup %4060 }
 0xd03   :  { %v2489_v61 = vrot.slane %v4061_v12, 1 }
 0xd04   :  { %v4063_v33 = vpop.eup %4062 }
 0xd05   :  { %v2488_v30 = vrot.slane %v4063_v33, 1  ;;  %v2493_v5 = vsub.f32 %v5280_v37, %v2489_v61 }
 0xd07   :  { %v2492_v59 = vsub.f32 %v5282_v43, %v2488_v30  ;;  %v2497_v45 = vrot.slane %v2493_v5, 7 }
 0xd09   :  { %v2496_v60 = vrot.slane %v2492_v59, 7  ;;  %v2501_v62 = vmul.f32 %v2497_v45, %v2473_v0 }
 0xd0b   :  { %v2500_v53 = vmul.f32 %v2496_v60, %v2443_v34  ;;  %v5334_v6 = vadd.f32 %v4061_v12, %v2501_v62 }
 0xd0d   :  { %v5332_v51 = vadd.f32 %v4063_v33, %v2500_v53 }
 0xd0f   :  { %v2506_v23 = vrot.slane %v5332_v51, 1 }
 0xd11   :  { %v2507_v15 = vsel %vm457_vm12, %v5334_v6, %v2506_v23 }
 0xd12   :  { %3794 = vmatmul.msk.f32.vlgmr.msrb.gmra.mxu3 %vm42_vm0, %v2507_v15  ;;  %3795 = vmatmul.msk.f32.vlgmr.msra.gmra.mxu0 %vm42_vm0, %v2507_v15 }
 0xd13   :  { %3796 = vmatmul.msk.f32.vlgmr.msrb.gmra.mxu1 %vm42_vm0, %v2507_v15  ;;  %2936 = vmatpush.msrb.mxu3 %v5156_v48 }
 0xd14   :  { %3083 = vmatpush.msra.mxu0 %v5104_v58  ;;  %3103 = vmatpush.msrb.mxu1 %v5111_v16 }
 0xd15   :  { %2937 = vmatpush.msrb.mxu3 %v5161_v19 }
 0xd16   :  { %3084 = vmatpush.msra.mxu0 %v5116_v21  ;;  %3104 = vmatpush.msrb.mxu1 %v5121_v10 }
 0xd17   :  { %2938 = vmatpush.msrb.mxu3 %v5168_v36 }
 0xd18   :  { %3085 = vmatpush.msra.mxu0 %v5128_v29  ;;  %3105 = vmatpush.msrb.mxu1 %v5133_v9 }
 0xd19   :  { %2939 = vmatpush.msrb.mxu3 %v5175_v26 }
 0xd1a   :  { %3086 = vmatpush.msra.mxu0 %v5138_v18  ;;  %3106 = vmatpush.msrb.mxu1 %v5146_v38 }
 0xd8f   :  { %v2547_v56 = vpop.f32.mrf.mxu0 }
 0xd90   :  { %v2573_v46 = vrot.slane %v2547_v56, 6  ;;  %v2575_v42 = vrot.slane %v2547_v56, 7  ;;  %v2567_v11 = vpop.f32.mrf.mxu1 }
 0xd91   :  { %v2660_v45 = vadd.f32 %v2567_v11, %v5249_v22 }
 0xd92   :  { %v2581_v54 = vadd.f32 %v2573_v46, %v5230_v39  ;;  %v2583_v4 = vadd.f32 %v2575_v42, %v5234_v14 }
 0xd93   :  { %v2662_v46 = vrot.slane %v2660_v45, 6 }
 0xd94   :  { %v3798_v1 = vmul.f32 -1.442695, %v2581_v54  ;;  %v3800_v32 = vmul.f32 -1.442695, %v2583_v4 }
 0xd95   :  { %v2527_v50 = vpop.f32.mrf.mxu3 }
 0xd96   :  { %v2572_v40 = vrot.slane %v2527_v50, 6  ;;  %v2574_v35 = vrot.slane %v2527_v50, 7  ;;  %4064 = vpow2.f32 %v3798_v1 }
 0xd98   :  { %v2580_v3 = vadd.f32 %v2572_v40, %v5228_v2  ;;  %v2582_v49 = vadd.f32 %v2574_v35, %v5232_v63 }
 0xd9a   :  { %v3797_v8 = vmul.f32 -1.442695, %v2580_v3  ;;  %v3799_v12 = vmul.f32 -1.442695, %v2582_v49  ;;  %v2663_v3 = vrot.slane %v2660_v45, 7 }
 0xd9c   :  { %4066 = vpow2.f32 %v3797_v8  ;;  %v4065_v47 = vpop.eup %4064 }
 0xd9d   :  { %4068 = vpow2.f32 %v3799_v12  ;;  %v5358_v17 = vadd.f32 1.0, %v4065_v47 }
 0xd9e   :  { %4070 = vpow2.f32 %v3800_v32 }
 0xda2   :  { %v4067_v61 = vpop.eup %4066 }
 0xda3   :  { %v4069_v52 = vpop.eup %4068  ;;  %v2596_v33 = vadd.f32 1.0, %v4067_v61 }
 0xda4   :  { %v4071_v27 = vpop.eup %4070  ;;  %v2598_v24 = vadd.f32 1.0, %v4069_v52 }
 0xda5   :  { %4072 = vrcp.f32 %v2596_v33  ;;  %v5360_v30 = vadd.f32 1.0, %v4071_v27  ;;  %v2611_v25 = vand.u32 2147483648, %v2596_v33  ;;  %v2609_v53 = vand.u32 2147483647, %v2596_v33 }
 0xda6   :  { %4074 = vrcp.f32 %v2598_v24  ;;  %v2641_v62 = vand.u32 2147483648, %v2598_v24  ;;  %v2639_v56 = vand.u32 2147483647, %v2598_v24  ;;  %vm2605_vm2 = vweird.f32 %v2596_v33 }
 0xda7   :  { %4076 = vrcp.f32 %v5358_v17  ;;  %v2612_v50 = vor.u32 1.1754944e-38, %v2611_v25  ;;  %vm2635_vm4 = vweird.f32 %v2598_v24  ;;  %vm2610_vm5 = vcmp.eq.f32.partialorder %v2609_v53, 8.507059e+37 }
 0xda8   :  { %4078 = vrcp.f32 %v5360_v30  ;;  %v2642_v1 = vor.u32 1.1754944e-38, %v2641_v62  ;;  %vm2640_vm8 = vcmp.eq.f32.partialorder %v2639_v56, 8.507059e+37  ;;  %v2656_v25 = vand.u32 2147483648, %v5360_v30 }
 0xdab   :  { %v4073_v5 = vpop.eup %4072 }
 0xdac   :  { %v4075_v13 = vpop.eup %4074  ;;  %v2601_v59 = vmul.f32 %v4073_v5, %v2596_v33  ;;  %vm2606_vm1 = vweird.f32 %v4073_v5 }
 0xdad   :  { %v2631_v31 = vmul.f32 %v4075_v13, %v2598_v24  ;;  %v5365_v34 = vpop.eup %4076  ;;  %vm2636_vm11 = vweird.f32 %v4075_v13  ;;  %vm2607_vm3 = vmor %vm2605_vm2, %vm2606_vm1  ;;  %vm2620_vm2 = vweird.f32 %v5358_v17 }
 0xdae   :  { %v2602_v44 = vsub.f32 1.0, %v2601_v59  ;;  %v4079_v23 = vpop.eup %4078  ;;  %v2616_v54 = vmul.f32 %v5365_v34, %v5358_v17  ;;  %vm2637_vm6 = vmor %vm2635_vm4, %vm2636_vm11  ;;  %vm2621_vm1 = vweird.f32 %v5365_v34  ;;  %v2626_v59 = vand.u32 2147483648, %v5358_v17 }
 0xdaf   :  { %v2632_v60 = vsub.f32 1.0, %v2631_v31  ;;  %v2646_v40 = vmul.f32 %v4079_v23, %v5360_v30  ;;  %vm2651_vm11 = vweird.f32 %v4079_v23  ;;  %vm2650_vm4 = vweird.f32 %v5360_v30 }
 0xdb0   :  { %v2603_v0 = vmul.f32 %v4073_v5, %v2602_v44  ;;  %v2617_v47 = vsub.f32 1.0, %v2616_v54  ;;  %v2624_v44 = vand.u32 2147483647, %v5358_v17  ;;  %v2627_v56 = vor.u32 1.1754944e-38, %v2626_v59 }
 0xdb1   :  { %v2633_v15 = vmul.f32 %v4075_v13, %v2632_v60  ;;  %v2647_v52 = vsub.f32 1.0, %v2646_v40  ;;  %v2657_v17 = vor.u32 1.1754944e-38, %v2656_v25 }
 0xdb2   :  { %v2604_v42 = vadd.f32 %v4073_v5, %v2603_v0  ;;  %v2618_v24 = vmul.f32 %v5365_v34, %v2617_v47  ;;  %v2654_v0 = vand.u32 2147483647, %v5360_v30 }
 0xdb3   :  { %v2634_v4 = vadd.f32 %v4075_v13, %v2633_v15 }
 0xdb4   :  { %v2608_v35 = vsel %vm2607_vm3, %v4073_v5, %v2604_v42  ;;  %v2648_v5 = vmul.f32 %v4079_v23, %v2647_v52  ;;  %v2619_v11 = vadd.f32 %v5365_v34, %v2618_v24  ;;  %vm2622_vm3 = vmor %vm2620_vm2, %vm2621_vm1 }
 0xdb5   :  { %v2613_v49 = vsel %vm2610_vm5, %v2612_v50, %v2608_v35  ;;  %v2638_v32 = vsel %vm2637_vm6, %v4075_v13, %v2634_v4  ;;  %vm2652_vm5 = vmor %vm2650_vm4, %vm2651_vm11  ;;  %vm2625_vm6 = vcmp.eq.f32.partialorder %v2624_v44, 8.507059e+37 }
 0xdb6   :  { %v2643_v8 = vsel %vm2640_vm8, %v2642_v1, %v2638_v32  ;;  %v2666_v12 = vmul.f32 %v2662_v46, %v2613_v49  ;;  %v2649_v31 = vadd.f32 %v4079_v23, %v2648_v5  ;;  %v2623_v62 = vsel %vm2622_vm3, %v5365_v34, %v2619_v11 }
 0xdb7   :  { %v2667_v61 = vmul.f32 %v2663_v3, %v2643_v8  ;;  %vm2655_vm8 = vcmp.eq.f32.partialorder %v2654_v0, 8.507059e+37  ;;  %v2628_v50 = vsel %vm2625_vm6, %v2627_v56, %v2623_v62 }
 0xdb8   :  { %v2668_v33 = vadd.f32 %v2666_v12, %v5260_v7  ;;  %v2653_v46 = vsel %vm2652_vm5, %v4079_v23, %v2649_v31 }
 0xdb9   :  { %v2669_v27 = vadd.f32 %v2667_v61, %v5262_v20  ;;  %v2658_v40 = vsel %vm2655_vm8, %v2657_v17, %v2653_v46 }
 0xdba   :  { %4080 = vtanh.f32 %v2668_v33 }
 0xdbb   :  { %4082 = vtanh.f32 %v2669_v27 }
 0xdc0   :  { %v4081_v13 = vpop.eup %4080 }
 0xdc1   :  { %v4083_v45 = vpop.eup %4082  ;;  %v2674_v60 = vrot.slane %v4081_v13, 1 }
 0xdc2   :  { %v2675_v53 = vrot.slane %v4083_v45, 1 }
 0xdc3   :  { %v2678_v15 = vsub.f32 %v5332_v51, %v2674_v60 }
 0xdc4   :  { %v2679_v42 = vsub.f32 %v5334_v6, %v2675_v53 }
 0xdc5   :  { %v2682_v54 = vrot.slane %v2678_v15, 7 }
 0xdc6   :  { %v2683_v4 = vrot.slane %v2679_v42, 7 }
 0xdc7   :  { %v2686_v35 = vmul.f32 %v2682_v54, %v2628_v50 }
 0xdc8   :  { %v2687_v1 = vmul.f32 %v2683_v4, %v2658_v40 }
 0xdc9   :  { %v5384_v30 = vadd.f32 %v4081_v13, %v2686_v35 }
 0xdca   :  { %v5386_v3 = vadd.f32 %v4083_v45, %v2687_v1 }
 0xdcb   :  { %v2692_v34 = vrot.slane %v5384_v30, 2 }
 0xdcc   :  { %v2693_v49 = vrot.slane %v5386_v3, 1 }
 0xdce   :  { %v2694_v23 = vsel %vm457_vm12, %v2693_v49, %v2692_v34 }
 0xdcf   :  { %3801 = vmatmul.msk.f32.vlgmr.msra.gmra.mxu2 %vm42_vm0, %v2694_v23  ;;  %3802 = vmatmul.msk.f32.vlgmr.msra.gmra.mxu3 %vm42_vm0, %v2694_v23 }
 0xdd0   :  { %3803 = vmatmul.msk.f32.vlgmr.msrb.gmra.mxu0 %vm42_vm0, %v2694_v23  ;;  %3123 = vmatpush.msra.mxu2 %v5156_v48 }
 0xdd1   :  { %3270 = vmatpush.msra.mxu3 %v5104_v58  ;;  %3290 = vmatpush.msrb.mxu0 %v5111_v16 }
 0xdd2   :  { %3124 = vmatpush.msra.mxu2 %v5161_v19 }
 0xdd3   :  { %3271 = vmatpush.msra.mxu3 %v5116_v21  ;;  %3291 = vmatpush.msrb.mxu0 %v5121_v10 }
 0xdd4   :  { %3125 = vmatpush.msra.mxu2 %v5168_v36 }
 0xdd5   :  { %3272 = vmatpush.msra.mxu3 %v5128_v29  ;;  %3292 = vmatpush.msrb.mxu0 %v5133_v9 }
 0xdd6   :  { %3126 = vmatpush.msra.mxu2 %v5175_v26 }
 0xdd7   :  { %3273 = vmatpush.msra.mxu3 %v5138_v18  ;;  %3293 = vmatpush.msrb.mxu0 %v5146_v38 }
 0xe4d   :  { %v2754_v13 = vpop.f32.mrf.mxu0 }
 0xe4e   :  { %v2847_v44 = vadd.f32 %v2754_v13, %v5249_v22 }
 0xe50   :  { %v2849_v54 = vrot.slane %v2847_v44, 5  ;;  %v2850_v23 = vrot.slane %v2847_v44, 6 }
 0xe52   :  { %v2714_v58 = vpop.f32.mrf.mxu2  ;;  %v2734_v16 = vpop.f32.mrf.mxu3 }
 0xe53   :  { %v2759_v48 = vrot.slane %v2714_v58, 5  ;;  %v2761_v19 = vrot.slane %v2714_v58, 6  ;;  %v2760_v32 = vrot.slane %v2734_v16, 5  ;;  %v2762_v21 = vrot.slane %v2734_v16, 6 }
 0xe55   :  { %v2767_v10 = vadd.f32 %v2759_v48, %v5228_v2  ;;  %v2769_v36 = vadd.f32 %v2761_v19, %v5232_v63  ;;  %v2768_v29 = vadd.f32 %v2760_v32, %v5230_v39  ;;  %v2770_v9 = vadd.f32 %v2762_v21, %v5234_v14 }
 0xe57   :  { %v3804_v8 = vmul.f32 -1.442695, %v2767_v10  ;;  %v3806_v26 = vmul.f32 -1.442695, %v2769_v36  ;;  %v3805_v12 = vmul.f32 -1.442695, %v2768_v29 }
 0xe58   :  { %v3807_v18 = vmul.f32 -1.442695, %v2770_v9 }
 0xe59   :  { %4084 = vpow2.f32 %v3804_v8 }
 0xe5a   :  { %4086 = vpow2.f32 %v3806_v26 }
 0xe5b   :  { %4088 = vpow2.f32 %v3805_v12 }
 0xe5c   :  { %4090 = vpow2.f32 %v3807_v18 }
 0xe5f   :  { %v4085_v38 = vpop.eup %4084 }
 0xe60   :  { %v4087_v47 = vpop.eup %4086  ;;  %v2783_v61 = vadd.f32 1.0, %v4085_v38 }
 0xe61   :  { %v4089_v52 = vpop.eup %4088  ;;  %v2785_v33 = vadd.f32 1.0, %v4087_v47 }
 0xe62   :  { %v4091_v27 = vpop.eup %4090  ;;  %4092 = vrcp.f32 %v2783_v61  ;;  %v5410_v24 = vadd.f32 1.0, %v4089_v52  ;;  %v2798_v60 = vand.u32 2147483648, %v2783_v61  ;;  %v2796_v15 = vand.u32 2147483647, %v2783_v61 }
 0xe63   :  { %4094 = vrcp.f32 %v2785_v33  ;;  %v5412_v5 = vadd.f32 1.0, %v4091_v27  ;;  %v2828_v56 = vand.u32 2147483648, %v2785_v33  ;;  %v2826_v17 = vand.u32 2147483647, %v2785_v33 }
 0xe64   :  { %4096 = vrcp.f32 %v5410_v24  ;;  %vm2792_vm2 = vweird.f32 %v2783_v61  ;;  %v2799_v4 = vor.u32 1.1754944e-38, %v2798_v60  ;;  %vm2822_vm4 = vweird.f32 %v2785_v33 }
 0xe65   :  { %4098 = vrcp.f32 %v5412_v5  ;;  %vm2797_vm5 = vcmp.eq.f32.partialorder %v2796_v15, 8.507059e+37  ;;  %v2829_v34 = vor.u32 1.1754944e-38, %v2828_v56  ;;  %vm2827_vm8 = vcmp.eq.f32.partialorder %v2826_v17, 8.507059e+37 }
 0xe66   :  { %v2813_v18 = vand.u32 2147483648, %v5410_v24  ;;  %v2843_v52 = vand.u32 2147483648, %v5412_v5  ;;  %v2841_v27 = vand.u32 2147483647, %v5412_v5 }
 0xe68   :  { %v4093_v11 = vpop.eup %4092 }
 0xe69   :  { %v4095_v59 = vpop.eup %4094  ;;  %v2788_v31 = vmul.f32 %v4093_v11, %v2783_v61  ;;  %vm2793_vm1 = vweird.f32 %v4093_v11  ;;  %v2811_v61 = vand.u32 2147483647, %v5410_v24 }
 0xe6a   :  { %v2818_v45 = vmul.f32 %v4095_v59, %v2785_v33  ;;  %v5417_v53 = vpop.eup %4096  ;;  %vm2823_vm11 = vweird.f32 %v4095_v59  ;;  %vm2794_vm3 = vmor %vm2792_vm2, %vm2793_vm1  ;;  %vm2807_vm2 = vweird.f32 %v5410_v24 }
 0xe6b   :  { %v2789_v25 = vsub.f32 1.0, %v2788_v31  ;;  %v4099_v46 = vpop.eup %4098  ;;  %v2803_v35 = vmul.f32 %v5417_v53, %v5410_v24  ;;  %vm2824_vm6 = vmor %vm2822_vm4, %vm2823_vm11  ;;  %vm2808_vm1 = vweird.f32 %v5417_v53  ;;  %vm2837_vm4 = vweird.f32 %v5412_v5 }
 0xe6c   :  { %v2819_v0 = vsub.f32 1.0, %v2818_v45  ;;  %v2833_v49 = vmul.f32 %v4099_v46, %v5412_v5  ;;  %vm2838_vm11 = vweird.f32 %v4099_v46  ;;  %v2814_v31 = vor.u32 1.1754944e-38, %v2813_v18 }
 0xe6d   :  { %v2790_v62 = vmul.f32 %v4093_v11, %v2789_v25  ;;  %v2804_v21 = vsub.f32 1.0, %v2803_v35  ;;  %v2844_v24 = vor.u32 1.1754944e-38, %v2843_v52  ;;  %v4202_v35 = vld [vmem:[%s5708_s1 + $0x168] sm:$0xff] }
 0xe6e   :  { %v2820_v42 = vmul.f32 %v4095_v59, %v2819_v0  ;;  %v2834_v10 = vsub.f32 1.0, %v2833_v49  ;;  %v4205_v49 = vld [vmem:[%s5708_s1 + $0x150] sm:$0xff] }
 0xe6f   :  { %v2791_v50 = vadd.f32 %v4093_v11, %v2790_v62  ;;  %v2805_v9 = vmul.f32 %v5417_v53, %v2804_v21 }
 0xe70   :  { %v2821_v40 = vadd.f32 %v4095_v59, %v2820_v42  ;;  %v2835_v8 = vmul.f32 %v4099_v46, %v2834_v10 }
 0xe71   :  { %v2795_v1 = vsel %vm2794_vm3, %v4093_v11, %v2791_v50  ;;  %v2806_v26 = vadd.f32 %v5417_v53, %v2805_v9  ;;  %vm2809_vm3 = vmor %vm2807_vm2, %vm2808_vm1  ;;  %v4199_v50 = vld [vmem:[%s5708_s1 + $0x180] sm:$0xff] }
 0xe72   :  { %v2800_v58 = vsel %vm2797_vm5, %v2799_v4, %v2795_v1  ;;  %v2825_v16 = vsel %vm2824_vm6, %v4095_v59, %v2821_v40  ;;  %v2836_v38 = vadd.f32 %v4099_v46, %v2835_v8  ;;  %vm2839_vm5 = vmor %vm2837_vm4, %vm2838_vm11  ;;  %vm2812_vm6 = vcmp.eq.f32.partialorder %v2811_v61, 8.507059e+37  ;;  %v4200_v4 = vld [vmem:[%s5708_s1 + $0x188] sm:$0xff]  ;;  %v5461_v40 = vld [vmem:[%s5708_s1 + $0x178] sm:$0xff] }
 0xe73   :  { %v2830_v48 = vsel %vm2827_vm8, %v2829_v34, %v2825_v16  ;;  %v2853_v19 = vmul.f32 %v2849_v54, %v2800_v58  ;;  %v2810_v13 = vsel %vm2809_vm3, %v5417_v53, %v2806_v26  ;;  %vm2842_vm8 = vcmp.eq.f32.partialorder %v2841_v27, 8.507059e+37  ;;  %v5449_v54 = vld [vmem:[%s5708_s1 + $0x190] sm:$0xff]  ;;  %v5473_v34 = vld [vmem:[%s5708_s1 + $0x160] sm:$0xff]  ;;  %v5485_v58 = vld [vmem:[%s5708_s1 + $0x148] sm:$0xff] }
 0xe74   :  { %v2854_v32 = vmul.f32 %v2850_v23, %v2830_v48  ;;  %v2840_v45 = vsel %vm2839_vm5, %v4099_v46, %v2836_v38  ;;  %v2815_v60 = vsel %vm2812_vm6, %v2814_v31, %v2810_v13  ;;  %v4203_v1 = vld [vmem:[%s5708_s1 + $0x170] sm:$0xff]  ;;  %v4206_v23 = vld [vmem:[%s5708_s1 + $0x158] sm:$0xff]  ;;  %v4209_v48 = vld [vmem:[%s5708_s1 + $0x140] sm:$0xff] }
 0xe75   :  { %v2855_v36 = vadd.f32 %v2853_v19, %v5260_v7  ;;  %v2845_v62 = vsel %vm2842_vm8, %v2844_v24, %v2840_v45  ;;  %v4208_v16 = vld [vmem:[%s5708_s1 + $0x138] sm:$0xff]  ;;  %s4264_s1 = smov [#allocation4]  }
 0xe76   :  { %v2856_v29 = vadd.f32 %v2854_v32, %v5262_v20  ;;  %s3663_s7 = sshll.u32 %s4264_s1, 4  ;;  %s3664_s7 = int_to_ptr.vmem [resolvable:$true] %s3663_s7 }
 0xe77   :  { %4100 = vtanh.f32 %v2855_v36  ;;  %3668 = dma.vmem_to_hbm [thread:$0]  %s3664_s7, 32, %s3666_s10, [#allocation5]  }
 0xe78   :  { %4102 = vtanh.f32 %v2856_v29 }
 0xe7d   :  { %v4101_v12 = vpop.eup %4100 }
 0xe7e   :  { %v4103_v47 = vpop.eup %4102  ;;  %v2861_v33 = vrot.slane %v4101_v12, 1 }
 0xe7f   :  { %v2862_v11 = vrot.slane %v4103_v47, 1 }
 0xe80   :  { %v2865_v59 = vsub.f32 %v5384_v30, %v2861_v33 }
 0xe81   :  { %v2866_v44 = vsub.f32 %v5386_v3, %v2862_v11 }
 0xe82   :  { %v2869_v25 = vrot.slane %v2865_v59, 7 }
 0xe83   :  { %v2870_v0 = vrot.slane %v2866_v44, 7 }
 0xe84   :  { %v2873_v15 = vmul.f32 %v2869_v25, %v2815_v60 }
 0xe85   :  { %v2874_v56 = vmul.f32 %v2870_v0, %v2845_v62 }
 0xe86   :  { %v5436_v5 = vadd.f32 %v4101_v12, %v2873_v15 }
 0xe87   :  { %v5438_v42 = vadd.f32 %v4103_v47, %v2874_v56 }
 0xe88   :  { %v2879_v53 = vrot.slane %v5436_v5, 3 }
 0xe89   :  { %v2880_v17 = vrot.slane %v5438_v42, 2 }
 0xe8b   :  { %v2881_v46 = vsel %vm457_vm12, %v2880_v17, %v2879_v53 }
 0xe8c   :  { %3808 = vmatmul.msk.f32.vlgmr.msra.gmra.mxu1 %vm42_vm0, %v2881_v46  ;;  %3809 = vmatmul.msk.f32.vlgmr.msrb.gmra.mxu2 %vm42_vm0, %v2881_v46 }
 0xe8d   :  { %3810 = vmatmul.msk.f32.vlgmr.msrb.gmra.mxu3 %vm42_vm0, %v2881_v46  ;;  %3310 = vmatpush.msra.mxu1 %v5449_v54 }
 0xe8e   :  { %3457 = vmatpush.msrb.mxu2 %v4199_v50  ;;  %3477 = vmatpush.msrb.mxu3 %v4200_v4 }
 0xe8f   :  { %3311 = vmatpush.msra.mxu1 %v5461_v40 }
 0xe90   :  { %3458 = vmatpush.msrb.mxu2 %v4202_v35  ;;  %3478 = vmatpush.msrb.mxu3 %v4203_v1 }
 0xe91   :  { %3312 = vmatpush.msra.mxu1 %v5473_v34 }
 0xe92   :  { %3459 = vmatpush.msrb.mxu2 %v4205_v49  ;;  %3479 = vmatpush.msrb.mxu3 %v4206_v23 }
 0xe93   :  { %3313 = vmatpush.msra.mxu1 %v5485_v58 }
 0xe94   :  { %3460 = vmatpush.msrb.mxu2 %v4208_v16  ;;  %3480 = vmatpush.msrb.mxu3 %v4209_v48 }
 0xf09   :  { %v2901_v19 = vpop.f32.mrf.mxu1 }
 0xf0a   :  { %v2946_v32 = vrot.slane %v2901_v19, 4  ;;  %v2948_v21 = vrot.slane %v2901_v19, 5 }
 0xf0c   :  { %v2954_v10 = vadd.f32 %v2946_v32, %v5228_v2  ;;  %v2956_v36 = vadd.f32 %v2948_v21, %v5232_v63 }
 0xf0e   :  { %v3811_v29 = vmul.f32 -1.442695, %v2954_v10  ;;  %v3813_v9 = vmul.f32 -1.442695, %v2956_v36 }
 0xf0f   :  { %v2921_v8 = vpop.f32.mrf.mxu2 }
 0xf10   :  { %4104 = vpow2.f32 %v3811_v29  ;;  %v2947_v26 = vrot.slane %v2921_v8, 4  ;;  %v2949_v12 = vrot.slane %v2921_v8, 5  ;;  %v2941_v25 = vpop.f32.mrf.mxu3 }
 0xf11   :  { %4106 = vpow2.f32 %v3813_v9  ;;  %v3034_v15 = vadd.f32 %v2941_v25, %v5249_v22 }
 0xf12   :  { %v2955_v18 = vadd.f32 %v2947_v26, %v5230_v39  ;;  %v2957_v38 = vadd.f32 %v2949_v12, %v5234_v14 }
 0xf13   :  { %v3036_v16 = vrot.slane %v3034_v15, 4  ;;  %v3037_v8 = vrot.slane %v3034_v15, 5 }
 0xf14   :  { %v3812_v47 = vmul.f32 -1.442695, %v2955_v18  ;;  %v3814_v61 = vmul.f32 -1.442695, %v2957_v38 }
 0xf16   :  { %v4105_v52 = vpop.eup %4104  ;;  %4108 = vpow2.f32 %v3812_v47 }
 0xf17   :  { %v4107_v33 = vpop.eup %4106  ;;  %v2970_v27 = vadd.f32 1.0, %v4105_v52  ;;  %4110 = vpow2.f32 %v3814_v61 }
 0xf18   :  { %v2972_v11 = vadd.f32 1.0, %v4107_v33 }
 0xf19   :  { %4112 = vrcp.f32 %v2970_v27  ;;  %v2985_v56 = vand.u32 2147483648, %v2970_v27  ;;  %v2983_v50 = vand.u32 2147483647, %v2970_v27  ;;  %vm2979_vm2 = vweird.f32 %v2970_v27 }
 0xf1a   :  { %4114 = vrcp.f32 %v2972_v11  ;;  %v3015_v4 = vand.u32 2147483648, %v2972_v11  ;;  %v3013_v49 = vand.u32 2147483647, %v2972_v11  ;;  %vm3009_vm4 = vweird.f32 %v2972_v11 }
 0xf1b   :  { %v2986_v19 = vor.u32 1.1754944e-38, %v2985_v56  ;;  %vm2984_vm5 = vcmp.eq.f32.partialorder %v2983_v50, 8.507059e+37 }
 0xf1c   :  { %v4109_v13 = vpop.eup %4108  ;;  %v3016_v36 = vor.u32 1.1754944e-38, %v3015_v4  ;;  %vm3014_vm8 = vcmp.eq.f32.partialorder %v3013_v49, 8.507059e+37 }
 0xf1d   :  { %v4111_v59 = vpop.eup %4110  ;;  %v5498_v31 = vadd.f32 1.0, %v4109_v13 }
 0xf1e   :  { %v5500_v45 = vadd.f32 1.0, %v4111_v59 }
 0xf1f   :  { %v4113_v44 = vpop.eup %4112  ;;  %4116 = vrcp.f32 %v5498_v31  ;;  %v3000_v59 = vand.u32 2147483648, %v5498_v31  ;;  %v2998_v25 = vand.u32 2147483647, %v5498_v31 }
 0xf20   :  { %v4115_v24 = vpop.eup %4114  ;;  %4118 = vrcp.f32 %v5500_v45  ;;  %v2975_v60 = vmul.f32 %v4113_v44, %v2970_v27  ;;  %vm2980_vm1 = vweird.f32 %v4113_v44 }
 0xf21   :  { %v3005_v0 = vmul.f32 %v4115_v24, %v2972_v11  ;;  %vm3010_vm11 = vweird.f32 %v4115_v24  ;;  %vm2981_vm3 = vmor %vm2979_vm2, %vm2980_vm1  ;;  %vm2994_vm2 = vweird.f32 %v5498_v31 }
 0xf22   :  { %v2976_v62 = vsub.f32 1.0, %v2975_v60  ;;  %vm3011_vm6 = vmor %vm3009_vm4, %vm3010_vm11  ;;  %v3030_v60 = vand.u32 2147483648, %v5500_v45  ;;  %vm3024_vm4 = vweird.f32 %v5500_v45 }
 0xf23   :  { %v3006_v53 = vsub.f32 1.0, %v3005_v0 }
 0xf24   :  { %v2977_v46 = vmul.f32 %v4113_v44, %v2976_v62  ;;  %v3028_v62 = vand.u32 2147483647, %v5500_v45 }
 0xf25   :  { %v5505_v17 = vpop.eup %4116  ;;  %v3007_v1 = vmul.f32 %v4115_v24, %v3006_v53 }
 0xf26   :  { %v4119_v35 = vpop.eup %4118  ;;  %v2978_v23 = vadd.f32 %v4113_v44, %v2977_v46  ;;  %v2990_v48 = vmul.f32 %v5505_v17, %v5498_v31  ;;  %vm2995_vm1 = vweird.f32 %v5505_v17  ;;  %v3001_v46 = vor.u32 1.1754944e-38, %v3000_v59 }
 0xf27   :  { %v3008_v32 = vadd.f32 %v4115_v24, %v3007_v1  ;;  %v3020_v21 = vmul.f32 %v4119_v35, %v5500_v45  ;;  %vm3025_vm11 = vweird.f32 %v4119_v35  ;;  %v3031_v1 = vor.u32 1.1754944e-38, %v3030_v60 }
 0xf28   :  { %v2982_v10 = vsel %vm2981_vm3, %v4113_v44, %v2978_v23  ;;  %v2991_v18 = vsub.f32 1.0, %v2990_v48  ;;  %vm2996_vm3 = vmor %vm2994_vm2, %vm2995_vm1 }
 0xf29   :  { %v2987_v29 = vsel %vm2984_vm5, %v2986_v19, %v2982_v10  ;;  %v3012_v9 = vsel %vm3011_vm6, %v4115_v24, %v3008_v32  ;;  %v3021_v47 = vsub.f32 1.0, %v3020_v21  ;;  %vm3026_vm5 = vmor %vm3024_vm4, %vm3025_vm11  ;;  %vm2999_vm6 = vcmp.eq.f32.partialorder %v2998_v25, 8.507059e+37 }
 0xf2a   :  { %v3017_v26 = vsel %vm3014_vm8, %v3016_v36, %v3012_v9  ;;  %v3040_v12 = vmul.f32 %v3036_v16, %v2987_v29  ;;  %v2992_v33 = vmul.f32 %v5505_v17, %v2991_v18  ;;  %vm3029_vm8 = vcmp.eq.f32.partialorder %v3028_v62, 8.507059e+37 }
 0xf2b   :  { %v3041_v38 = vmul.f32 %v3037_v8, %v3017_v26  ;;  %v3022_v27 = vmul.f32 %v4119_v35, %v3021_v47 }
 0xf2c   :  { %v3042_v61 = vadd.f32 %v3040_v12, %v5260_v7  ;;  %v2993_v11 = vadd.f32 %v5505_v17, %v2992_v33 }
 0xf2d   :  { %v3043_v52 = vadd.f32 %v3041_v38, %v5262_v20  ;;  %v3023_v44 = vadd.f32 %v4119_v35, %v3022_v27 }
 0xf2e   :  { %4120 = vtanh.f32 %v3042_v61  ;;  %v2997_v56 = vsel %vm2996_vm3, %v5505_v17, %v2993_v11 }
 0xf2f   :  { %4122 = vtanh.f32 %v3043_v52  ;;  %v3027_v50 = vsel %vm3026_vm5, %v4119_v35, %v3023_v44  ;;  %v3002_v49 = vsel %vm2999_vm6, %v3001_v46, %v2997_v56 }
 0xf30   :  { %v3032_v16 = vsel %vm3029_vm8, %v3031_v1, %v3027_v50 }
 0xf34   :  { %v4121_v13 = vpop.eup %4120 }
 0xf35   :  { %v4123_v24 = vpop.eup %4122  ;;  %v3048_v0 = vrot.slane %v4121_v13, 1 }
 0xf36   :  { %v3049_v15 = vrot.slane %v4123_v24, 1 }
 0xf37   :  { %v3052_v53 = vsub.f32 %v5436_v5, %v3048_v0 }
 0xf38   :  { %v3053_v4 = vsub.f32 %v5438_v42, %v3049_v15 }
 0xf39   :  { %v3056_v31 = vrot.slane %v3052_v53, 7 }
 0xf3a   :  { %v3057_v23 = vrot.slane %v3053_v4, 7 }
 0xf3b   :  { %v3060_v48 = vmul.f32 %v3056_v31, %v3002_v49 }
 0xf3c   :  { %v3061_v19 = vmul.f32 %v3057_v23, %v3032_v16 }
 0xf3d   :  { %v5524_v45 = vadd.f32 %v4121_v13, %v3060_v48 }
 0xf3e   :  { %v5526_v32 = vadd.f32 %v4123_v24, %v3061_v19 }
 0xf3f   :  { %v3066_v17 = vrot.slane %v5524_v45, 4 }
 0xf40   :  { %v3067_v21 = vrot.slane %v5526_v32, 3 }
 0xf42   :  { %v3068_v35 = vsel %vm457_vm12, %v3067_v21, %v3066_v17 }
 0xf43   :  { %3815 = vmatmul.msk.f32.vlgmr.msra.gmra.mxu0 %vm42_vm0, %v3068_v35  ;;  %3816 = vmatmul.msk.f32.vlgmr.msrb.gmra.mxu1 %vm42_vm0, %v3068_v35 }
 0xf44   :  { %3817 = vmatmul.msk.f32.vlgmr.msra.gmra.mxu2 %vm42_vm0, %v3068_v35  ;;  %3497 = vmatpush.msra.mxu0 %v5449_v54 }
 0xf46   :  { %3498 = vmatpush.msra.mxu0 %v5461_v40 }
 0xf48   :  { %3499 = vmatpush.msra.mxu0 %v5473_v34 }
 0xf4a   :  { %3500 = vmatpush.msra.mxu0 %v5485_v58 }
 0xfc0   :  { %v3088_v10 = vpop.f32.mrf.mxu0  ;;  %v3108_v36 = vpop.f32.mrf.mxu1 }
 0xfc1   :  { %v3133_v29 = vrot.slane %v3088_v10, 3  ;;  %v3135_v9 = vrot.slane %v3088_v10, 4  ;;  %v3134_v8 = vrot.slane %v3108_v36, 3  ;;  %v3136_v26 = vrot.slane %v3108_v36, 4 }
 0xfc3   :  { %v3141_v12 = vadd.f32 %v3133_v29, %v5228_v2  ;;  %v3143_v18 = vadd.f32 %v3135_v9, %v5232_v63  ;;  %v3142_v38 = vadd.f32 %v3134_v8, %v5230_v39  ;;  %v3144_v54 = vadd.f32 %v3136_v26, %v5234_v14 }
 0xfc5   :  { %v3818_v47 = vmul.f32 -1.442695, %v3141_v12  ;;  %v3820_v40 = vmul.f32 -1.442695, %v3143_v18  ;;  %v3819_v61 = vmul.f32 -1.442695, %v3142_v38 }
 0xfc6   :  { %v3821_v34 = vmul.f32 -1.442695, %v3144_v54 }
 0xfc7   :  { %4124 = vpow2.f32 %v3818_v47  ;;  %v3128_v25 = vpop.f32.mrf.mxu2 }
 0xfc8   :  { %4126 = vpow2.f32 %v3820_v40  ;;  %v3221_v56 = vadd.f32 %v3128_v25, %v5249_v22 }
 0xfc9   :  { %4128 = vpow2.f32 %v3819_v61 }
 0xfca   :  { %4130 = vpow2.f32 %v3821_v34  ;;  %v3223_v19 = vrot.slane %v3221_v56, 3  ;;  %v3224_v26 = vrot.slane %v3221_v56, 4 }
 0xfcd   :  { %v4125_v58 = vpop.eup %4124 }
 0xfce   :  { %v4127_v52 = vpop.eup %4126  ;;  %v3157_v33 = vadd.f32 1.0, %v4125_v58 }
 0xfcf   :  { %v4129_v27 = vpop.eup %4128  ;;  %v3159_v11 = vadd.f32 1.0, %v4127_v52 }
 0xfd0   :  { %v4131_v13 = vpop.eup %4130  ;;  %4132 = vrcp.f32 %v3157_v33  ;;  %v5542_v59 = vadd.f32 1.0, %v4129_v27  ;;  %v3172_v53 = vand.u32 2147483648, %v3157_v33  ;;  %v3170_v1 = vand.u32 2147483647, %v3157_v33 }
 0xfd1   :  { %4134 = vrcp.f32 %v3159_v11  ;;  %v5544_v44 = vadd.f32 1.0, %v4131_v13  ;;  %v3202_v31 = vand.u32 2147483648, %v3159_v11  ;;  %v3200_v16 = vand.u32 2147483647, %v3159_v11 }
 0xfd2   :  { %4136 = vrcp.f32 %v5542_v59  ;;  %vm3166_vm2 = vweird.f32 %v3157_v33  ;;  %v3173_v21 = vor.u32 1.1754944e-38, %v3172_v53  ;;  %vm3196_vm4 = vweird.f32 %v3159_v11 }
 0xfd3   :  { %4138 = vrcp.f32 %v5544_v44  ;;  %vm3171_vm5 = vcmp.eq.f32.partialorder %v3170_v1, 8.507059e+37  ;;  %v3203_v29 = vor.u32 1.1754944e-38, %v3202_v31  ;;  %vm3201_vm8 = vcmp.eq.f32.partialorder %v3200_v16, 8.507059e+37 }
 0xfd4   :  { %v3187_v27 = vand.u32 2147483648, %v5542_v59  ;;  %v3217_v25 = vand.u32 2147483648, %v5544_v44 }
 0xfd6   :  { %v4133_v24 = vpop.eup %4132  ;;  %v3188_v53 = vor.u32 1.1754944e-38, %v3187_v27  ;;  %v3218_v1 = vor.u32 1.1754944e-38, %v3217_v25 }
 0xfd7   :  { %v4135_v60 = vpop.eup %4134  ;;  %v3162_v0 = vmul.f32 %v4133_v24, %v3157_v33  ;;  %vm3167_vm1 = vweird.f32 %v4133_v24 }
 0xfd8   :  { %v3192_v62 = vmul.f32 %v4135_v60, %v3159_v11  ;;  %v5549_v50 = vpop.eup %4136  ;;  %vm3197_vm11 = vweird.f32 %v4135_v60  ;;  %vm3168_vm3 = vmor %vm3166_vm2, %vm3167_vm1  ;;  %vm3181_vm2 = vweird.f32 %v5542_v59 }
 0xfd9   :  { %v3163_v15 = vsub.f32 1.0, %v3162_v0  ;;  %v4139_v49 = vpop.eup %4138  ;;  %v3177_v17 = vmul.f32 %v5549_v50, %v5542_v59  ;;  %vm3198_vm6 = vmor %vm3196_vm4, %vm3197_vm11  ;;  %vm3182_vm1 = vweird.f32 %v5549_v50  ;;  %vm3211_vm4 = vweird.f32 %v5544_v44 }
 0xfda   :  { %v3193_v46 = vsub.f32 1.0, %v3192_v62  ;;  %v3207_v10 = vmul.f32 %v4139_v49, %v5544_v44  ;;  %vm3212_vm11 = vweird.f32 %v4139_v49  ;;  %v3215_v0 = vand.u32 2147483647, %v5544_v44 }
 0xfdb   :  { %v3164_v4 = vmul.f32 %v4133_v24, %v3163_v15  ;;  %v3178_v38 = vsub.f32 1.0, %v3177_v17 }
 0xfdc   :  { %v3194_v23 = vmul.f32 %v4135_v60, %v3193_v46  ;;  %v3208_v47 = vsub.f32 1.0, %v3207_v10 }
 0xfdd   :  { %v3165_v48 = vadd.f32 %v4133_v24, %v3164_v4  ;;  %v3179_v34 = vmul.f32 %v5549_v50, %v3178_v38 }
 0xfde   :  { %v3195_v35 = vadd.f32 %v4135_v60, %v3194_v23  ;;  %v3209_v58 = vmul.f32 %v4139_v49, %v3208_v47 }
 0xfdf   :  { %v3169_v36 = vsel %vm3168_vm3, %v4133_v24, %v3165_v48  ;;  %v3180_v52 = vadd.f32 %v5549_v50, %v3179_v34  ;;  %v3185_v24 = vand.u32 2147483647, %v5542_v59  ;;  %vm3183_vm3 = vmor %vm3181_vm2, %vm3182_vm1 }
 0xfe0   :  { %v3174_v9 = vsel %vm3171_vm5, %v3173_v21, %v3169_v36  ;;  %v3199_v8 = vsel %vm3198_vm6, %v4135_v60, %v3195_v35  ;;  %v3210_v11 = vadd.f32 %v4139_v49, %v3209_v58  ;;  %vm3213_vm5 = vmor %vm3211_vm4, %vm3212_vm11 }
 0xfe1   :  { %v3204_v12 = vsel %vm3201_vm8, %v3203_v29, %v3199_v8  ;;  %v3227_v18 = vmul.f32 %v3223_v19, %v3174_v9  ;;  %v3184_v15 = vsel %vm3183_vm3, %v5549_v50, %v3180_v52  ;;  %vm3186_vm6 = vcmp.eq.f32.partialorder %v3185_v24, 8.507059e+37 }
 0xfe2   :  { %v3228_v54 = vmul.f32 %v3224_v26, %v3204_v12  ;;  %v3214_v46 = vsel %vm3213_vm5, %v4139_v49, %v3210_v11  ;;  %v3189_v31 = vsel %vm3186_vm6, %v3188_v53, %v3184_v15  ;;  %vm3216_vm8 = vcmp.eq.f32.partialorder %v3215_v0, 8.507059e+37 }
 0xfe3   :  { %v3229_v40 = vadd.f32 %v3227_v18, %v5260_v7  ;;  %v3219_v16 = vsel %vm3216_vm8, %v3218_v1, %v3214_v46 }
 0xfe4   :  { %v3230_v61 = vadd.f32 %v3228_v54, %v5262_v20 }
 0xfe5   :  { %4140 = vtanh.f32 %v3229_v40 }
 0xfe6   :  { %4142 = vtanh.f32 %v3230_v61 }
 0xfeb   :  { %v4141_v33 = vpop.eup %4140 }
 0xfec   :  { %v4143_v13 = vpop.eup %4142  ;;  %v3235_v60 = vrot.slane %v4141_v33, 1 }
 0xfed   :  { %v3236_v62 = vrot.slane %v4143_v13, 1 }
 0xfee   :  { %v3239_v56 = vsub.f32 %v5524_v45, %v3235_v60 }
 0xfef   :  { %v3240_v4 = vsub.f32 %v5526_v32, %v3236_v62 }
 0xff0   :  { %v3243_v59 = vrot.slane %v3239_v56, 7 }
 0xff1   :  { %v3244_v23 = vrot.slane %v3240_v4, 7 }
 0xff2   :  { %v3247_v48 = vmul.f32 %v3243_v59, %v3189_v31 }
 0xff3   :  { %v3248_v19 = vmul.f32 %v3244_v23, %v3219_v16 }
 0xff4   :  { %v5568_v44 = vadd.f32 %v4141_v33, %v3247_v48 }
 0xff5   :  { %v5570_v17 = vadd.f32 %v4143_v13, %v3248_v19 }
 0xff6   :  { %v3253_v50 = vrot.slane %v5568_v44, 5 }
 0xff7   :  { %v3254_v21 = vrot.slane %v5570_v17, 4 }
 0xff9   :  { %v3255_v49 = vsel %vm457_vm12, %v3254_v21, %v3253_v50 }
 0xffa   :  { %3822 = vmatmul.msk.f32.vlgmr.msra.gmra.mxu3 %vm42_vm0, %v3255_v49  ;;  %3823 = vmatmul.msk.f32.vlgmr.msrb.gmra.mxu0 %vm42_vm0, %v3255_v49 }
 0xffb   :  { %3824 = vmatmul.msk.f32.vlgmr.msra.gmra.mxu1 %vm42_vm0, %v3255_v49 }
0x1077   :  { %v3295_v35 = vpop.f32.mrf.mxu0 }
0x1078   :  { %v3321_v10 = vrot.slane %v3295_v35, 2  ;;  %v3323_v36 = vrot.slane %v3295_v35, 3  ;;  %v3315_v60 = vpop.f32.mrf.mxu1 }
0x1079   :  { %v3408_v56 = vadd.f32 %v3315_v60, %v5249_v22 }
0x107a   :  { %v3329_v29 = vadd.f32 %v3321_v10, %v5230_v39  ;;  %v3331_v8 = vadd.f32 %v3323_v36, %v5234_v14 }
0x107b   :  { %v3410_v50 = vrot.slane %v3408_v56, 2 }
0x107c   :  { %v3826_v18 = vmul.f32 -1.442695, %v3329_v29  ;;  %v3828_v47 = vmul.f32 -1.442695, %v3331_v8  ;;  %v3411_v8 = vrot.slane %v3408_v56, 3 }
0x107d   :  { %v3275_v9 = vpop.f32.mrf.mxu3 }
0x107e   :  { %v3320_v26 = vrot.slane %v3275_v9, 2  ;;  %v3322_v12 = vrot.slane %v3275_v9, 3  ;;  %4144 = vpow2.f32 %v3826_v18 }
0x1080   :  { %v3328_v38 = vadd.f32 %v3320_v26, %v5228_v2  ;;  %v3330_v54 = vadd.f32 %v3322_v12, %v5232_v63 }
0x1082   :  { %v3825_v40 = vmul.f32 -1.442695, %v3328_v38  ;;  %v3827_v61 = vmul.f32 -1.442695, %v3330_v54 }
0x1084   :  { %4146 = vpow2.f32 %v3825_v40  ;;  %v4145_v34 = vpop.eup %4144 }
0x1085   :  { %4148 = vpow2.f32 %v3827_v61  ;;  %v5582_v13 = vadd.f32 1.0, %v4145_v34 }
0x1086   :  { %4150 = vpow2.f32 %v3828_v47 }
0x108a   :  { %v4147_v58 = vpop.eup %4146 }
0x108b   :  { %v4149_v52 = vpop.eup %4148  ;;  %v3344_v33 = vadd.f32 1.0, %v4147_v58 }
0x108c   :  { %v4151_v27 = vpop.eup %4150  ;;  %v3346_v11 = vadd.f32 1.0, %v4149_v52 }
0x108d   :  { %4152 = vrcp.f32 %v3344_v33  ;;  %v5584_v24 = vadd.f32 1.0, %v4151_v27  ;;  %v3359_v46 = vand.u32 2147483648, %v3344_v33  ;;  %v3357_v31 = vand.u32 2147483647, %v3344_v33 }
0x108e   :  { %4154 = vrcp.f32 %v3346_v11  ;;  %v3389_v23 = vand.u32 2147483648, %v3346_v11  ;;  %v3387_v19 = vand.u32 2147483647, %v3346_v11  ;;  %vm3353_vm2 = vweird.f32 %v3344_v33 }
0x108f   :  { %4156 = vrcp.f32 %v5582_v13  ;;  %v3360_v35 = vor.u32 1.1754944e-38, %v3359_v46  ;;  %vm3383_vm4 = vweird.f32 %v3346_v11  ;;  %vm3358_vm5 = vcmp.eq.f32.partialorder %v3357_v31, 8.507059e+37 }
0x1090   :  { %4158 = vrcp.f32 %v5584_v24  ;;  %v3390_v9 = vor.u32 1.1754944e-38, %v3389_v23  ;;  %vm3388_vm8 = vcmp.eq.f32.partialorder %v3387_v19, 8.507059e+37  ;;  %v3402_v56 = vand.u32 2147483647, %v5584_v24 }
0x1093   :  { %v4153_v25 = vpop.eup %4152 }
0x1094   :  { %v4155_v0 = vpop.eup %4154  ;;  %v3349_v62 = vmul.f32 %v4153_v25, %v3344_v33  ;;  %vm3354_vm1 = vweird.f32 %v4153_v25 }
0x1095   :  { %v3379_v15 = vmul.f32 %v4155_v0, %v3346_v11  ;;  %v5589_v1 = vpop.eup %4156  ;;  %vm3384_vm11 = vweird.f32 %v4155_v0  ;;  %vm3355_vm3 = vmor %vm3353_vm2, %vm3354_vm1  ;;  %v3374_v11 = vand.u32 2147483648, %v5582_v13  ;;  %vm3368_vm2 = vweird.f32 %v5582_v13 }
0x1096   :  { %v3350_v53 = vsub.f32 1.0, %v3349_v62  ;;  %v4159_v16 = vpop.eup %4158  ;;  %v3364_v49 = vmul.f32 %v5589_v1, %v5582_v13  ;;  %vm3385_vm6 = vmor %vm3383_vm4, %vm3384_vm11  ;;  %vm3369_vm1 = vweird.f32 %v5589_v1  ;;  %v3404_v62 = vand.u32 2147483648, %v5584_v24 }
0x1097   :  { %v3380_v4 = vsub.f32 1.0, %v3379_v15  ;;  %v3394_v36 = vmul.f32 %v4159_v16, %v5584_v24  ;;  %vm3399_vm11 = vweird.f32 %v4159_v16  ;;  %vm3398_vm4 = vweird.f32 %v5584_v24 }
0x1098   :  { %v3351_v59 = vmul.f32 %v4153_v25, %v3350_v53  ;;  %v3365_v54 = vsub.f32 1.0, %v3364_v49 }
0x1099   :  { %v3381_v48 = vmul.f32 %v4155_v0, %v3380_v4  ;;  %v3395_v40 = vsub.f32 1.0, %v3394_v36 }
0x109a   :  { %v3352_v21 = vadd.f32 %v4153_v25, %v3351_v59  ;;  %v3366_v58 = vmul.f32 %v5589_v1, %v3365_v54  ;;  %v3375_v59 = vor.u32 1.1754944e-38, %v3374_v11 }
0x109b   :  { %v3382_v10 = vadd.f32 %v4155_v0, %v3381_v48  ;;  %v3396_v52 = vmul.f32 %v4159_v16, %v3395_v40 }
0x109c   :  { %v3356_v29 = vsel %vm3355_vm3, %v4153_v25, %v3352_v21  ;;  %v3367_v33 = vadd.f32 %v5589_v1, %v3366_v58  ;;  %vm3370_vm3 = vmor %vm3368_vm2, %vm3369_vm1 }
0x109d   :  { %v3361_v26 = vsel %vm3358_vm5, %v3360_v35, %v3356_v29  ;;  %v3386_v12 = vsel %vm3385_vm6, %v4155_v0, %v3382_v10  ;;  %v3397_v25 = vadd.f32 %v4159_v16, %v3396_v52  ;;  %v3372_v0 = vand.u32 2147483647, %v5582_v13  ;;  %vm3400_vm5 = vmor %vm3398_vm4, %vm3399_vm11 }
0x109e   :  { %v3391_v18 = vsel %vm3388_vm8, %v3390_v9, %v3386_v12  ;;  %v3414_v38 = vmul.f32 %v3410_v50, %v3361_v26  ;;  %v3371_v46 = vsel %vm3370_vm3, %v5589_v1, %v3367_v33  ;;  %v3405_v13 = vor.u32 1.1754944e-38, %v3404_v62 }
0x109f   :  { %v3415_v47 = vmul.f32 %v3411_v8, %v3391_v18  ;;  %v3401_v31 = vsel %vm3400_vm5, %v4159_v16, %v3397_v25  ;;  %vm3373_vm6 = vcmp.eq.f32.partialorder %v3372_v0, 8.507059e+37  ;;  %vm3403_vm8 = vcmp.eq.f32.partialorder %v3402_v56, 8.507059e+37 }
0x10a0   :  { %v3416_v61 = vadd.f32 %v3414_v38, %v5260_v7  ;;  %v3376_v19 = vsel %vm3373_vm6, %v3375_v59, %v3371_v46  ;;  %v3406_v21 = vsel %vm3403_vm8, %v3405_v13, %v3401_v31 }
0x10a1   :  { %v3417_v34 = vadd.f32 %v3415_v47, %v5262_v20 }
0x10a2   :  { %4160 = vtanh.f32 %v3416_v61 }
0x10a3   :  { %4162 = vtanh.f32 %v3417_v34 }
0x10a8   :  { %v4161_v27 = vpop.eup %4160 }
0x10a9   :  { %v4163_v60 = vpop.eup %4162  ;;  %v3422_v15 = vrot.slane %v4161_v27, 1 }
0x10aa   :  { %v3423_v53 = vrot.slane %v4163_v60, 1 }
0x10ab   :  { %v3426_v4 = vsub.f32 %v5568_v44, %v3422_v15 }
0x10ac   :  { %v3427_v23 = vsub.f32 %v5570_v17, %v3423_v53 }
0x10ad   :  { %v3430_v48 = vrot.slane %v3426_v4, 7 }
0x10ae   :  { %v3431_v50 = vrot.slane %v3427_v23, 7 }
0x10af   :  { %v3434_v49 = vmul.f32 %v3430_v48, %v3376_v19 }
0x10b0   :  { %v3435_v35 = vmul.f32 %v3431_v50, %v3406_v21 }
0x10b1   :  { %v5608_v24 = vadd.f32 %v4161_v27, %v3434_v49 }
0x10b2   :  { %v5610_v10 = vadd.f32 %v4163_v60, %v3435_v35 }
0x10b3   :  { %v3440_v1 = vrot.slane %v5608_v24, 6 }
0x10b4   :  { %v3441_v36 = vrot.slane %v5610_v10, 5 }
0x10b6   :  { %v3442_v16 = vsel %vm457_vm12, %v3441_v36, %v3440_v1 }
0x10b7   :  { %3829 = vmatmul.msk.f32.vlgmr.msrb.gmra.mxu2 %vm42_vm0, %v3442_v16  ;;  %3830 = vmatmul.msk.f32.vlgmr.msrb.gmra.mxu3 %vm42_vm0, %v3442_v16 }
0x10b8   :  { %3831 = vmatmul.msk.f32.vlgmr.msra.gmra.mxu0 %vm42_vm0, %v3442_v16 }
0x1135   :  { %v3502_v0 = vpop.f32.mrf.mxu0 }
0x1136   :  { %v3595_v53 = vadd.f32 %v3502_v0, %v5249_v22 }
0x1138   :  { %v3597_v49 = vrot.slane %v3595_v53, 1 }
0x113a   :  { %v3462_v29 = vpop.f32.mrf.mxu2  ;;  %v3482_v9 = vpop.f32.mrf.mxu3 }
0x113b   :  { %v3507_v8 = vrot.slane %v3462_v29, 1  ;;  %v3509_v26 = vrot.slane %v3462_v29, 2  ;;  %v3508_v12 = vrot.slane %v3482_v9, 1  ;;  %v3510_v18 = vrot.slane %v3482_v9, 2 }
0x113d   :  { %v3515_v38 = vadd.f32 %v3507_v8, %v5228_v2  ;;  %v3517_v54 = vadd.f32 %v3509_v26, %v5232_v63  ;;  %v3516_v47 = vadd.f32 %v3508_v12, %v5230_v39  ;;  %v3518_v40 = vadd.f32 %v3510_v18, %v5234_v14 }
0x113e   :  { %v3598_v8 = vrot.slane %v3595_v53, 2  ;;  %v3626_v53 = vsel %vm1759_vm13, %v5280_v37, %v5334_v6 }
0x113f   :  { %v3832_v61 = vmul.f32 -1.442695, %v3515_v38  ;;  %v3834_v34 = vmul.f32 -1.442695, %v3517_v54  ;;  %v3833_v58 = vmul.f32 -1.442695, %v3516_v47  ;;  %v3628_v6 = vsel %vm1762_vm15, %v3626_v53, %v5386_v3 }
0x1140   :  { %v3835_v52 = vmul.f32 -1.442695, %v3518_v40  ;;  %v2045_v3 = vsub.f32 %v5060_v41, %v5181_v55 }
0x1141   :  { %4164 = vpow2.f32 %v3832_v61 }
0x1142   :  { %4166 = vpow2.f32 %v3834_v34 }
0x1143   :  { %4168 = vpow2.f32 %v3833_v58 }
0x1144   :  { %4170 = vpow2.f32 %v3835_v52 }
0x1147   :  { %v4165_v33 = vpop.eup %4164 }
0x1148   :  { %v4167_v27 = vpop.eup %4166  ;;  %v3531_v11 = vadd.f32 1.0, %v4165_v33 }
0x1149   :  { %v4169_v25 = vpop.eup %4168  ;;  %v3533_v60 = vadd.f32 1.0, %v4167_v27 }
0x114a   :  { %v4171_v2 = vpop.eup %4170  ;;  %4172 = vrcp.f32 %v3531_v11  ;;  %v5625_v63 = vadd.f32 1.0, %v4169_v25  ;;  %v3546_v4 = vand.u32 2147483648, %v3531_v11  ;;  %v3544_v13 = vand.u32 2147483647, %v3531_v11 }
0x114b   :  { %4174 = vrcp.f32 %v3533_v60  ;;  %v5627_v39 = vadd.f32 1.0, %v4171_v2  ;;  %v3576_v48 = vand.u32 2147483648, %v3533_v60  ;;  %v3574_v21 = vand.u32 2147483647, %v3533_v60 }
0x114c   :  { %4176 = vrcp.f32 %v5625_v63  ;;  %vm3540_vm11 = vweird.f32 %v3531_v11  ;;  %v3547_v1 = vor.u32 1.1754944e-38, %v3546_v4  ;;  %vm3570_vm3 = vweird.f32 %v3533_v60 }
0x114d   :  { %4178 = vrcp.f32 %v5627_v39  ;;  %vm3545_vm4 = vcmp.eq.f32.partialorder %v3544_v13, 8.507059e+37  ;;  %v3577_v29 = vor.u32 1.1754944e-38, %v3576_v48  ;;  %vm3575_vm6 = vcmp.eq.f32.partialorder %v3574_v21, 8.507059e+37 }
0x114e   :  { %v3589_v0 = vand.u32 2147483647, %v5627_v39 }
0x1150   :  { %v4173_v14 = vpop.eup %4172 }
0x1151   :  { %v4175_v62 = vpop.eup %4174  ;;  %v3536_v15 = vmul.f32 %v4173_v14, %v3531_v11  ;;  %vm3541_vm12 = vweird.f32 %v4173_v14  ;;  %v3561_v11 = vand.u32 2147483648, %v5625_v63 }
0x1152   :  { %v3566_v56 = vmul.f32 %v4175_v62, %v3533_v60  ;;  %v5632_v31 = vpop.eup %4176  ;;  %vm3571_vm1 = vweird.f32 %v4175_v62  ;;  %vm3542_vm2 = vmor %vm3540_vm11, %vm3541_vm12  ;;  %v3591_v60 = vand.u32 2147483648, %v5627_v39 }
0x1153   :  { %v3537_v46 = vsub.f32 1.0, %v3536_v15  ;;  %v5634_v19 = vpop.eup %4178  ;;  %v3551_v36 = vmul.f32 %v5632_v31, %v5625_v63  ;;  %vm3572_vm5 = vmor %vm3570_vm3, %vm3571_vm1  ;;  %vm3556_vm8 = vweird.f32 %v5632_v31  ;;  %vm3555_vm1 = vweird.f32 %v5625_v63 }
0x1154   :  { %v3567_v59 = vsub.f32 1.0, %v3566_v56  ;;  %v3581_v9 = vmul.f32 %v5634_v19, %v5627_v39  ;;  %vm3586_vm12 = vweird.f32 %v5634_v19  ;;  %vm5652_vm11 = vmor %vm3555_vm1, %vm3556_vm8 }
0x1155   :  { %v3538_v23 = vmul.f32 %v4173_v14, %v3537_v46  ;;  %v3552_v47 = vsub.f32 1.0, %v3551_v36  ;;  %v3562_v46 = vor.u32 1.1754944e-38, %v3561_v11 }
0x1156   :  { %v3568_v50 = vmul.f32 %v4175_v62, %v3567_v59  ;;  %v3582_v61 = vsub.f32 1.0, %v3581_v9  ;;  %v3625_v59 = vsel %vm1759_vm13, %v5282_v43, %v5332_v51  ;;  %v3630_v43 = vsel %vm1765_vm7, %v3628_v6, %v5438_v42 }
0x1157   :  { %v3539_v35 = vadd.f32 %v4173_v14, %v3538_v23  ;;  %v3553_v58 = vmul.f32 %v5632_v31, %v3552_v47  ;;  %v3627_v13 = vsel %vm1762_vm15, %v3625_v59, %v5384_v30  ;;  %v3632_v30 = vsel %vm1768_vm9, %v3630_v43, %v5526_v32 }
0x1158   :  { %v3569_v22 = vadd.f32 %v4175_v62, %v3568_v50  ;;  %v3583_v52 = vmul.f32 %v5634_v19, %v3582_v61  ;;  %vm5721_vm13 = vcmask 1046528  }
0x1159   :  { %v3543_v16 = vsel %vm3542_vm2, %v4173_v14, %v3539_v35  ;;  %v3554_v33 = vadd.f32 %v5632_v31, %v3553_v58  ;;  %vm3585_vm2 = vweird.f32 %v5627_v39  ;;  %vm5722_vm15 = vmmov %vm5721_vm13 }
0x115a   :  { %v3548_v26 = vsel %vm3545_vm4, %v3547_v1, %v3543_v16  ;;  %v3573_v12 = vsel %vm3572_vm5, %v4175_v62, %v3569_v22  ;;  %v3584_v25 = vadd.f32 %v5634_v19, %v3583_v52  ;;  %vm5661_vm3 = vmor %vm3585_vm2, %vm3586_vm12  ;;  %vm3590_vm5 = vcmp.eq.f32.partialorder %v3589_v0, 8.507059e+37 }
0x115b   :  { %v3578_v18 = vsel %vm3575_vm6, %v3577_v29, %v3573_v12  ;;  %v3601_v38 = vmul.f32 %v3597_v49, %v3548_v26  ;;  %v3558_v15 = vsel %vm5652_vm11, %v5632_v31, %v3554_v33  ;;  %v3592_v31 = vor.u32 1.1754944e-38, %v3591_v60 }
0x115c   :  { %v3602_v54 = vmul.f32 %v3598_v8, %v3578_v18  ;;  %v3588_v39 = vsel %vm5661_vm3, %v5634_v19, %v3584_v25  ;;  %v3629_v19 = vsel %vm1765_vm7, %v3627_v13, %v5436_v5  ;;  %v3634_v22 = vsel %vm1771_vm10, %v3632_v30, %v5570_v17 }
0x115d   :  { %v3603_v40 = vadd.f32 %v3601_v38, %v5260_v7  ;;  %v3593_v50 = vsel %vm3590_vm5, %v3592_v31, %v3588_v39  ;;  %v3631_v51 = vsel %vm1768_vm9, %v3629_v19, %v5524_v45  ;;  %v2046_v45 = vsub.f32 %v5072_v28, %v5194_v57 }
0x115e   :  { %v3604_v34 = vadd.f32 %v3602_v54, %v5262_v20  ;;  %v3559_v20 = vand.u32 2147483647, %v5625_v63  ;;  %v3633_v1 = vsel %vm1771_vm10, %v3631_v51, %v5568_v44  ;;  %v3636_v32 = vsel %vm1774_vm14, %v3634_v22, %v5610_v10 }
0x115f   :  { %4180 = vtanh.f32 %v3603_v40  ;;  %v3635_v42 = vsel %vm1774_vm14, %v3633_v1, %v5608_v24 }
0x1160   :  { %4182 = vtanh.f32 %v3604_v34  ;;  %vm3560_vm4 = vcmp.eq.f32.partialorder %v3559_v20, 8.507059e+37 }
0x1161   :  { %v3563_v48 = vsel %vm3560_vm4, %v3562_v46, %v3558_v15 }
0x1165   :  { %v4181_v27 = vpop.eup %4180 }
0x1166   :  { %v4183_v7 = vpop.eup %4182  ;;  %v3609_v2 = vrot.slane %v4181_v27, 1 }
0x1167   :  { %v3610_v62 = vrot.slane %v4183_v7, 1 }
0x1168   :  { %v3613_v63 = vsub.f32 %v5608_v24, %v3609_v2 }
0x1169   :  { %v3614_v4 = vsub.f32 %v5610_v10, %v3610_v62 }
0x116a   :  { %v3617_v23 = vrot.slane %v3613_v63, 7 }
0x116b   :  { %v3618_v37 = vrot.slane %v3614_v4, 7 }
0x116c   :  { %v3621_v21 = vmul.f32 %v3617_v23, %v3563_v48 }
0x116d   :  { %v3622_v49 = vmul.f32 %v3618_v37, %v3593_v50 }
0x116e   :  { %v3623_v35 = vadd.f32 %v4181_v27, %v3621_v21 }
0x116f   :  { %v3624_v5 = vadd.f32 %v4183_v7, %v3622_v49 }
0x1170   :  { %v3637_v36 = vsel %vm5721_vm13, %v3635_v42, %v3623_v35 }
0x1171   :  { %v3638_v41 = vsel %vm5722_vm15, %v3636_v32, %v3624_v5  ;;  %v3639_v55 = vadd.f32 %v3637_v36, %v2045_v3 }
0x1172   :  { %v3640_v44 = vadd.f32 %v3638_v41, %v2046_v45 }
0x1173   :  { %v3641_v17 = vmul.f32 0.5, %v3639_v55 }
0x1174   :  { %v3642_v24 = vmul.f32 0.5, %v3640_v44 }
0x1175   :  { %3643 = vst.msk [vmem:[#allocation2] sm:$0xff] %vm42_vm0, %v3641_v17 }
0x1176   :  { %3644 = vst.msk [vmem:[#allocation2 + $0x8] sm:$0xff] %vm42_vm0, %v3642_v24 }
0x1177   :  { %3657 = dma.vmem_to_hbm [thread:$0]  %s3650_s11, 256, %s3652_s14, [#allocation3], %s4266_s15, %s4266_s15, %s4267_s16  }
0x1178   :  { %4258 = dma.done.wait [#allocation3], 256  }
0x1179   :  { %4259 = vsyncadd [#allocation3], 4294967040 }
0x117a   :  { %4260 = dma.done.wait [#allocation5], 32  }
0x117b   :  { %4261 = vsyncadd [#allocation5], 4294967264 }
0x117c   :  { %3677 = vsyncpa [#allocation3], 1 }
0x117d   :  { %3678 = vsyncpa [#allocation5], 1 }

</bundles_post_ra>
